<compile_context>
chip_gen: v7x
topology: tpu7x:2x2x1
jax: 0.10.0
libtpu: 0.0.40
codegen_flags: <defaults>
</compile_context>

<pallas_src>
import math
from functools import partial

import jax
import jax.numpy as jnp
import numpy as np
from jax.experimental import pallas as pl
from jax.experimental.pallas import tpu as pltpu


# ----------------------------- in-kernel helpers ---------------------------- #

_SQRT_HALF = 0.7071067811865476


def _erf_poly(x):
    # Abramowitz & Stegun 7.1.26 rational approximation, |err| < 1.5e-7.
    a1, a2, a3, a4, a5 = 0.254829592, -0.284496736, 1.421413741, -1.453152027, 1.061405429
    p = 0.3275911
    ax = jnp.abs(x)
    t = 1.0 / (1.0 + p * ax)
    poly = ((((a5 * t + a4) * t + a3) * t + a2) * t + a1) * t
    y = 1.0 - poly * jnp.exp(-ax * ax)
    return jnp.where(x < 0, -y, y)


def _gelu_exact(x):
    # Matches nn.GELU() (erf-based) to ~1e-7.
    return 0.5 * x * (1.0 + _erf_poly(x * _SQRT_HALF))


def _layernorm(t, g, b, eps):
    mu = jnp.mean(t, axis=-1, keepdims=True)
    c = t - mu
    var = jnp.mean(c * c, axis=-1, keepdims=True)
    return c * jax.lax.rsqrt(var + eps) * g + b


# ------------------------------- fused kernel ------------------------------- #
# One grid step == one (batch element, encoder layer). Layer weights are streamed
# by the BlockSpec pipeline; the residual stream is the revisited output block.

def encoder_layer_kernel(x_ref, cos_ref, sinlo_ref, sinhi_ref,
                         ln1g_ref, ln1b_ref, qkvw_ref, qkvb_ref,
                         projw_ref, projb_ref, ln2g_ref, ln2b_ref,
                         fc1w_ref, fc1b_ref, fc2w_ref, fc2b_ref,
                         out_ref, *, num_heads, head_dim, n_real, eps, approx_recip):
    C = num_heads * head_dim
    hd2 = head_dim // 2
    n_pad = x_ref.shape[-2]
    layer = pl.program_id(1)

    # Residual stream lives in the (revisited) output block across the layer axis.
    @pl.when(layer == 0)
    def _():
        out_ref[...] = x_ref[...]

    x = out_ref[...].astype(jnp.float32)                         # (Np, C)

    wdt = qkvw_ref.dtype
    mx = lambda t: t.astype(wdt)          # cast at the MXU boundary (no-op for f32 path)

    # ---------------- attention: x += proj(SDPA(RoPE(qkv(LN1(x))))) -----------------
    h1 = _layernorm(x, ln1g_ref[...], ln1b_ref[...], eps)
    qkv = jnp.dot(mx(h1), qkvw_ref[...], preferred_element_type=jnp.float32) + qkvb_ref[...]
    q = qkv[:, 0 * C:1 * C]
    k = qkv[:, 1 * C:2 * C]
    v = qkv[:, 2 * C:3 * C]

    # RoPE via two XLU lane-rolls.  Per-head boundaries, rotate-half sign and the
    # special/padded-token identity rows are all folded into the sin/cos tables
    # (sin_lo nonzero only on lower-half dims, sin_hi only on upper-half dims).
    cos = cos_ref[...]
    sin_lo = sinlo_ref[...]
    sin_hi = sinhi_ref[...]

    def rope(t):
        return (t * cos
                + pltpu.roll(t, C - hd2, axis=1) * sin_lo        # -> t[:, c + hd/2]
                + pltpu.roll(t, hd2, axis=1) * sin_hi)           # -> t[:, c - hd/2]

    q = rope(q)   # attention scale already folded into the q weight columns
    k = rope(k)

    if n_pad > n_real:   # mask padded key tokens out of every softmax row
        key_ids = jax.lax.broadcasted_iota(jnp.int32, (1, n_pad), 1)
        key_bias = jnp.where(key_ids >= n_real, jnp.float32(-1e30), jnp.float32(0.0))
    else:
        key_bias = None

    acc = jnp.zeros((n_pad, C), jnp.float32)
    for h in range(num_heads):            # static unroll; everything stays in VMEM/vregs
        lo = h * head_dim
        hi = lo + head_dim
        s = jax.lax.dot_general(mx(q[:, lo:hi]), mx(k[:, lo:hi]),
                                (((1,), (1,)), ((), ())),
                                preferred_element_type=jnp.float32)     # (Np, Np)
        if key_bias is not None:
            s = s + key_bias
        s = s - jnp.max(s, axis=-1, keepdims=True)
        p = jnp.exp(s)
        denom = jnp.sum(p, axis=-1, keepdims=True)
        inv = pl.reciprocal(denom, approx=True) if approx_recip else 1.0 / denom
        o = jnp.dot(mx(p), mx(v[:, lo:hi]), preferred_element_type=jnp.float32) * inv
        # Fold this head's output straight through the matching proj_w rows (no concat).
        acc = acc + jnp.dot(mx(o), projw_ref[lo:hi, :], preferred_element_type=jnp.float32)

    x = x + acc + projb_ref[...]

    # ---------------- MLP: x += fc2(GELU(fc1(LN2(x)))) ------------------------------
    h2 = _layernorm(x, ln2g_ref[...], ln2b_ref[...], eps)
    m = jnp.dot(mx(h2), fc1w_ref[...], preferred_element_type=jnp.float32) + fc1b_ref[...]
    m = _gelu_exact(m)
    x = x + jnp.dot(mx(m), fc2w_ref[...], preferred_element_type=jnp.float32) + fc2b_ref[...]

    out_ref[...] = x.astype(out_ref.dtype)


# ------------------------------ module wrapper ------------------------------ #

def rope_vit_encoder(x, rope, params, *, num_heads, num_special_tokens,
                     eps=1e-6, mxu_dtype=jnp.bfloat16, approx_recip=True):
    """Forward pass equivalent to Encoder.forward (eval mode, pre_norm=False)."""
    B, N, C = x.shape
    H = num_heads
    hd = C // H
    hd2 = hd // 2
    L = params["qkv_w"].shape[0]
    M = params["fc1_w"].shape[-1]
    n = num_special_tokens
    scale = hd ** (-0.5)

    # ---- pad tokens to a sublane multiple (padded keys masked in-kernel). ----------
    N_pad = ((N + 7) // 8) * 8
    xp = jnp.pad(x, ((0, 0), (0, N_pad - N), (0, 0))) if N_pad != N else x

    # ---- RoPE tables: identity rows for special/padded tokens, head-tiled to (N_pad, C).
    sin, cos = jnp.split(rope.astype(jnp.float32), 2, axis=-1)          # (N-n, hd) each
    sin = jnp.concatenate([jnp.zeros((n, hd), jnp.float32), sin,
                           jnp.zeros((N_pad - N, hd), jnp.float32)], axis=0)
    cos = jnp.concatenate([jnp.ones((n, hd), jnp.float32), cos,
                           jnp.ones((N_pad - N, hd), jnp.float32)], axis=0)
    sin_full = jnp.tile(sin, (1, H))                                    # (N_pad, C)
    cos_full = jnp.tile(cos, (1, H))
    lo_mask = jnp.tile(jnp.arange(hd) < hd2, (H,))[None, :]             # (1, C)
    sin_lo = jnp.where(lo_mask, -sin_full, 0.0)        # rotate-half sign folded in
    sin_hi = jnp.where(lo_mask, 0.0, sin_full)

    # ---- fold the attention scale into the q columns of the qkv projection. --------
    qscale = jnp.concatenate([jnp.full((C,), scale, jnp.float32),
                              jnp.ones((2 * C,), jnp.float32)])
    qkv_w = params["qkv_w"].astype(jnp.float32) * qscale
    qkv_b = params["qkv_b"].astype(jnp.float32) * qscale

    # ---- pre-cast big matmul weights to the MXU dtype (biases/LN stay f32). --------
    wdt = jnp.float32 if mxu_dtype is None else mxu_dtype
    qkv_w = qkv_w.astype(wdt)
    proj_w = params["proj_w"].astype(wdt)
    fc1_w = params["fc1_w"].astype(wdt)
    fc2_w = params["fc2_w"].astype(wdt)

    # ---- explicit VMEM budget: ~2-3 streamed layers of weights + activations. ------
    w_item = np.dtype(wdt).itemsize
    per_layer_w = (C * 3 * C + C * C + 2 * C * M) * w_item + (10 * C + 2 * M) * 4
    act_bytes = N_pad * (12 * C + 2 * M) * 4 + N_pad * N_pad * 4 + 3 * N_pad * C * 4
    vmem_limit = int(min(64 * 1024 * 1024,
                         max(32 * 1024 * 1024, 3 * per_layer_w + 4 * act_bytes)))

    tok = lambda: pl.BlockSpec((N_pad, C), lambda b, l: (0, 0))
    per_layer = lambda *s: pl.BlockSpec((None, *s), lambda b, l: (l,) + (0,) * len(s))

    kernel = partial(encoder_layer_kernel, num_heads=H, head_dim=hd, n_real=N,
                     eps=eps, approx_recip=approx_recip)

    out = pl.pallas_call(
        kernel,
        out_shape=jax.ShapeDtypeStruct((B, N_pad, C), x.dtype),
        grid=(B, L),                                   # batch parallel, layers streamed
        in_specs=[
            pl.BlockSpec((None, N_pad, C), lambda b, l: (b, 0, 0)),   # x (one batch elem)
            tok(), tok(), tok(),                                      # cos, sin_lo, sin_hi
            per_layer(1, C), per_layer(1, C),                         # ln1 gamma / beta
            per_layer(C, 3 * C), per_layer(1, 3 * C),                 # qkv W / b (scaled q)
            per_layer(C, C), per_layer(1, C),                         # proj W / b
            per_layer(1, C), per_layer(1, C),                         # ln2 gamma / beta
            per_layer(C, M), per_layer(1, M),                         # fc1 W / b
            per_layer(M, C), per_layer(1, C),                         # fc2 W / b
        ],
        out_specs=pl.BlockSpec((None, N_pad, C), lambda b, l: (b, 0, 0)),
        compiler_params=pltpu.CompilerParams(
            dimension_semantics=("parallel", "arbitrary"),
            vmem_limit_bytes=vmem_limit),
    )(xp, cos_full, sin_lo, sin_hi,
      params["ln1_g"], params["ln1_b"], qkv_w, qkv_b,
      proj_w, params["proj_b"], params["ln2_g"], params["ln2_b"],
      fc1_w, params["fc1_b"], fc2_w, params["fc2_b"])

    return out[:, :N, :] if N_pad != N else out


# ----------------------------- pure-JAX reference --------------------------- #

def reference(x, rope, params, num_heads, num_special_tokens, eps=1e-6):
    B, N, C = x.shape
    H = num_heads
    hd = C // H
    L = params["qkv_w"].shape[0]
    n = num_special_tokens
    scale = hd ** (-0.5)
    sin, cos = jnp.split(rope, 2, axis=-1)

    def ln(t, g, b):
        mu = jnp.mean(t, axis=-1, keepdims=True)
        var = jnp.mean((t - mu) ** 2, axis=-1, keepdims=True)
        return (t - mu) / jnp.sqrt(var + eps) * g + b

    def rope_apply(t):                                   # (B, H, P, hd)
        t1, t2 = jnp.split(t, 2, axis=-1)
        return t * cos + jnp.concatenate([-t2, t1], axis=-1) * sin

    for l in range(L):
        h = ln(x, params["ln1_g"][l, 0], params["ln1_b"][l, 0])
        qkv = h @ params["qkv_w"][l] + params["qkv_b"][l, 0]
        qkv = qkv.reshape(B, N, 3, H, hd).transpose(2, 0, 3, 1, 4)
        q, k, v = qkv[0], qkv[1], qkv[2]
        q = jnp.concatenate([q[:, :, :n], rope_apply(q[:, :, n:])], axis=2)
        k = jnp.concatenate([k[:, :, :n], rope_apply(k[:, :, n:])], axis=2)
        s = jnp.einsum("bhqd,bhkd->bhqk", q, k) * scale
        a = jax.nn.softmax(s, axis=-1)
        o = jnp.einsum("bhqk,bhkd->bhqd", a, v).transpose(0, 2, 1, 3).reshape(B, N, C)
        x = x + o @ params["proj_w"][l] + params["proj_b"][l, 0]
        h2 = ln(x, params["ln2_g"][l, 0], params["ln2_b"][l, 0])
        m = jax.nn.gelu(h2 @ params["fc1_w"][l] + params["fc1_b"][l, 0], approximate=False)
        x = x + m @ params["fc2_w"][l] + params["fc2_b"][l, 0]
    return x


# ----------------------------------- main ----------------------------------- #

if __name__ == "__main__":
    B = 2
    H, hd = 8, 16
    C = H * hd                 # hidden_dim = 128 (lane-aligned)
    M = 4 * C                  # mlp_dim = 512
    L = 3                      # num_layers (streamed via the grid)
    n_special = 1
    n_patches = 17
    N = n_special + n_patches  # 18 tokens -> padded to 24 inside the wrapper

    key = jax.random.PRNGKey(0)
    ks = iter(jax.random.split(key, 20))

    x = jax.random.normal(next(ks), (B, N, C), jnp.float32)

    # rope: (num_patches, 2*head_dim) = [sin | cos], standard (non-interleaved) layout.
    pos = jnp.arange(n_patches, dtype=jnp.float32)[:, None]
    inv_freq = 1.0 / (100.0 ** (jnp.arange(0, hd, 2, dtype=jnp.float32) / hd))
    ang = pos * inv_freq[None, :]
    ang = jnp.concatenate([ang, ang], axis=-1)
    rope = jnp.concatenate([jnp.sin(ang), jnp.cos(ang)], axis=-1)       # (P, 2*hd)

    def unif(k, shape, fan_in):
        bound = 1.0 / math.sqrt(fan_in)
        return jax.random.uniform(k, shape, jnp.float32, -bound, bound)

    params = {
        "ln1_g": 1.0 + 0.1 * jax.random.normal(next(ks), (L, 1, C), jnp.float32),
        "ln1_b": 0.05 * jax.random.normal(next(ks), (L, 1, C), jnp.float32),
        "qkv_w": unif(next(ks), (L, C, 3 * C), C),
        "qkv_b": unif(next(ks), (L, 1, 3 * C), C),
        "proj_w": unif(next(ks), (L, C, C), C),
        "proj_b": unif(next(ks), (L, 1, C), C),
        "ln2_g": 1.0 + 0.1 * jax.random.normal(next(ks), (L, 1, C), jnp.float32),
        "ln2_b": 0.05 * jax.random.normal(next(ks), (L, 1, C), jnp.float32),
        "fc1_w": unif(next(ks), (L, C, M), C),
        "fc1_b": unif(next(ks), (L, 1, M), C),
        "fc2_w": unif(next(ks), (L, M, C), M),
        "fc2_b": unif(next(ks), (L, 1, C), M),
    }

    ref = reference(x, rope, params, H, n_special)

    # Exact path: f32 MXU operands, exact reciprocal (tight correctness check).
    out = rope_vit_encoder(x, rope, params, num_heads=H, num_special_tokens=n_special,
                           mxu_dtype=None, approx_recip=False)
    out = jax.block_until_ready(out)
    assert out.shape == (B, N, C)
    np.testing.assert_allclose(np.asarray(out), np.asarray(ref), rtol=5e-4, atol=5e-4)

    # Default fast path: bf16 weights/operands at every MXU boundary + EUP approx recip.
    out_fast = rope_vit_encoder(x, rope, params, num_heads=H, num_special_tokens=n_special)
    out_fast = jax.block_until_ready(out_fast)
    np.testing.assert_allclose(np.asarray(out_fast), np.asarray(ref), rtol=1e-1, atol=1e-1)

    print("KERNEL_OK")
</pallas_src>

<mosaic_0001>
module attributes {stable_mosaic.version = 11 : i64} {
  func.func @encoder_layer_kernel(%arg0: i32, %arg1: i32, %arg2: memref<1x24x128xf32, #tpu.memory_space<vmem>>, %arg3: memref<24x128xf32, #tpu.memory_space<vmem>>, %arg4: memref<24x128xf32, #tpu.memory_space<vmem>>, %arg5: memref<24x128xf32, #tpu.memory_space<vmem>>, %arg6: memref<1x1x128xf32, #tpu.memory_space<vmem>>, %arg7: memref<1x1x128xf32, #tpu.memory_space<vmem>>, %arg8: memref<1x128x384xf32, #tpu.memory_space<vmem>>, %arg9: memref<1x1x384xf32, #tpu.memory_space<vmem>>, %arg10: memref<1x128x128xf32, #tpu.memory_space<vmem>>, %arg11: memref<1x1x128xf32, #tpu.memory_space<vmem>>, %arg12: memref<1x1x128xf32, #tpu.memory_space<vmem>>, %arg13: memref<1x1x128xf32, #tpu.memory_space<vmem>>, %arg14: memref<1x128x512xf32, #tpu.memory_space<vmem>>, %arg15: memref<1x1x512xf32, #tpu.memory_space<vmem>>, %arg16: memref<1x512x128xf32, #tpu.memory_space<vmem>>, %arg17: memref<1x1x128xf32, #tpu.memory_space<vmem>>, %arg18: memref<1x24x128xf32, #tpu.memory_space<vmem>>) attributes {dimension_semantics = [#tpu.dimension_semantics<parallel>, #tpu.dimension_semantics<arbitrary>], iteration_bounds = array<i64: 2, 3>, scalar_prefetch = 0 : i64, scratch_operands = 0 : i64, tpu.core_type = #tpu.core_type<tc>, window_params = [{transform_indices = @transform_0, window_bounds = array<i64: 1, 24, 128>}, {pipeline_mode = #tpu.pipeline_mode<synchronous>, transform_indices = @transform_1, window_bounds = array<i64: 24, 128>}, {pipeline_mode = #tpu.pipeline_mode<synchronous>, transform_indices = @transform_2, window_bounds = array<i64: 24, 128>}, {pipeline_mode = #tpu.pipeline_mode<synchronous>, transform_indices = @transform_3, window_bounds = array<i64: 24, 128>}, {transform_indices = @transform_4, window_bounds = array<i64: 1, 1, 128>}, {transform_indices = @transform_5, window_bounds = array<i64: 1, 1, 128>}, {transform_indices = @transform_6, window_bounds = array<i64: 1, 128, 384>}, {transform_indices = @transform_7, window_bounds = array<i64: 1, 1, 384>}, {transform_indices = @transform_8, window_bounds = array<i64: 1, 128, 128>}, {transform_indices = @transform_9, window_bounds = array<i64: 1, 1, 128>}, {transform_indices = @transform_10, window_bounds = array<i64: 1, 1, 128>}, {transform_indices = @transform_11, window_bounds = array<i64: 1, 1, 128>}, {transform_indices = @transform_12, window_bounds = array<i64: 1, 128, 512>}, {transform_indices = @transform_13, window_bounds = array<i64: 1, 1, 512>}, {transform_indices = @transform_14, window_bounds = array<i64: 1, 512, 128>}, {transform_indices = @transform_15, window_bounds = array<i64: 1, 1, 128>}, {transform_indices = @transform_16, window_bounds = array<i64: 1, 24, 128>}]} {
    %c0_i32 = arith.constant 0 : i32
    %0 = arith.cmpi eq, %arg1, %c0_i32 : i32
    %1 = arith.extui %0 : i1 to i32
    %c0_i32_0 = arith.constant 0 : i32
    %2 = arith.cmpi ne, %1, %c0_i32_0 : i32
    scf.if %2 {
      %c0_142 = arith.constant 0 : index
      %c0_143 = arith.constant 0 : index
      %c0_144 = arith.constant 0 : index
      %326 = vector.load %arg2[%c0_142, %c0_143, %c0_144] : memref<1x24x128xf32, #tpu.memory_space<vmem>>, vector<1x24x128xf32>
      %327 = vector.shape_cast %326 : vector<1x24x128xf32> to vector<24x128xf32>
      %c0_145 = arith.constant 0 : index
      %c0_146 = arith.constant 0 : index
      %c0_147 = arith.constant 0 : index
      %328 = vector.load %arg18[%c0_145, %c0_146, %c0_147] : memref<1x24x128xf32, #tpu.memory_space<vmem>>, vector<1x24x128xf32>
      %329 = vector.shape_cast %328 : vector<1x24x128xf32> to vector<24x128xf32>
      %330 = vector.shape_cast %327 : vector<24x128xf32> to vector<1x24x128xf32>
      tpu.vector_store %arg18[%c0_145, %c0_146, %c0_147], %330 {strides = array<i32>} : memref<1x24x128xf32, #tpu.memory_space<vmem>>, vector<1x24x128xf32>,
    } else {
    }
    %c0 = arith.constant 0 : index
    %c0_1 = arith.constant 0 : index
    %c0_2 = arith.constant 0 : index
    %3 = vector.load %arg18[%c0, %c0_1, %c0_2] : memref<1x24x128xf32, #tpu.memory_space<vmem>>, vector<1x24x128xf32>
    %4 = vector.shape_cast %3 : vector<1x24x128xf32> to vector<24x128xf32>
    %c0_3 = arith.constant 0 : index
    %c0_4 = arith.constant 0 : index
    %c0_5 = arith.constant 0 : index
    %5 = vector.load %arg6[%c0_3, %c0_4, %c0_5] : memref<1x1x128xf32, #tpu.memory_space<vmem>>, vector<1x1x128xf32>
    %6 = vector.shape_cast %5 : vector<1x1x128xf32> to vector<1x128xf32>
    %c0_6 = arith.constant 0 : index
    %c0_7 = arith.constant 0 : index
    %c0_8 = arith.constant 0 : index
    %7 = vector.load %arg7[%c0_6, %c0_7, %c0_8] : memref<1x1x128xf32, #tpu.memory_space<vmem>>, vector<1x1x128xf32>
    %8 = vector.shape_cast %7 : vector<1x1x128xf32> to vector<1x128xf32>
    %cst = arith.constant dense<0.000000e+00> : vector<24xf32>
    %9 = vector.multi_reduction <add>, %4, %cst [1] : vector<24x128xf32> to vector<24xf32>
    %10 = vector.shape_cast %9 : vector<24xf32> to vector<24x1xf32>
    %cst_9 = arith.constant 1.280000e+02 : f32
    %11 = vector.broadcast %cst_9 : f32 to vector<24x1xf32>
    %12 = arith.divf %10, %11 : vector<24x1xf32>
    %13 = vector.broadcast %12 : vector<24x1xf32> to vector<24x128xf32>
    %14 = arith.subf %4, %13 : vector<24x128xf32>
    %15 = arith.mulf %14, %14 : vector<24x128xf32>
    %cst_10 = arith.constant dense<0.000000e+00> : vector<24xf32>
    %16 = vector.multi_reduction <add>, %15, %cst_10 [1] : vector<24x128xf32> to vector<24xf32>
    %17 = vector.shape_cast %16 : vector<24xf32> to vector<24x1xf32>
    %cst_11 = arith.constant 1.280000e+02 : f32
    %18 = vector.broadcast %cst_11 : f32 to vector<24x1xf32>
    %19 = arith.divf %17, %18 : vector<24x1xf32>
    %cst_12 = arith.constant 9.99999997E-7 : f32
    %20 = vector.broadcast %cst_12 : f32 to vector<24x1xf32>
    %21 = arith.addf %19, %20 : vector<24x1xf32>
    %22 = math.rsqrt %21 : vector<24x1xf32>
    %23 = vector.broadcast %22 : vector<24x1xf32> to vector<24x128xf32>
    %24 = arith.mulf %14, %23 : vector<24x128xf32>
    %25 = vector.broadcast %6 : vector<1x128xf32> to vector<24x128xf32>
    %26 = arith.mulf %24, %25 : vector<24x128xf32>
    %27 = vector.broadcast %8 : vector<1x128xf32> to vector<24x128xf32>
    %28 = arith.addf %26, %27 : vector<24x128xf32>
    %c0_13 = arith.constant 0 : index
    %c0_14 = arith.constant 0 : index
    %c0_15 = arith.constant 0 : index
    %29 = vector.load %arg8[%c0_13, %c0_14, %c0_15] : memref<1x128x384xf32, #tpu.memory_space<vmem>>, vector<1x128x384xf32>
    %30 = vector.shape_cast %29 : vector<1x128x384xf32> to vector<128x384xf32>
    %cst_16 = arith.constant dense<0.000000e+00> : vector<24x384xf32>
    %31 = tpu.matmul %28, %30, %cst_16 {dimension_numbers = #tpu.dot_dimension_numbers<[1], [0], [0], [1], [0, 0, 1, 1], [], []>} : vector<24x128xf32>, vector<128x384xf32>, vector<24x384xf32> -> vector<24x384xf32>
    %c0_17 = arith.constant 0 : index
    %c0_18 = arith.constant 0 : index
    %c0_19 = arith.constant 0 : index
    %32 = vector.load %arg9[%c0_17, %c0_18, %c0_19] : memref<1x1x384xf32, #tpu.memory_space<vmem>>, vector<1x1x384xf32>
    %33 = vector.shape_cast %32 : vector<1x1x384xf32> to vector<1x384xf32>
    %34 = vector.broadcast %33 : vector<1x384xf32> to vector<24x384xf32>
    %35 = arith.addf %31, %34 : vector<24x384xf32>
    %36 = vector.extract_strided_slice %35 {offsets = [0, 0], sizes = [24, 128], strides = [1, 1]} : vector<24x384xf32> to vector<24x128xf32>
    %37 = vector.extract_strided_slice %35 {offsets = [0, 128], sizes = [24, 128], strides = [1, 1]} : vector<24x384xf32> to vector<24x128xf32>
    %38 = vector.extract_strided_slice %35 {offsets = [0, 256], sizes = [24, 128], strides = [1, 1]} : vector<24x384xf32> to vector<24x128xf32>
    %c0_20 = arith.constant 0 : index
    %c0_21 = arith.constant 0 : index
    %39 = vector.load %arg3[%c0_20, %c0_21] : memref<24x128xf32, #tpu.memory_space<vmem>>, vector<24x128xf32>
    %c0_22 = arith.constant 0 : index
    %c0_23 = arith.constant 0 : index
    %40 = vector.load %arg4[%c0_22, %c0_23] : memref<24x128xf32, #tpu.memory_space<vmem>>, vector<24x128xf32>
    %c0_24 = arith.constant 0 : index
    %c0_25 = arith.constant 0 : index
    %41 = vector.load %arg5[%c0_24, %c0_25] : memref<24x128xf32, #tpu.memory_space<vmem>>, vector<24x128xf32>
    %42 = arith.mulf %36, %39 : vector<24x128xf32>
    %c120_i32 = arith.constant 120 : i32
    %43 = tpu.dynamic_rotate %36 by %c120_i32 dim 1 : vector<24x128xf32>, i32 -> vector<24x128xf32>
    %44 = arith.mulf %43, %40 : vector<24x128xf32>
    %45 = arith.addf %42, %44 : vector<24x128xf32>
    %c8_i32 = arith.constant 8 : i32
    %46 = tpu.dynamic_rotate %36 by %c8_i32 dim 1 : vector<24x128xf32>, i32 -> vector<24x128xf32>
    %47 = arith.mulf %46, %41 : vector<24x128xf32>
    %48 = arith.addf %45, %47 : vector<24x128xf32>
    %49 = arith.mulf %37, %39 : vector<24x128xf32>
    %c120_i32_26 = arith.constant 120 : i32
    %50 = tpu.dynamic_rotate %37 by %c120_i32_26 dim 1 : vector<24x128xf32>, i32 -> vector<24x128xf32>
    %51 = arith.mulf %50, %40 : vector<24x128xf32>
    %52 = arith.addf %49, %51 : vector<24x128xf32>
    %c8_i32_27 = arith.constant 8 : i32
    %53 = tpu.dynamic_rotate %37 by %c8_i32_27 dim 1 : vector<24x128xf32>, i32 -> vector<24x128xf32>
    %54 = arith.mulf %53, %41 : vector<24x128xf32>
    %55 = arith.addf %52, %54 : vector<24x128xf32>
    %56 = tpu.iota {dimensions = array<i32: 1>} : vector<1x24xi32>
    %c18_i32 = arith.constant 18 : i32
    %57 = vector.broadcast %c18_i32 : i32 to vector<1x24xi32>
    %58 = arith.cmpi sge, %56, %57 : vector<1x24xi32>
    %cst_28 = arith.constant -1.000000e+30 : f32
    %cst_29 = arith.constant 0.000000e+00 : f32
    %59 = vector.broadcast %cst_28 : f32 to vector<1x24xf32>
    %60 = vector.broadcast %cst_29 : f32 to vector<1x24xf32>
    %61 = arith.select %58, %59, %60 : vector<1x24xi1>, vector<1x24xf32>
    %cst_30 = arith.constant 0.000000e+00 : f32
    %62 = vector.broadcast %cst_30 : f32 to vector<24x128xf32>
    %63 = vector.extract_strided_slice %48 {offsets = [0, 0], sizes = [24, 16], strides = [1, 1]} : vector<24x128xf32> to vector<24x16xf32>
    %64 = vector.extract_strided_slice %55 {offsets = [0, 0], sizes = [24, 16], strides = [1, 1]} : vector<24x128xf32> to vector<24x16xf32>
    %cst_31 = arith.constant dense<0.000000e+00> : vector<24x24xf32>
    %65 = tpu.matmul %63, %64, %cst_31 {dimension_numbers = #tpu.dot_dimension_numbers<[1], [1], [0], [0], [0, 0, 1, 0], [], []>} : vector<24x16xf32>, vector<24x16xf32>, vector<24x24xf32> -> vector<24x24xf32>
    %66 = vector.broadcast %61 : vector<1x24xf32> to vector<24x24xf32>
    %67 = arith.addf %65, %66 : vector<24x24xf32>
    %cst_32 = arith.constant dense<0xFF800000> : vector<24xf32>
    %68 = vector.multi_reduction <maximumf>, %67, %cst_32 [1] : vector<24x24xf32> to vector<24xf32>
    %69 = vector.shape_cast %68 : vector<24xf32> to vector<24x1xf32>
    %70 = vector.broadcast %69 : vector<24x1xf32> to vector<24x24xf32>
    %71 = arith.subf %67, %70 : vector<24x24xf32>
    %72 = math.exp %71 : vector<24x24xf32>
    %cst_33 = arith.constant dense<0.000000e+00> : vector<24xf32>
    %73 = vector.multi_reduction <add>, %72, %cst_33 [1] : vector<24x24xf32> to vector<24xf32>
    %74 = vector.shape_cast %73 : vector<24xf32> to vector<24x1xf32>
    %cst_34 = arith.constant 1.000000e+00 : f32
    %75 = vector.broadcast %cst_34 : f32 to vector<24x1xf32>
    %76 = arith.divf %75, %74 : vector<24x1xf32>
    %77 = vector.extract_strided_slice %38 {offsets = [0, 0], sizes = [24, 16], strides = [1, 1]} : vector<24x128xf32> to vector<24x16xf32>
    %cst_35 = arith.constant dense<0.000000e+00> : vector<24x16xf32>
    %78 = tpu.matmul %72, %77, %cst_35 {dimension_numbers = #tpu.dot_dimension_numbers<[1], [0], [0], [1], [0, 0, 1, 1], [], []>} : vector<24x24xf32>, vector<24x16xf32>, vector<24x16xf32> -> vector<24x16xf32>
    %79 = vector.broadcast %76 : vector<24x1xf32> to vector<24x16xf32>
    %80 = arith.mulf %78, %79 : vector<24x16xf32>
    %c0_36 = arith.constant 0 : index
    %c0_37 = arith.constant 0 : index
    %c0_38 = arith.constant 0 : index
    %81 = vector.load %arg10[%c0_36, %c0_37, %c0_38] : memref<1x128x128xf32, #tpu.memory_space<vmem>>, vector<1x16x128xf32>
    %82 = vector.shape_cast %81 : vector<1x16x128xf32> to vector<16x128xf32>
    %cst_39 = arith.constant dense<0.000000e+00> : vector<24x128xf32>
    %83 = tpu.matmul %80, %82, %cst_39 {dimension_numbers = #tpu.dot_dimension_numbers<[1], [0], [0], [1], [0, 0, 1, 1], [], []>} : vector<24x16xf32>, vector<16x128xf32>, vector<24x128xf32> -> vector<24x128xf32>
    %84 = arith.addf %62, %83 : vector<24x128xf32>
    %85 = vector.extract_strided_slice %48 {offsets = [0, 16], sizes = [24, 16], strides = [1, 1]} : vector<24x128xf32> to vector<24x16xf32>
    %86 = vector.extract_strided_slice %55 {offsets = [0, 16], sizes = [24, 16], strides = [1, 1]} : vector<24x128xf32> to vector<24x16xf32>
    %cst_40 = arith.constant dense<0.000000e+00> : vector<24x24xf32>
    %87 = tpu.matmul %85, %86, %cst_40 {dimension_numbers = #tpu.dot_dimension_numbers<[1], [1], [0], [0], [0, 0, 1, 0], [], []>} : vector<24x16xf32>, vector<24x16xf32>, vector<24x24xf32> -> vector<24x24xf32>
    %88 = vector.broadcast %61 : vector<1x24xf32> to vector<24x24xf32>
    %89 = arith.addf %87, %88 : vector<24x24xf32>
    %cst_41 = arith.constant dense<0xFF800000> : vector<24xf32>
    %90 = vector.multi_reduction <maximumf>, %89, %cst_41 [1] : vector<24x24xf32> to vector<24xf32>
    %91 = vector.shape_cast %90 : vector<24xf32> to vector<24x1xf32>
    %92 = vector.broadcast %91 : vector<24x1xf32> to vector<24x24xf32>
    %93 = arith.subf %89, %92 : vector<24x24xf32>
    %94 = math.exp %93 : vector<24x24xf32>
    %cst_42 = arith.constant dense<0.000000e+00> : vector<24xf32>
    %95 = vector.multi_reduction <add>, %94, %cst_42 [1] : vector<24x24xf32> to vector<24xf32>
    %96 = vector.shape_cast %95 : vector<24xf32> to vector<24x1xf32>
    %cst_43 = arith.constant 1.000000e+00 : f32
    %97 = vector.broadcast %cst_43 : f32 to vector<24x1xf32>
    %98 = arith.divf %97, %96 : vector<24x1xf32>
    %99 = vector.extract_strided_slice %38 {offsets = [0, 16], sizes = [24, 16], strides = [1, 1]} : vector<24x128xf32> to vector<24x16xf32>
    %cst_44 = arith.constant dense<0.000000e+00> : vector<24x16xf32>
    %100 = tpu.matmul %94, %99, %cst_44 {dimension_numbers = #tpu.dot_dimension_numbers<[1], [0], [0], [1], [0, 0, 1, 1], [], []>} : vector<24x24xf32>, vector<24x16xf32>, vector<24x16xf32> -> vector<24x16xf32>
    %101 = vector.broadcast %98 : vector<24x1xf32> to vector<24x16xf32>
    %102 = arith.mulf %100, %101 : vector<24x16xf32>
    %c0_45 = arith.constant 0 : index
    %c16 = arith.constant 16 : index
    %c0_46 = arith.constant 0 : index
    %103 = vector.load %arg10[%c0_45, %c16, %c0_46] : memref<1x128x128xf32, #tpu.memory_space<vmem>>, vector<1x16x128xf32>
    %104 = vector.shape_cast %103 : vector<1x16x128xf32> to vector<16x128xf32>
    %cst_47 = arith.constant dense<0.000000e+00> : vector<24x128xf32>
    %105 = tpu.matmul %102, %104, %cst_47 {dimension_numbers = #tpu.dot_dimension_numbers<[1], [0], [0], [1], [0, 0, 1, 1], [], []>} : vector<24x16xf32>, vector<16x128xf32>, vector<24x128xf32> -> vector<24x128xf32>
    %106 = arith.addf %84, %105 : vector<24x128xf32>
    %107 = vector.extract_strided_slice %48 {offsets = [0, 32], sizes = [24, 16], strides = [1, 1]} : vector<24x128xf32> to vector<24x16xf32>
    %108 = vector.extract_strided_slice %55 {offsets = [0, 32], sizes = [24, 16], strides = [1, 1]} : vector<24x128xf32> to vector<24x16xf32>
    %cst_48 = arith.constant dense<0.000000e+00> : vector<24x24xf32>
    %109 = tpu.matmul %107, %108, %cst_48 {dimension_numbers = #tpu.dot_dimension_numbers<[1], [1], [0], [0], [0, 0, 1, 0], [], []>} : vector<24x16xf32>, vector<24x16xf32>, vector<24x24xf32> -> vector<24x24xf32>
    %110 = vector.broadcast %61 : vector<1x24xf32> to vector<24x24xf32>
    %111 = arith.addf %109, %110 : vector<24x24xf32>
    %cst_49 = arith.constant dense<0xFF800000> : vector<24xf32>
    %112 = vector.multi_reduction <maximumf>, %111, %cst_49 [1] : vector<24x24xf32> to vector<24xf32>
    %113 = vector.shape_cast %112 : vector<24xf32> to vector<24x1xf32>
    %114 = vector.broadcast %113 : vector<24x1xf32> to vector<24x24xf32>
    %115 = arith.subf %111, %114 : vector<24x24xf32>
    %116 = math.exp %115 : vector<24x24xf32>
    %cst_50 = arith.constant dense<0.000000e+00> : vector<24xf32>
    %117 = vector.multi_reduction <add>, %116, %cst_50 [1] : vector<24x24xf32> to vector<24xf32>
    %118 = vector.shape_cast %117 : vector<24xf32> to vector<24x1xf32>
    %cst_51 = arith.constant 1.000000e+00 : f32
    %119 = vector.broadcast %cst_51 : f32 to vector<24x1xf32>
    %120 = arith.divf %119, %118 : vector<24x1xf32>
    %121 = vector.extract_strided_slice %38 {offsets = [0, 32], sizes = [24, 16], strides = [1, 1]} : vector<24x128xf32> to vector<24x16xf32>
    %cst_52 = arith.constant dense<0.000000e+00> : vector<24x16xf32>
    %122 = tpu.matmul %116, %121, %cst_52 {dimension_numbers = #tpu.dot_dimension_numbers<[1], [0], [0], [1], [0, 0, 1, 1], [], []>} : vector<24x24xf32>, vector<24x16xf32>, vector<24x16xf32> -> vector<24x16xf32>
    %123 = vector.broadcast %120 : vector<24x1xf32> to vector<24x16xf32>
    %124 = arith.mulf %122, %123 : vector<24x16xf32>
    %c0_53 = arith.constant 0 : index
    %c32 = arith.constant 32 : index
    %c0_54 = arith.constant 0 : index
    %125 = vector.load %arg10[%c0_53, %c32, %c0_54] : memref<1x128x128xf32, #tpu.memory_space<vmem>>, vector<1x16x128xf32>
    %126 = vector.shape_cast %125 : vector<1x16x128xf32> to vector<16x128xf32>
    %cst_55 = arith.constant dense<0.000000e+00> : vector<24x128xf32>
    %127 = tpu.matmul %124, %126, %cst_55 {dimension_numbers = #tpu.dot_dimension_numbers<[1], [0], [0], [1], [0, 0, 1, 1], [], []>} : vector<24x16xf32>, vector<16x128xf32>, vector<24x128xf32> -> vector<24x128xf32>
    %128 = arith.addf %106, %127 : vector<24x128xf32>
    %129 = vector.extract_strided_slice %48 {offsets = [0, 48], sizes = [24, 16], strides = [1, 1]} : vector<24x128xf32> to vector<24x16xf32>
    %130 = vector.extract_strided_slice %55 {offsets = [0, 48], sizes = [24, 16], strides = [1, 1]} : vector<24x128xf32> to vector<24x16xf32>
    %cst_56 = arith.constant dense<0.000000e+00> : vector<24x24xf32>
    %131 = tpu.matmul %129, %130, %cst_56 {dimension_numbers = #tpu.dot_dimension_numbers<[1], [1], [0], [0], [0, 0, 1, 0], [], []>} : vector<24x16xf32>, vector<24x16xf32>, vector<24x24xf32> -> vector<24x24xf32>
    %132 = vector.broadcast %61 : vector<1x24xf32> to vector<24x24xf32>
    %133 = arith.addf %131, %132 : vector<24x24xf32>
    %cst_57 = arith.constant dense<0xFF800000> : vector<24xf32>
    %134 = vector.multi_reduction <maximumf>, %133, %cst_57 [1] : vector<24x24xf32> to vector<24xf32>
    %135 = vector.shape_cast %134 : vector<24xf32> to vector<24x1xf32>
    %136 = vector.broadcast %135 : vector<24x1xf32> to vector<24x24xf32>
    %137 = arith.subf %133, %136 : vector<24x24xf32>
    %138 = math.exp %137 : vector<24x24xf32>
    %cst_58 = arith.constant dense<0.000000e+00> : vector<24xf32>
    %139 = vector.multi_reduction <add>, %138, %cst_58 [1] : vector<24x24xf32> to vector<24xf32>
    %140 = vector.shape_cast %139 : vector<24xf32> to vector<24x1xf32>
    %cst_59 = arith.constant 1.000000e+00 : f32
    %141 = vector.broadcast %cst_59 : f32 to vector<24x1xf32>
    %142 = arith.divf %141, %140 : vector<24x1xf32>
    %143 = vector.extract_strided_slice %38 {offsets = [0, 48], sizes = [24, 16], strides = [1, 1]} : vector<24x128xf32> to vector<24x16xf32>
    %cst_60 = arith.constant dense<0.000000e+00> : vector<24x16xf32>
    %144 = tpu.matmul %138, %143, %cst_60 {dimension_numbers = #tpu.dot_dimension_numbers<[1], [0], [0], [1], [0, 0, 1, 1], [], []>} : vector<24x24xf32>, vector<24x16xf32>, vector<24x16xf32> -> vector<24x16xf32>
    %145 = vector.broadcast %142 : vector<24x1xf32> to vector<24x16xf32>
    %146 = arith.mulf %144, %145 : vector<24x16xf32>
    %c0_61 = arith.constant 0 : index
    %c48 = arith.constant 48 : index
    %c0_62 = arith.constant 0 : index
    %147 = vector.load %arg10[%c0_61, %c48, %c0_62] : memref<1x128x128xf32, #tpu.memory_space<vmem>>, vector<1x16x128xf32>
    %148 = vector.shape_cast %147 : vector<1x16x128xf32> to vector<16x128xf32>
    %cst_63 = arith.constant dense<0.000000e+00> : vector<24x128xf32>
    %149 = tpu.matmul %146, %148, %cst_63 {dimension_numbers = #tpu.dot_dimension_numbers<[1], [0], [0], [1], [0, 0, 1, 1], [], []>} : vector<24x16xf32>, vector<16x128xf32>, vector<24x128xf32> -> vector<24x128xf32>
    %150 = arith.addf %128, %149 : vector<24x128xf32>
    %151 = vector.extract_strided_slice %48 {offsets = [0, 64], sizes = [24, 16], strides = [1, 1]} : vector<24x128xf32> to vector<24x16xf32>
    %152 = vector.extract_strided_slice %55 {offsets = [0, 64], sizes = [24, 16], strides = [1, 1]} : vector<24x128xf32> to vector<24x16xf32>
    %cst_64 = arith.constant dense<0.000000e+00> : vector<24x24xf32>
    %153 = tpu.matmul %151, %152, %cst_64 {dimension_numbers = #tpu.dot_dimension_numbers<[1], [1], [0], [0], [0, 0, 1, 0], [], []>} : vector<24x16xf32>, vector<24x16xf32>, vector<24x24xf32> -> vector<24x24xf32>
    %154 = vector.broadcast %61 : vector<1x24xf32> to vector<24x24xf32>
    %155 = arith.addf %153, %154 : vector<24x24xf32>
    %cst_65 = arith.constant dense<0xFF800000> : vector<24xf32>
    %156 = vector.multi_reduction <maximumf>, %155, %cst_65 [1] : vector<24x24xf32> to vector<24xf32>
    %157 = vector.shape_cast %156 : vector<24xf32> to vector<24x1xf32>
    %158 = vector.broadcast %157 : vector<24x1xf32> to vector<24x24xf32>
    %159 = arith.subf %155, %158 : vector<24x24xf32>
    %160 = math.exp %159 : vector<24x24xf32>
    %cst_66 = arith.constant dense<0.000000e+00> : vector<24xf32>
    %161 = vector.multi_reduction <add>, %160, %cst_66 [1] : vector<24x24xf32> to vector<24xf32>
    %162 = vector.shape_cast %161 : vector<24xf32> to vector<24x1xf32>
    %cst_67 = arith.constant 1.000000e+00 : f32
    %163 = vector.broadcast %cst_67 : f32 to vector<24x1xf32>
    %164 = arith.divf %163, %162 : vector<24x1xf32>
    %165 = vector.extract_strided_slice %38 {offsets = [0, 64], sizes = [24, 16], strides = [1, 1]} : vector<24x128xf32> to vector<24x16xf32>
    %cst_68 = arith.constant dense<0.000000e+00> : vector<24x16xf32>
    %166 = tpu.matmul %160, %165, %cst_68 {dimension_numbers = #tpu.dot_dimension_numbers<[1], [0], [0], [1], [0, 0, 1, 1], [], []>} : vector<24x24xf32>, vector<24x16xf32>, vector<24x16xf32> -> vector<24x16xf32>
    %167 = vector.broadcast %164 : vector<24x1xf32> to vector<24x16xf32>
    %168 = arith.mulf %166, %167 : vector<24x16xf32>
    %c0_69 = arith.constant 0 : index
    %c64 = arith.constant 64 : index
    %c0_70 = arith.constant 0 : index
    %169 = vector.load %arg10[%c0_69, %c64, %c0_70] : memref<1x128x128xf32, #tpu.memory_space<vmem>>, vector<1x16x128xf32>
    %170 = vector.shape_cast %169 : vector<1x16x128xf32> to vector<16x128xf32>
    %cst_71 = arith.constant dense<0.000000e+00> : vector<24x128xf32>
    %171 = tpu.matmul %168, %170, %cst_71 {dimension_numbers = #tpu.dot_dimension_numbers<[1], [0], [0], [1], [0, 0, 1, 1], [], []>} : vector<24x16xf32>, vector<16x128xf32>, vector<24x128xf32> -> vector<24x128xf32>
    %172 = arith.addf %150, %171 : vector<24x128xf32>
    %173 = vector.extract_strided_slice %48 {offsets = [0, 80], sizes = [24, 16], strides = [1, 1]} : vector<24x128xf32> to vector<24x16xf32>
    %174 = vector.extract_strided_slice %55 {offsets = [0, 80], sizes = [24, 16], strides = [1, 1]} : vector<24x128xf32> to vector<24x16xf32>
    %cst_72 = arith.constant dense<0.000000e+00> : vector<24x24xf32>
    %175 = tpu.matmul %173, %174, %cst_72 {dimension_numbers = #tpu.dot_dimension_numbers<[1], [1], [0], [0], [0, 0, 1, 0], [], []>} : vector<24x16xf32>, vector<24x16xf32>, vector<24x24xf32> -> vector<24x24xf32>
    %176 = vector.broadcast %61 : vector<1x24xf32> to vector<24x24xf32>
    %177 = arith.addf %175, %176 : vector<24x24xf32>
    %cst_73 = arith.constant dense<0xFF800000> : vector<24xf32>
    %178 = vector.multi_reduction <maximumf>, %177, %cst_73 [1] : vector<24x24xf32> to vector<24xf32>
    %179 = vector.shape_cast %178 : vector<24xf32> to vector<24x1xf32>
    %180 = vector.broadcast %179 : vector<24x1xf32> to vector<24x24xf32>
    %181 = arith.subf %177, %180 : vector<24x24xf32>
    %182 = math.exp %181 : vector<24x24xf32>
    %cst_74 = arith.constant dense<0.000000e+00> : vector<24xf32>
    %183 = vector.multi_reduction <add>, %182, %cst_74 [1] : vector<24x24xf32> to vector<24xf32>
    %184 = vector.shape_cast %183 : vector<24xf32> to vector<24x1xf32>
    %cst_75 = arith.constant 1.000000e+00 : f32
    %185 = vector.broadcast %cst_75 : f32 to vector<24x1xf32>
    %186 = arith.divf %185, %184 : vector<24x1xf32>
    %187 = vector.extract_strided_slice %38 {offsets = [0, 80], sizes = [24, 16], strides = [1, 1]} : vector<24x128xf32> to vector<24x16xf32>
    %cst_76 = arith.constant dense<0.000000e+00> : vector<24x16xf32>
    %188 = tpu.matmul %182, %187, %cst_76 {dimension_numbers = #tpu.dot_dimension_numbers<[1], [0], [0], [1], [0, 0, 1, 1], [], []>} : vector<24x24xf32>, vector<24x16xf32>, vector<24x16xf32> -> vector<24x16xf32>
    %189 = vector.broadcast %186 : vector<24x1xf32> to vector<24x16xf32>
    %190 = arith.mulf %188, %189 : vector<24x16xf32>
    %c0_77 = arith.constant 0 : index
    %c80 = arith.constant 80 : index
    %c0_78 = arith.constant 0 : index
    %191 = vector.load %arg10[%c0_77, %c80, %c0_78] : memref<1x128x128xf32, #tpu.memory_space<vmem>>, vector<1x16x128xf32>
    %192 = vector.shape_cast %191 : vector<1x16x128xf32> to vector<16x128xf32>
    %cst_79 = arith.constant dense<0.000000e+00> : vector<24x128xf32>
    %193 = tpu.matmul %190, %192, %cst_79 {dimension_numbers = #tpu.dot_dimension_numbers<[1], [0], [0], [1], [0, 0, 1, 1], [], []>} : vector<24x16xf32>, vector<16x128xf32>, vector<24x128xf32> -> vector<24x128xf32>
    %194 = arith.addf %172, %193 : vector<24x128xf32>
    %195 = vector.extract_strided_slice %48 {offsets = [0, 96], sizes = [24, 16], strides = [1, 1]} : vector<24x128xf32> to vector<24x16xf32>
    %196 = vector.extract_strided_slice %55 {offsets = [0, 96], sizes = [24, 16], strides = [1, 1]} : vector<24x128xf32> to vector<24x16xf32>
    %cst_80 = arith.constant dense<0.000000e+00> : vector<24x24xf32>
    %197 = tpu.matmul %195, %196, %cst_80 {dimension_numbers = #tpu.dot_dimension_numbers<[1], [1], [0], [0], [0, 0, 1, 0], [], []>} : vector<24x16xf32>, vector<24x16xf32>, vector<24x24xf32> -> vector<24x24xf32>
    %198 = vector.broadcast %61 : vector<1x24xf32> to vector<24x24xf32>
    %199 = arith.addf %197, %198 : vector<24x24xf32>
    %cst_81 = arith.constant dense<0xFF800000> : vector<24xf32>
    %200 = vector.multi_reduction <maximumf>, %199, %cst_81 [1] : vector<24x24xf32> to vector<24xf32>
    %201 = vector.shape_cast %200 : vector<24xf32> to vector<24x1xf32>
    %202 = vector.broadcast %201 : vector<24x1xf32> to vector<24x24xf32>
    %203 = arith.subf %199, %202 : vector<24x24xf32>
    %204 = math.exp %203 : vector<24x24xf32>
    %cst_82 = arith.constant dense<0.000000e+00> : vector<24xf32>
    %205 = vector.multi_reduction <add>, %204, %cst_82 [1] : vector<24x24xf32> to vector<24xf32>
    %206 = vector.shape_cast %205 : vector<24xf32> to vector<24x1xf32>
    %cst_83 = arith.constant 1.000000e+00 : f32
    %207 = vector.broadcast %cst_83 : f32 to vector<24x1xf32>
    %208 = arith.divf %207, %206 : vector<24x1xf32>
    %209 = vector.extract_strided_slice %38 {offsets = [0, 96], sizes = [24, 16], strides = [1, 1]} : vector<24x128xf32> to vector<24x16xf32>
    %cst_84 = arith.constant dense<0.000000e+00> : vector<24x16xf32>
    %210 = tpu.matmul %204, %209, %cst_84 {dimension_numbers = #tpu.dot_dimension_numbers<[1], [0], [0], [1], [0, 0, 1, 1], [], []>} : vector<24x24xf32>, vector<24x16xf32>, vector<24x16xf32> -> vector<24x16xf32>
    %211 = vector.broadcast %208 : vector<24x1xf32> to vector<24x16xf32>
    %212 = arith.mulf %210, %211 : vector<24x16xf32>
    %c0_85 = arith.constant 0 : index
    %c96 = arith.constant 96 : index
    %c0_86 = arith.constant 0 : index
    %213 = vector.load %arg10[%c0_85, %c96, %c0_86] : memref<1x128x128xf32, #tpu.memory_space<vmem>>, vector<1x16x128xf32>
    %214 = vector.shape_cast %213 : vector<1x16x128xf32> to vector<16x128xf32>
    %cst_87 = arith.constant dense<0.000000e+00> : vector<24x128xf32>
    %215 = tpu.matmul %212, %214, %cst_87 {dimension_numbers = #tpu.dot_dimension_numbers<[1], [0], [0], [1], [0, 0, 1, 1], [], []>} : vector<24x16xf32>, vector<16x128xf32>, vector<24x128xf32> -> vector<24x128xf32>
    %216 = arith.addf %194, %215 : vector<24x128xf32>
    %217 = vector.extract_strided_slice %48 {offsets = [0, 112], sizes = [24, 16], strides = [1, 1]} : vector<24x128xf32> to vector<24x16xf32>
    %218 = vector.extract_strided_slice %55 {offsets = [0, 112], sizes = [24, 16], strides = [1, 1]} : vector<24x128xf32> to vector<24x16xf32>
    %cst_88 = arith.constant dense<0.000000e+00> : vector<24x24xf32>
    %219 = tpu.matmul %217, %218, %cst_88 {dimension_numbers = #tpu.dot_dimension_numbers<[1], [1], [0], [0], [0, 0, 1, 0], [], []>} : vector<24x16xf32>, vector<24x16xf32>, vector<24x24xf32> -> vector<24x24xf32>
    %220 = vector.broadcast %61 : vector<1x24xf32> to vector<24x24xf32>
    %221 = arith.addf %219, %220 : vector<24x24xf32>
    %cst_89 = arith.constant dense<0xFF800000> : vector<24xf32>
    %222 = vector.multi_reduction <maximumf>, %221, %cst_89 [1] : vector<24x24xf32> to vector<24xf32>
    %223 = vector.shape_cast %222 : vector<24xf32> to vector<24x1xf32>
    %224 = vector.broadcast %223 : vector<24x1xf32> to vector<24x24xf32>
    %225 = arith.subf %221, %224 : vector<24x24xf32>
    %226 = math.exp %225 : vector<24x24xf32>
    %cst_90 = arith.constant dense<0.000000e+00> : vector<24xf32>
    %227 = vector.multi_reduction <add>, %226, %cst_90 [1] : vector<24x24xf32> to vector<24xf32>
    %228 = vector.shape_cast %227 : vector<24xf32> to vector<24x1xf32>
    %cst_91 = arith.constant 1.000000e+00 : f32
    %229 = vector.broadcast %cst_91 : f32 to vector<24x1xf32>
    %230 = arith.divf %229, %228 : vector<24x1xf32>
    %231 = vector.extract_strided_slice %38 {offsets = [0, 112], sizes = [24, 16], strides = [1, 1]} : vector<24x128xf32> to vector<24x16xf32>
    %cst_92 = arith.constant dense<0.000000e+00> : vector<24x16xf32>
    %232 = tpu.matmul %226, %231, %cst_92 {dimension_numbers = #tpu.dot_dimension_numbers<[1], [0], [0], [1], [0, 0, 1, 1], [], []>} : vector<24x24xf32>, vector<24x16xf32>, vector<24x16xf32> -> vector<24x16xf32>
    %233 = vector.broadcast %230 : vector<24x1xf32> to vector<24x16xf32>
    %234 = arith.mulf %232, %233 : vector<24x16xf32>
    %c0_93 = arith.constant 0 : index
    %c112 = arith.constant 112 : index
    %c0_94 = arith.constant 0 : index
    %235 = vector.load %arg10[%c0_93, %c112, %c0_94] : memref<1x128x128xf32, #tpu.memory_space<vmem>>, vector<1x16x128xf32>
    %236 = vector.shape_cast %235 : vector<1x16x128xf32> to vector<16x128xf32>
    %cst_95 = arith.constant dense<0.000000e+00> : vector<24x128xf32>
    %237 = tpu.matmul %234, %236, %cst_95 {dimension_numbers = #tpu.dot_dimension_numbers<[1], [0], [0], [1], [0, 0, 1, 1], [], []>} : vector<24x16xf32>, vector<16x128xf32>, vector<24x128xf32> -> vector<24x128xf32>
    %238 = arith.addf %216, %237 : vector<24x128xf32>
    %239 = arith.addf %4, %238 : vector<24x128xf32>
    %c0_96 = arith.constant 0 : index
    %c0_97 = arith.constant 0 : index
    %c0_98 = arith.constant 0 : index
    %240 = vector.load %arg11[%c0_96, %c0_97, %c0_98] : memref<1x1x128xf32, #tpu.memory_space<vmem>>, vector<1x1x128xf32>
    %241 = vector.shape_cast %240 : vector<1x1x128xf32> to vector<1x128xf32>
    %242 = vector.broadcast %241 : vector<1x128xf32> to vector<24x128xf32>
    %243 = arith.addf %239, %242 : vector<24x128xf32>
    %c0_99 = arith.constant 0 : index
    %c0_100 = arith.constant 0 : index
    %c0_101 = arith.constant 0 : index
    %244 = vector.load %arg12[%c0_99, %c0_100, %c0_101] : memref<1x1x128xf32, #tpu.memory_space<vmem>>, vector<1x1x128xf32>
    %245 = vector.shape_cast %244 : vector<1x1x128xf32> to vector<1x128xf32>
    %c0_102 = arith.constant 0 : index
    %c0_103 = arith.constant 0 : index
    %c0_104 = arith.constant 0 : index
    %246 = vector.load %arg13[%c0_102, %c0_103, %c0_104] : memref<1x1x128xf32, #tpu.memory_space<vmem>>, vector<1x1x128xf32>
    %247 = vector.shape_cast %246 : vector<1x1x128xf32> to vector<1x128xf32>
    %cst_105 = arith.constant dense<0.000000e+00> : vector<24xf32>
    %248 = vector.multi_reduction <add>, %243, %cst_105 [1] : vector<24x128xf32> to vector<24xf32>
    %249 = vector.shape_cast %248 : vector<24xf32> to vector<24x1xf32>
    %cst_106 = arith.constant 1.280000e+02 : f32
    %250 = vector.broadcast %cst_106 : f32 to vector<24x1xf32>
    %251 = arith.divf %249, %250 : vector<24x1xf32>
    %252 = vector.broadcast %251 : vector<24x1xf32> to vector<24x128xf32>
    %253 = arith.subf %243, %252 : vector<24x128xf32>
    %254 = arith.mulf %253, %253 : vector<24x128xf32>
    %cst_107 = arith.constant dense<0.000000e+00> : vector<24xf32>
    %255 = vector.multi_reduction <add>, %254, %cst_107 [1] : vector<24x128xf32> to vector<24xf32>
    %256 = vector.shape_cast %255 : vector<24xf32> to vector<24x1xf32>
    %cst_108 = arith.constant 1.280000e+02 : f32
    %257 = vector.broadcast %cst_108 : f32 to vector<24x1xf32>
    %258 = arith.divf %256, %257 : vector<24x1xf32>
    %cst_109 = arith.constant 9.99999997E-7 : f32
    %259 = vector.broadcast %cst_109 : f32 to vector<24x1xf32>
    %260 = arith.addf %258, %259 : vector<24x1xf32>
    %261 = math.rsqrt %260 : vector<24x1xf32>
    %262 = vector.broadcast %261 : vector<24x1xf32> to vector<24x128xf32>
    %263 = arith.mulf %253, %262 : vector<24x128xf32>
    %264 = vector.broadcast %245 : vector<1x128xf32> to vector<24x128xf32>
    %265 = arith.mulf %263, %264 : vector<24x128xf32>
    %266 = vector.broadcast %247 : vector<1x128xf32> to vector<24x128xf32>
    %267 = arith.addf %265, %266 : vector<24x128xf32>
    %c0_110 = arith.constant 0 : index
    %c0_111 = arith.constant 0 : index
    %c0_112 = arith.constant 0 : index
    %268 = vector.load %arg14[%c0_110, %c0_111, %c0_112] : memref<1x128x512xf32, #tpu.memory_space<vmem>>, vector<1x128x512xf32>
    %269 = vector.shape_cast %268 : vector<1x128x512xf32> to vector<128x512xf32>
    %cst_113 = arith.constant dense<0.000000e+00> : vector<24x512xf32>
    %270 = tpu.matmul %267, %269, %cst_113 {dimension_numbers = #tpu.dot_dimension_numbers<[1], [0], [0], [1], [0, 0, 1, 1], [], []>} : vector<24x128xf32>, vector<128x512xf32>, vector<24x512xf32> -> vector<24x512xf32>
    %c0_114 = arith.constant 0 : index
    %c0_115 = arith.constant 0 : index
    %c0_116 = arith.constant 0 : index
    %271 = vector.load %arg15[%c0_114, %c0_115, %c0_116] : memref<1x1x512xf32, #tpu.memory_space<vmem>>, vector<1x1x512xf32>
    %272 = vector.shape_cast %271 : vector<1x1x512xf32> to vector<1x512xf32>
    %273 = vector.broadcast %272 : vector<1x512xf32> to vector<24x512xf32>
    %274 = arith.addf %270, %273 : vector<24x512xf32>
    %cst_117 = arith.constant 5.000000e-01 : f32
    %275 = vector.broadcast %cst_117 : f32 to vector<24x512xf32>
    %276 = arith.mulf %275, %274 : vector<24x512xf32>
    %cst_118 = arith.constant 0.707106769 : f32
    %277 = vector.broadcast %cst_118 : f32 to vector<24x512xf32>
    %278 = arith.mulf %274, %277 : vector<24x512xf32>
    %279 = math.absf %278 : vector<24x512xf32>
    %cst_119 = arith.constant 0.327591091 : f32
    %280 = vector.broadcast %cst_119 : f32 to vector<24x512xf32>
    %281 = arith.mulf %280, %279 : vector<24x512xf32>
    %cst_120 = arith.constant 1.000000e+00 : f32
    %282 = vector.broadcast %cst_120 : f32 to vector<24x512xf32>
    %283 = arith.addf %282, %281 : vector<24x512xf32>
    %cst_121 = arith.constant 1.000000e+00 : f32
    %284 = vector.broadcast %cst_121 : f32 to vector<24x512xf32>
    %285 = arith.divf %284, %283 : vector<24x512xf32>
    %cst_122 = arith.constant 1.06140542 : f32
    %286 = vector.broadcast %cst_122 : f32 to vector<24x512xf32>
    %287 = arith.mulf %286, %285 : vector<24x512xf32>
    %cst_123 = arith.constant -1.45315206 : f32
    %288 = vector.broadcast %cst_123 : f32 to vector<24x512xf32>
    %289 = arith.addf %287, %288 : vector<24x512xf32>
    %290 = arith.mulf %289, %285 : vector<24x512xf32>
    %cst_124 = arith.constant 1.42141378 : f32
    %291 = vector.broadcast %cst_124 : f32 to vector<24x512xf32>
    %292 = arith.addf %290, %291 : vector<24x512xf32>
    %293 = arith.mulf %292, %285 : vector<24x512xf32>
    %cst_125 = arith.constant -0.284496725 : f32
    %294 = vector.broadcast %cst_125 : f32 to vector<24x512xf32>
    %295 = arith.addf %293, %294 : vector<24x512xf32>
    %296 = arith.mulf %295, %285 : vector<24x512xf32>
    %cst_126 = arith.constant 0.254829586 : f32
    %297 = vector.broadcast %cst_126 : f32 to vector<24x512xf32>
    %298 = arith.addf %296, %297 : vector<24x512xf32>
    %299 = arith.mulf %298, %285 : vector<24x512xf32>
    %cst_127 = arith.constant 0.000000e+00 : f32
    %300 = vector.broadcast %cst_127 : f32 to vector<24x512xf32>
    %301 = arith.subf %300, %279 : vector<24x512xf32>
    %302 = arith.mulf %301, %279 : vector<24x512xf32>
    %303 = math.exp %302 : vector<24x512xf32>
    %304 = arith.mulf %299, %303 : vector<24x512xf32>
    %cst_128 = arith.constant 1.000000e+00 : f32
    %305 = vector.broadcast %cst_128 : f32 to vector<24x512xf32>
    %306 = arith.subf %305, %304 : vector<24x512xf32>
    %cst_129 = arith.constant 0.000000e+00 : f32
    %307 = vector.broadcast %cst_129 : f32 to vector<24x512xf32>
    %308 = arith.cmpf olt, %278, %307 : vector<24x512xf32>
    %cst_130 = arith.constant 0.000000e+00 : f32
    %309 = vector.broadcast %cst_130 : f32 to vector<24x512xf32>
    %310 = arith.subf %309, %306 : vector<24x512xf32>
    %311 = arith.select %308, %310, %306 : vector<24x512xi1>, vector<24x512xf32>
    %cst_131 = arith.constant 1.000000e+00 : f32
    %312 = vector.broadcast %cst_131 : f32 to vector<24x512xf32>
    %313 = arith.addf %312, %311 : vector<24x512xf32>
    %314 = arith.mulf %276, %313 : vector<24x512xf32>
    %c0_132 = arith.constant 0 : index
    %c0_133 = arith.constant 0 : index
    %c0_134 = arith.constant 0 : index
    %315 = vector.load %arg16[%c0_132, %c0_133, %c0_134] : memref<1x512x128xf32, #tpu.memory_space<vmem>>, vector<1x512x128xf32>
    %316 = vector.shape_cast %315 : vector<1x512x128xf32> to vector<512x128xf32>
    %cst_135 = arith.constant dense<0.000000e+00> : vector<24x128xf32>
    %317 = tpu.matmul %314, %316, %cst_135 {dimension_numbers = #tpu.dot_dimension_numbers<[1], [0], [0], [1], [0, 0, 1, 1], [], []>} : vector<24x512xf32>, vector<512x128xf32>, vector<24x128xf32> -> vector<24x128xf32>
    %318 = arith.addf %243, %317 : vector<24x128xf32>
    %c0_136 = arith.constant 0 : index
    %c0_137 = arith.constant 0 : index
    %c0_138 = arith.constant 0 : index
    %319 = vector.load %arg17[%c0_136, %c0_137, %c0_138] : memref<1x1x128xf32, #tpu.memory_space<vmem>>, vector<1x1x128xf32>
    %320 = vector.shape_cast %319 : vector<1x1x128xf32> to vector<1x128xf32>
    %321 = vector.broadcast %320 : vector<1x128xf32> to vector<24x128xf32>
    %322 = arith.addf %318, %321 : vector<24x128xf32>
    %c0_139 = arith.constant 0 : index
    %c0_140 = arith.constant 0 : index
    %c0_141 = arith.constant 0 : index
    %323 = vector.load %arg18[%c0_139, %c0_140, %c0_141] : memref<1x24x128xf32, #tpu.memory_space<vmem>>, vector<1x24x128xf32>
    %324 = vector.shape_cast %323 : vector<1x24x128xf32> to vector<24x128xf32>
    %325 = vector.shape_cast %322 : vector<24x128xf32> to vector<1x24x128xf32>
    tpu.vector_store %arg18[%c0_139, %c0_140, %c0_141], %325 {strides = array<i32>} : memref<1x24x128xf32, #tpu.memory_space<vmem>>, vector<1x24x128xf32>,
    return
  }
  func.func @transform_0(%arg0: i32, %arg1: i32) -> (i32, i32, i32) {
    %c0_i32 = arith.constant 0 : i32
    %c0_i32_0 = arith.constant 0 : i32
    %c0_i32_1 = arith.constant 0 : i32
    return %arg0, %c0_i32, %c0_i32_0 : i32, i32, i32
  }
  func.func @transform_1(%arg0: i32, %arg1: i32) -> (i32, i32) {
    %c0_i32 = arith.constant 0 : i32
    %c0_i32_0 = arith.constant 0 : i32
    %c0_i32_1 = arith.constant 0 : i32
    return %c0_i32, %c0_i32_0 : i32, i32
  }
  func.func @transform_2(%arg0: i32, %arg1: i32) -> (i32, i32) {
    %c0_i32 = arith.constant 0 : i32
    %c0_i32_0 = arith.constant 0 : i32
    %c0_i32_1 = arith.constant 0 : i32
    return %c0_i32, %c0_i32_0 : i32, i32
  }
  func.func @transform_3(%arg0: i32, %arg1: i32) -> (i32, i32) {
    %c0_i32 = arith.constant 0 : i32
    %c0_i32_0 = arith.constant 0 : i32
    %c0_i32_1 = arith.constant 0 : i32
    return %c0_i32, %c0_i32_0 : i32, i32
  }
  func.func @transform_4(%arg0: i32, %arg1: i32) -> (i32, i32, i32) {
    %c0_i32 = arith.constant 0 : i32
    %c0_i32_0 = arith.constant 0 : i32
    %c0_i32_1 = arith.constant 0 : i32
    return %arg1, %c0_i32, %c0_i32_0 : i32, i32, i32
  }
  func.func @transform_5(%arg0: i32, %arg1: i32) -> (i32, i32, i32) {
    %c0_i32 = arith.constant 0 : i32
    %c0_i32_0 = arith.constant 0 : i32
    %c0_i32_1 = arith.constant 0 : i32
    return %arg1, %c0_i32, %c0_i32_0 : i32, i32, i32
  }
  func.func @transform_6(%arg0: i32, %arg1: i32) -> (i32, i32, i32) {
    %c0_i32 = arith.constant 0 : i32
    %c0_i32_0 = arith.constant 0 : i32
    %c0_i32_1 = arith.constant 0 : i32
    return %arg1, %c0_i32, %c0_i32_0 : i32, i32, i32
  }
  func.func @transform_7(%arg0: i32, %arg1: i32) -> (i32, i32, i32) {
    %c0_i32 = arith.constant 0 : i32
    %c0_i32_0 = arith.constant 0 : i32
    %c0_i32_1 = arith.constant 0 : i32
    return %arg1, %c0_i32, %c0_i32_0 : i32, i32, i32
  }
  func.func @transform_8(%arg0: i32, %arg1: i32) -> (i32, i32, i32) {
    %c0_i32 = arith.constant 0 : i32
    %c0_i32_0 = arith.constant 0 : i32
    %c0_i32_1 = arith.constant 0 : i32
    return %arg1, %c0_i32, %c0_i32_0 : i32, i32, i32
  }
  func.func @transform_9(%arg0: i32, %arg1: i32) -> (i32, i32, i32) {
    %c0_i32 = arith.constant 0 : i32
    %c0_i32_0 = arith.constant 0 : i32
    %c0_i32_1 = arith.constant 0 : i32
    return %arg1, %c0_i32, %c0_i32_0 : i32, i32, i32
  }
  func.func @transform_10(%arg0: i32, %arg1: i32) -> (i32, i32, i32) {
    %c0_i32 = arith.constant 0 : i32
    %c0_i32_0 = arith.constant 0 : i32
    %c0_i32_1 = arith.constant 0 : i32
    return %arg1, %c0_i32, %c0_i32_0 : i32, i32, i32
  }
  func.func @transform_11(%arg0: i32, %arg1: i32) -> (i32, i32, i32) {
    %c0_i32 = arith.constant 0 : i32
    %c0_i32_0 = arith.constant 0 : i32
    %c0_i32_1 = arith.constant 0 : i32
    return %arg1, %c0_i32, %c0_i32_0 : i32, i32, i32
  }
  func.func @transform_12(%arg0: i32, %arg1: i32) -> (i32, i32, i32) {
    %c0_i32 = arith.constant 0 : i32
    %c0_i32_0 = arith.constant 0 : i32
    %c0_i32_1 = arith.constant 0 : i32
    return %arg1, %c0_i32, %c0_i32_0 : i32, i32, i32
  }
  func.func @transform_13(%arg0: i32, %arg1: i32) -> (i32, i32, i32) {
    %c0_i32 = arith.constant 0 : i32
    %c0_i32_0 = arith.constant 0 : i32
    %c0_i32_1 = arith.constant 0 : i32
    return %arg1, %c0_i32, %c0_i32_0 : i32, i32, i32
  }
  func.func @transform_14(%arg0: i32, %arg1: i32) -> (i32, i32, i32) {
    %c0_i32 = arith.constant 0 : i32
    %c0_i32_0 = arith.constant 0 : i32
    %c0_i32_1 = arith.constant 0 : i32
    return %arg1, %c0_i32, %c0_i32_0 : i32, i32, i32
  }
  func.func @transform_15(%arg0: i32, %arg1: i32) -> (i32, i32, i32) {
    %c0_i32 = arith.constant 0 : i32
    %c0_i32_0 = arith.constant 0 : i32
    %c0_i32_1 = arith.constant 0 : i32
    return %arg1, %c0_i32, %c0_i32_0 : i32, i32, i32
  }
  func.func @transform_16(%arg0: i32, %arg1: i32) -> (i32, i32, i32) {
    %c0_i32 = arith.constant 0 : i32
    %c0_i32_0 = arith.constant 0 : i32
    %c0_i32_1 = arith.constant 0 : i32
    return %arg0, %c0_i32, %c0_i32_0 : i32, i32, i32
  }
}

</mosaic_0001>

<bundles_post_ra>
// kernel: tpu_custom_call.1
= control target key start
LH: loop header
LB: loop body
LE: loop exit
PB: predicated region body
PF: predicated region fallthrough
CT: control target
= control target key end

     0   :  { %s8820_s0 = inlined_call_operand.hbm [shape: f32[2,24,128], index: 0, kind: input, shape index: {}]   ;;  %s8821_s1 = inlined_call_operand.hbm [shape: f32[24,128], index: 1, kind: input, shape index: {}]   ;;  %s8822_s2 = inlined_call_operand.hbm [shape: f32[24,128], index: 2, kind: input, shape index: {}]   ;;  %s8823_s3 = inlined_call_operand.hbm [shape: f32[24,128], index: 3, kind: input, shape index: {}]   ;;  %s8824_s4 = inlined_call_operand.hbm [shape: f32[3,1,128], index: 4, kind: input, shape index: {}]   ;;  %s8825_s5 = inlined_call_operand.hbm [shape: f32[3,1,128], index: 5, kind: input, shape index: {}]   ;;  %s8826_s6 = inlined_call_operand.hbm [shape: f32[3,128,384], index: 6, kind: input, shape index: {}]   ;;  %s8827_s7 = inlined_call_operand.vmem [shape: f32[3,1,384], index: 7, kind: input, shape index: {}]   ;;  %s8828_s8 = inlined_call_operand.hbm [shape: f32[3,128,128], index: 8, kind: input, shape index: {}]   ;;  %s8829_s9 = inlined_call_operand.vmem [shape: f32[3,1,128], index: 9, kind: input, shape index: {}]   ;;  %s8830_s10 = inlined_call_operand.vmem [shape: f32[3,1,128], index: 10, kind: input, shape index: {}]   ;;  %s8831_s11 = inlined_call_operand.vmem [shape: f32[3,1,128], index: 11, kind: input, shape index: {}]   ;;  %s8832_s12 = inlined_call_operand.hbm [shape: f32[3,128,512], index: 12, kind: input, shape index: {}]   ;;  %s8833_s13 = inlined_call_operand.vmem [shape: f32[3,1,512], index: 13, kind: input, shape index: {}]   ;;  %s8834_s14 = inlined_call_operand.hbm [shape: f32[3,512,128], index: 14, kind: input, shape index: {}]   ;;  %s8835_s15 = inlined_call_operand.vmem [shape: f32[3,1,128], index: 15, kind: input, shape index: {}]   ;;  %s8836_s16 = inlined_call_operand.hbm [shape: f32[2,24,128], index: 16, kind: output, shape index: {}]  }
   0x1   :  { %8880 = sst [smem:[#allocation37_spill]] %s8820_s0 }
   0x2   :  { %8881 = sst [smem:[#allocation38_spill]] %s8821_s1 }
   0x3   :  { %8882 = sst [smem:[#allocation39_spill]] %s8822_s2 }
   0x4   :  { %8883 = sst [smem:[#allocation40_spill]] %s8823_s3 }
   0x5   :  { %8884 = sst [smem:[#allocation41_spill]] %s8824_s4 }
   0x6   :  { %8885 = sst [smem:[#allocation42_spill]] %s8825_s5 }
   0x7   :  { %8886 = sst [smem:[#allocation43_spill]] %s8826_s6 }
   0x8   :  { %8887 = sst [smem:[#allocation44_spill]] %s8827_s7 }
   0x9   :  { %8888 = sst [smem:[#allocation45_spill]] %s8828_s8 }
   0xa   :  { %8889 = sst [smem:[#allocation46_spill]] %s8829_s9 }
   0xb   :  { %8890 = sst [smem:[#allocation47_spill]] %s8830_s10 }
   0xc   :  { %8891 = sst [smem:[#allocation48_spill]] %s8831_s11 }
   0xd   :  { %8892 = sst [smem:[#allocation49_spill]] %s8832_s12 }
   0xe   :  { %8893 = sst [smem:[#allocation50_spill]] %s8833_s13 }
   0xf   :  { %8894 = sst [smem:[#allocation51_spill]] %s8834_s14 }
  0x10   :  { %8895 = sst [smem:[#allocation52_spill]] %s8835_s15 }
  0x11   :  { %8896 = sst [smem:[#allocation53_spill]] %s8836_s16 }
  0x12   :  { %21 = vsyncpa [#allocation3], 0 }
  0x13   :  { %23 = vsyncpa [#allocation3 + $0x1], 0 }
  0x14   :  { %24 = vsyncpa [#allocation6], 0 }
  0x15   :  { %25 = vsyncpa [#allocation9], 0 }
  0x16   :  { %26 = vsyncpa [#allocation4], 0 }
  0x17   :  { %28 = vsyncpa [#allocation4 + $0x1], 0  ;;  %s7068_s21 = smov 0   ;;  %s7070_s22 = smov 0  }
  0x18   :  { %s7072_s23 = smov 0   ;;  %s7074_s24 = smov 0  }
  0x19   :  { %s7076_s25 = smov 0   ;;  %s7078_s26 = smov 0  }
  0x1a   :  { %s7080_s27 = smov 0   ;;  %s7082_s28 = smov 0  }
  0x1b   :  { %s7084_s29 = smov 0   ;;  %s7086_s30 = smov 0  }
  0x1c   :  { %s7088_s0 = smov 0  }
  0x1d LB: > { %8897 = sst [smem:[#allocation22_spill]] %s6915_s22  ;;  %p8841_p0 = scmp.ne.s32.totalorder %s6931_s26, %s6927_s25  ;;  %s6951_s0 = sphi %s7088_s0, %s34_s0   ;;  %s6947_s30 = sphi %s7086_s30, %s8984_s30   ;;  %s6943_s29 = sphi %s7084_s29, %s8983_s29   ;;  %s6939_s28 = sphi %s7082_s28, %s8982_s28   ;;  %s6935_s27 = sphi %s7080_s27, %s8981_s27   ;;  %s6931_s26 = sphi %s7078_s26, %s8980_s26   ;;  %s6927_s25 = sphi %s7076_s25, %s8986_s25   ;;  %s6923_s24 = sphi %s7074_s24, %s8985_s24   ;;  %s6919_s23 = sphi %s7072_s23, %s8978_s23   ;;  %s6915_s22 = sphi %s7070_s22, %s8977_s22   ;;  %s6911_s21 = sphi %s7068_s21, %s8976_s21  }
  0x1e   : > { %8898 = sst [smem:[#allocation23_spill]] %s6919_s23  ;;  %p61_p1 = scmp.eq.s32.totalorder %s6951_s0, 0 }
  0x1f   : > { %8899 = sst [smem:[#allocation24_spill]] %s6923_s24  ;;  %p8842_p3 = scmp.lt.s32.totalorder %s6951_s0, 6 }
  0x20   : > { %8900 = sst [smem:[#allocation25_spill]] %s6931_s26  ;;  %p62_p2 = por %p61_p1, %p8841_p0 }
  0x21   : > { %8901 = sst [smem:[#allocation26_spill]] %s6935_s27  ;;  %s530_s19 = sand.u32 1, %s6951_s0  }
  0x22   : > { %8902 = sst [smem:[#allocation27_spill]] %s6939_s28  ;;  %s532_s20 = sand.u32 1, %s6931_s26  }
  0x23   : > { %8903 = sst [smem:[#allocation28_spill]] %s6943_s29  ;;  %s6104_s16 = smul.u32 24, %s532_s20 }
  0x24   : > { %8904 = sst [smem:[#allocation29_spill]] %s6947_s30  ;;  %p7138_p4 = pnand %p8842_p3, %p62_p2 }
  0x25   : > { %8905 = sst [smem:[#allocation30_spill]] %s6951_s0  ;;  %s6105_s15 = smul.u32 384, %s6947_s30 }
  0x26   : > { %s8907_s18 = sld [smem:[#allocation37_spill]]  ;;  %s534_s11 = scalar_lea.vmem [#allocation2], %s6104_s16 }
  0x27   : > { %s541_s10 = sshll.u32 %s534_s11, 4  ;;  %s7150_s20 = scalar_lea.sflag [#allocation3], %s530_s19  ;;  %s7148_s10 = int_to_ptr.vmem [resolvable:$true] %s541_s10 }
  0x28   : > { %p6525_p6 = pneg %p7138_p4 }
  0x2c   : > { %s7146_s7 = scalar_lea.hbm %s8907_s18, %s6105_s15  ;;  %s6528_s17 = scalar_lea.hbm %s8907_s18, 768 }
  0x2d   : > { %s6523_s9 = scalar_lea.hbm %s7146_s7, 384  ;;  %p6529_p9 = scmp.lt.u32.totalorder %s7146_s7, %s8907_s18 }
  0x2e   : > { %p6524_p5 = scmp.ne.s32.totalorder %s7146_s7, %s6523_s9  ;;  %p6530_p10 = scmp.lt.u32.totalorder %s6528_s17, %s6523_s9 }
  0x2f   : > { %p6532_p12 = scmp.lt.u32.totalorder %s6523_s9, %s7146_s7 }
  0x30   : > { %p6526_p7 = pnand %p6525_p6, %p6524_p5  ;;  %p6531_p11 = por %p6530_p10, %p6529_p9 }
  0x32   : > { %p6527_p8 = pneg %p6526_p7  ;;  %p6533_p13 = por %p6532_p12, %p6531_p11 }
  0x34   : > { %p6534_p2 = pnand %p6533_p13, %p6527_p8 }
  0x36   : > { %6537 = shalt.err (!%p6534_p2)
}
  0x37   : > { %s6538_s11 = scalar_lea.vmem %s7148_s10, 384  ;;  %s6953_s16 = smov [#allocation2]  }
  0x38   : > { %p6539_p5 = scmp.ne.s32.totalorder %s7148_s10, %s6538_s11  ;;  %s6543_s19 = sshll.u32 %s6953_s16, 4  ;;  %s6544_s19 = int_to_ptr.vmem [resolvable:$false] %s6543_s19 }
  0x39   : > { %s6545_s14 = scalar_lea.vmem %s6544_s19, 768  ;;  %p6546_p3 = scmp.lt.s32.totalorder %s7148_s10, %s6544_s19 }
  0x3a   : > { %p6541_p7 = pnand %p6539_p5, %p6525_p6  ;;  %p6547_p9 = scmp.lt.s32.totalorder %s6545_s14, %s6538_s11 }
  0x3c   : > { %p6542_p0 = pneg %p6541_p7  ;;  %p6548_p10 = por %p6547_p9, %p6546_p3 }
  0x3e   : > { %p6549_p11 = pnand %p6548_p10, %p6542_p0 }
  0x40   : > { %6552 = shalt.err (!%p6549_p11)
}
  0x41   : > { %s8843_s9 = smov 128   ;;  %s8845_s27 = smov 8  }
  0x42   : > { %6153 = dma.hbm_to_vmem [thread:$0]  (!%p7138_p4), %s7146_s7, 384, %s7148_s10, %s7150_s20, %s8843_s9, %s8843_s9, %s8845_s27  }
  0x43   : > { %s43_s13 = sadd.s32 1, %s6943_s29  ;;  %s142_s15 = sadd.s32 1, %s6919_s23 }
  0x44   : > { %p44_p0 = scmp.ge.s32.totalorder %s43_s13, 3  ;;  %p149_p3 = scmp.ne.s32.totalorder %s6919_s23, %s6915_s22 }
  0x45   : > { %s7186_s17 = sand.u32 1, %s6919_s23   ;;  %s5089_s11 = sshll.u32 %s6943_s29, 4 }
  0x46   : > { %s8988_s13 = smov (%p44_p0, %s43_s13), 0  ;;  %s8909_s28 = sadd.s32 1, %s6947_s30 }
  0x47   : > { %8908 = sst [smem:[#allocation31_spill]] %s8988_s13  ;;  %s8990_s28 = smov (!%p44_p0, %s8909_s28), %s6947_s30 }
  0x48   : > { %s139_s16 = ssub.s32 %s6943_s29, %s8988_s13  ;;  %p151_p4 = por %p149_p3, %p61_p1 }
  0x49   : > { %p48_p6 = scmp.ge.s32.totalorder %s8990_s28, 2  ;;  %p140_p8 = scmp.eq.s32.totalorder %s139_s16, 0 }
  0x4a   : > { %s8910_s4 = sld [smem:[#allocation41_spill]]  ;;  %s554_s27 = scalar_lea.vmem [#allocation10], %s7186_s17 }
  0x4b   : > { %s8992_s28 = smov (%p48_p6, %s8990_s28), 0  ;;  %s561_s18 = sshll.u32 %s554_s27, 4  ;;  %s7211_s18 = int_to_ptr.vmem [resolvable:$true] %s561_s18 }
  0x4c   : > { %8911 = sst [smem:[#allocation32_spill]] %s8992_s28  ;;  %s50_s9 = ssub.s32 %s6947_s30, %s8992_s28 }
  0x4d   : > { %s7206_s14 = scalar_select %p140_p8, %s6919_s23, %s142_s15  }
  0x4e   : > { %p51_p1 = scmp.eq.s32.totalorder %s50_s9, 0  ;;  %p8913_p12 = scmp.lt.s32.totalorder %s6951_s0, 6 }
  0x4f   : > { %8912 = sst [smem:[#allocation33_spill]] %s7206_s14  ;;  %s8915_s7 = sadd.s32 1, %s6931_s26 }
  0x50   : > { %s7201_s19 = scalar_lea.hbm %s8910_s4, %s5089_s11  ;;  %p7215_p13 = pnand %p8913_p12, %p151_p4 }
  0x51   : > { %s7222_s10 = scalar_select %p51_p1, %s6931_s26, %s8915_s7  }
  0x52   : > { %s8914_s16 = scalar_select %p7215_p13, 1, 0 }
  0x53   : > { %8916 = sst [smem:[#allocation34_spill]] %s7222_s10  ;;  %s8917_s5 = sld [smem:[#allocation42_spill]] }
  0x54   : > { %s6553_s28 = scalar_lea.hbm %s7201_s19, 16  ;;  %p7233_p5 = pneg %p7215_p13 }
  0x55   : > { %p6554_p2 = scmp.ne.s32.totalorder %s7201_s19, %s6553_s28  ;;  %s6558_s7 = scalar_lea.hbm %s8910_s4, 48 }
  0x56   : > { %s8918_s9 = scalar_select %p7233_p5, 1, 0 }
  0x57   : > { %p6556_p7 = pnand %p7233_p5, %p6554_p2  ;;  %p6559_p10 = scmp.lt.u32.totalorder %s7201_s19, %s8910_s4 }
  0x58   : > { %p6560_p11 = scmp.lt.u32.totalorder %s6558_s7, %s6553_s28  ;;  %p6562_p3 = scmp.lt.u32.totalorder %s6553_s28, %s7201_s19 }
  0x59   : > { %s7227_s15 = scalar_lea.hbm %s8917_s5, %s5089_s11  ;;  %p6557_p9 = pneg %p6556_p7 }
  0x5a   : > { %p6561_p0 = por %p6560_p11, %p6559_p10 }
  0x5c   : > { %p6563_p4 = por %p6562_p3, %p6561_p0 }
  0x5e   : > { %p6564_p6 = pnand %p6563_p4, %p6557_p9 }
  0x60   : > { %6567 = shalt.err (!%p6564_p6)
}
  0x61   : > { %s6568_s3 = scalar_lea.vmem %s7211_s18, 16  ;;  %s6956_s30 = smov [#allocation10]  }
  0x62   : > { %p6569_p8 = scmp.ne.s32.totalorder %s7211_s18, %s6568_s3  ;;  %s6573_s13 = sshll.u32 %s6956_s30, 4  ;;  %s6574_s13 = int_to_ptr.vmem [resolvable:$false] %s6573_s13 }
  0x63   : > { %s6575_s11 = scalar_lea.vmem %s6574_s13, 32  ;;  %p6576_p2 = scmp.lt.s32.totalorder %s7211_s18, %s6574_s13 }
  0x64   : > { %p6571_p1 = pnand %p6569_p8, %p7233_p5  ;;  %p6577_p7 = scmp.lt.s32.totalorder %s6575_s11, %s6568_s3 }
  0x66   : > { %p6572_p12 = pneg %p6571_p1  ;;  %p6578_p10 = por %p6577_p7, %p6576_p2 }
  0x68   : > { %p6579_p11 = pnand %p6578_p10, %p6572_p12 }
  0x6a   : > { %6582 = shalt.err (!%p6579_p11)
}
  0x6b   : > { %6156 = dma.hbm_to_vmem [thread:$0]  (!%p7215_p13), %s7201_s19, 16, %s7211_s18, %s7150_s20  }
  0x6c   : > { %s571_s28 = scalar_lea.vmem [#allocation11], %s7186_s17  ;;  %s6106_s10 = smul.u32 384, %s7186_s17 }
  0x6d   : > { %s578_s14 = sshll.u32 %s571_s28, 4  ;;  %s6107_s27 = smul.u32 6144, %s6943_s29  ;;  %s579_s14 = int_to_ptr.vmem [resolvable:$true] %s578_s14 }
  0x6e   : > { %s6583_s7 = scalar_lea.hbm %s7227_s15, 16  ;;  %s6588_s13 = scalar_lea.hbm %s8917_s5, 48 }
  0x6f   : > { %p6584_p9 = scmp.ne.s32.totalorder %s7227_s15, %s6583_s7  ;;  %p6589_p4 = scmp.lt.u32.totalorder %s7227_s15, %s8917_s5 }
  0x70   : > { %p6590_p6 = scmp.lt.u32.totalorder %s6588_s13, %s6583_s7  ;;  %p6592_p1 = scmp.lt.u32.totalorder %s6583_s7, %s7227_s15 }
  0x71   : > { %p6586_p0 = pnand %p6584_p9, %p7233_p5 }
  0x72   : > { %p6591_p8 = por %p6590_p6, %p6589_p4 }
  0x73   : > { %p6587_p3 = pneg %p6586_p0 }
  0x74   : > { %p6593_p12 = por %p6592_p1, %p6591_p8 }
  0x76   : > { %p6594_p2 = pnand %p6593_p12, %p6587_p3 }
  0x78   : > { %6597 = shalt.err (!%p6594_p2)
}
  0x79   : > { %s6598_s18 = scalar_lea.vmem %s579_s14, 16  ;;  %s6957_s19 = smov [#allocation11]  }
  0x7a   : > { %p6599_p7 = scmp.ne.s32.totalorder %s579_s14, %s6598_s18  ;;  %s6603_s28 = sshll.u32 %s6957_s19, 4  ;;  %s6604_s28 = int_to_ptr.vmem [resolvable:$false] %s6603_s28 }
  0x7b   : > { %s6605_s3 = scalar_lea.vmem %s6604_s28, 32  ;;  %p6606_p9 = scmp.lt.s32.totalorder %s579_s14, %s6604_s28 }
  0x7c   : > { %p6601_p10 = pnand %p6599_p7, %p7233_p5  ;;  %p6607_p0 = scmp.lt.s32.totalorder %s6605_s3, %s6598_s18 }
  0x7e   : > { %p6602_p11 = pneg %p6601_p10  ;;  %p6608_p13 = por %p6607_p0, %p6606_p9 }
  0x80   : > { %p6609_p4 = pnand %p6608_p13, %p6602_p11 }
  0x82   : > { %6612 = shalt.err (!%p6609_p4)
}
  0x83   : > { %p8919_p6 = scmp.ne.s32.totalorder %s8914_s16, 0  ;;  %s8920_s6 = sld [smem:[#allocation43_spill]] }
  0x84   : > { %s589_s13 = scalar_lea.vmem [#allocation12], %s6106_s10 }
  0x85   : > { %6159 = dma.hbm_to_vmem [thread:$0]  (!%p8919_p6), %s7227_s15, 16, %s579_s14, %s7150_s20  }
  0x86   : > { %s596_s11 = sshll.u32 %s589_s13, 4  ;;  %s7285_s11 = int_to_ptr.vmem [resolvable:$true] %s596_s11 }
  0x89   : > { %s7281_s30 = scalar_lea.hbm %s8920_s6, %s6107_s27  ;;  %s6618_s19 = scalar_lea.hbm %s8920_s6, 18432 }
  0x8a   : > { %s6613_s18 = scalar_lea.hbm %s7281_s30, 6144  ;;  %p6619_p1 = scmp.lt.u32.totalorder %s7281_s30, %s8920_s6 }
  0x8b   : > { %p6614_p13 = scmp.ne.s32.totalorder %s7281_s30, %s6613_s18  ;;  %p6620_p12 = scmp.lt.u32.totalorder %s6618_s19, %s6613_s18 }
  0x8c   : > { %p6622_p7 = scmp.lt.u32.totalorder %s6613_s18, %s7281_s30 }
  0x8d   : > { %p6616_p3 = pnand %p6614_p13, %p7233_p5  ;;  %p6621_p2 = por %p6620_p12, %p6619_p1 }
  0x8f   : > { %p6617_p8 = pneg %p6616_p3  ;;  %p6623_p10 = por %p6622_p7, %p6621_p2 }
  0x91   : > { %p6624_p11 = pnand %p6623_p10, %p6617_p8 }
  0x93   : > { %6627 = shalt.err (!%p6624_p11)
}
  0x94   : > { %s6628_s10 = scalar_lea.vmem %s7285_s11, 6144  ;;  %s6958_s3 = smov [#allocation12]  }
  0x95   : > { %p6629_p9 = scmp.ne.s32.totalorder %s7285_s11, %s6628_s10  ;;  %s6633_s4 = sshll.u32 %s6958_s3, 4  ;;  %s6634_s4 = int_to_ptr.vmem [resolvable:$false] %s6633_s4 }
  0x96   : > { %s6635_s7 = scalar_lea.vmem %s6634_s4, 12288  ;;  %p6636_p13 = scmp.lt.s32.totalorder %s7285_s11, %s6634_s4 }
  0x97   : > { %p6631_p0 = pnand %p6629_p9, %p7233_p5  ;;  %p6637_p3 = scmp.lt.s32.totalorder %s6635_s7, %s6628_s10 }
  0x99   : > { %p6632_p4 = pneg %p6631_p0  ;;  %p6638_p1 = por %p6637_p3, %p6636_p13 }
  0x9b   : > { %p6639_p12 = pnand %p6638_p1, %p6632_p4 }
  0x9d   : > { %6642 = shalt.err (!%p6639_p12)
}
  0x9e   : > { %s6959_s13 = smov 384   ;;  %s6960_s18 = smov 24  }
  0x9f   : > { %6162 = dma.hbm_to_vmem [thread:$0]  (!%p8919_p6), %s7281_s30, 6144, %s7285_s11, %s7150_s20, %s6959_s13, %s6959_s13, %s6960_s18  }
  0xa0   : > { %s5092_s15 = sshll.u32 %s7186_s17, 7  ;;  %s5215_s14 = sshll.u32 %s6943_s29, 11 }
  0xa1   : > { %s8921_s8 = sld [smem:[#allocation45_spill]]  ;;  %s617_s10 = scalar_lea.vmem [#allocation13], %s5092_s15 }
  0xa2   : > { %s624_s3 = sshll.u32 %s617_s10, 4  ;;  %s7316_s3 = int_to_ptr.vmem [resolvable:$true] %s624_s3 }
  0xa7   : > { %s7314_s28 = scalar_lea.hbm %s8921_s8, %s5215_s14  ;;  %s6648_s7 = scalar_lea.hbm %s8921_s8, 6144 }
  0xa8   : > { %s6643_s4 = scalar_lea.hbm %s7314_s28, 2048  ;;  %p6649_p10 = scmp.lt.u32.totalorder %s7314_s28, %s8921_s8 }
  0xa9   : > { %p6644_p8 = scmp.ne.s32.totalorder %s7314_s28, %s6643_s4  ;;  %p6650_p11 = scmp.lt.u32.totalorder %s6648_s7, %s6643_s4 }
  0xaa   : > { %p6652_p0 = scmp.lt.u32.totalorder %s6643_s4, %s7314_s28 }
  0xab   : > { %p6646_p2 = pnand %p6644_p8, %p7233_p5  ;;  %p6651_p9 = por %p6650_p11, %p6649_p10 }
  0xad   : > { %p6647_p7 = pneg %p6646_p2  ;;  %p6653_p4 = por %p6652_p0, %p6651_p9 }
  0xaf   : > { %p6654_p13 = pnand %p6653_p4, %p6647_p7 }
  0xb1   : > { %6657 = shalt.err (!%p6654_p13)
}
  0xb2   : > { %s6658_s15 = scalar_lea.vmem %s7316_s3, 2048  ;;  %s6961_s14 = smov [#allocation13]  }
  0xb3   : > { %p6659_p3 = scmp.ne.s32.totalorder %s7316_s3, %s6658_s15  ;;  %s6663_s19 = sshll.u32 %s6961_s14, 4  ;;  %s6664_s19 = int_to_ptr.vmem [resolvable:$false] %s6663_s19 }
  0xb4   : > { %s6665_s27 = scalar_lea.vmem %s6664_s19, 4096  ;;  %p6666_p8 = scmp.lt.s32.totalorder %s7316_s3, %s6664_s19 }
  0xb5   : > { %p6661_p1 = pnand %p6659_p3, %p7233_p5  ;;  %p6667_p2 = scmp.lt.s32.totalorder %s6665_s27, %s6658_s15 }
  0xb7   : > { %p6662_p12 = pneg %p6661_p1  ;;  %p6668_p10 = por %p6667_p2, %p6666_p8 }
  0xb9   : > { %p6669_p11 = pnand %p6668_p10, %p6662_p12 }
  0xbb   : > { %6672 = shalt.err (!%p6669_p11)
}
  0xbc   : > { %s8922_s10 = smov 8   ;;  %s8923_s4 = smov 128  }
  0xbd   : > { %6165 = dma.hbm_to_vmem [thread:$0]  (!%p8919_p6), %s7314_s28, 2048, %s7316_s3, %s7150_s20, %s8923_s4, %s8923_s4, %s8922_s10  }
  0xbe   : > { %s7344_s30 = sadd.s32 4294967295, %s6951_s0   ;;  %s5082_s11 = sadd.s32 4294967294, %s6951_s0  }
  0xbf   : > { %p66_p7 = scmp.ne.s32.totalorder %s6927_s25, %s6923_s24  ;;  %p8861_p9 = scmp.eq.s32.totalorder %s7344_s30, 0 }
  0xc0   : > { %p155_p0 = scmp.ne.s32.totalorder %s6915_s22, %s6911_s21  ;;  %p465_p4 = scmp.eq.s32.totalorder %s7344_s30, 5 }
  0xc1   : > { %p7355_p13 = por %p8861_p9, %p66_p7  ;;  %p471_p3 = scmp.eq.s32.totalorder %s5082_s11, 5 }
  0xc2   : > { %p7361_p1 = por %p155_p0, %p8861_p9  ;;  %p8926_p12 = scmp.ne.s32.totalorder %s6931_s26, %s6927_s25 }
  0xc3   : > { %s8924_s7 = scalar_select %p7355_p13, 1, 0 }
  0xc4   : > { %s8925_s28 = scalar_select %p7361_p1, 1, 0 }
  0xc5   : > { %p7368_p8 = por %p465_p4, %p8926_p12  ;;  %p7372_p2 = por %p471_p3, %p66_p7 }
  0xc6   : > { %p5083_p10 = scmp.ge.s32.totalorder %s6951_s0, 1  ;;  %p478_p11 = scmp.lt.s32.totalorder %s6951_s0, 7 }
  0xc7   : > { %s8927_s3 = scalar_select %p7368_p8, 1, 0 }
  0xc8   : > { %s8929_s21 = scalar_select %p7372_p2, 1, 0 }
  0xc9   : > { %8928 = sst [smem:[#allocation35_spill]] %s8927_s3  ;;  %s8868_s13 = sshll.u32 %s7186_s17, 9 }
  0xca   : > { %8930 = sst [smem:[#allocation36_spill]] %s8929_s21  ;;  %p7379_p13 = pnand %p5083_p10, %p478_p11 }
  0xcb   : > { %s6962_s15 = smov [#allocation5]   ;;  %s8871_s19 = sshll.u32 %s6943_s29, 13 }
  0xcc   : > { %s8931_s18 = scalar_select %p7379_p13, 1, 0 }
  0xcd   : > { %s490_s14 = sshll.u32 %s6962_s15, 4  ;;  %p6140_p0 = pneg %p7379_p13  ;;  %s491_s14 = int_to_ptr.vmem [resolvable:$true] %s490_s14 }
  0xce   : > { %s8932_s12 = sld [smem:[#allocation49_spill]]  ;;  %s656_s6 = scalar_lea.vmem [#allocation14], %s8868_s13 }
  0xcf   : > { %s663_s8 = sshll.u32 %s656_s6, 4  ;;  %p7397_p7 = pnand %p6140_p0, %p8861_p9  ;;  %s7401_s8 = int_to_ptr.vmem [resolvable:$true] %s663_s8 }
  0xd0   : > { %s8934_s1 = sld [smem:[#allocation38_spill]] }
  0xd1   : > { %s8933_s26 = scalar_select %p7397_p7, 1, 0 }
  0xd2   : > { %p7411_p3 = pneg %p7397_p7 }
  0xd4   : > { %s7391_s5 = scalar_lea.hbm %s8932_s12, %s8871_s19 }
  0xd6   : > { %s6673_s21 = scalar_lea.hbm %s8934_s1, 384 }
  0xd7   : > { %p6674_p4 = scmp.ne.s32.totalorder %s8934_s1, %s6673_s21  ;;  %p6680_p11 = scmp.lt.u32.totalorder %s6673_s21, %s8934_s1 }
  0xd9   : > { %p6676_p12 = pnand %p7411_p3, %p6674_p4 }
  0xdb   : > { %p6677_p10 = pneg %p6676_p12 }
  0xdd   : > { %p6682_p0 = pnand %p6680_p11, %p6677_p10 }
  0xdf   : > { %6685 = shalt.err (!%p6682_p0)
}
  0xe0   : > { %s6686_s23 = scalar_lea.vmem %s491_s14, 384  ;;  %p6694_p1 = scmp.lt.s32.totalorder %s491_s14, %s491_s14 }
  0xe1   : > { %p6687_p9 = scmp.ne.s32.totalorder %s491_s14, %s6686_s23  ;;  %p6695_p13 = scmp.lt.s32.totalorder %s6686_s23, %s6686_s23 }
  0xe3   : > { %p6689_p2 = pnand %p6687_p9, %p7411_p3  ;;  %p6696_p6 = por %p6695_p13, %p6694_p1 }
  0xe5   : > { %p6690_p8 = pneg %p6689_p2 }
  0xe7   : > { %p6697_p5 = pnand %p6696_p6, %p6690_p8 }
  0xe9   : > { %6700 = shalt.err (!%p6697_p5)
}
  0xea   : > { %6143 = dma.hbm_to_vmem [thread:$0]  (!%p7397_p7), %s8934_s1, 384, %s491_s14, [#allocation6], %s8923_s4, %s8923_s4, %s8922_s10  }
  0xeb   : > { %s6701_s21 = scalar_lea.hbm %s7391_s5, 8192  ;;  %p8936_p2 = scmp.ne.s32.totalorder %s8918_s9, 0 }
  0xec   : > { %p6702_p9 = scmp.ne.s32.totalorder %s7391_s5, %s6701_s21  ;;  %s6706_s11 = scalar_lea.hbm %s8932_s12, 24576 }
  0xed   : > { %p6707_p5 = scmp.lt.u32.totalorder %s7391_s5, %s8932_s12  ;;  %p6708_p1 = scmp.lt.u32.totalorder %s6706_s11, %s6701_s21 }
  0xee   : > { %p6704_p13 = pnand %p6702_p9, %p8936_p2  ;;  %p6710_p4 = scmp.lt.u32.totalorder %s6701_s21, %s7391_s5 }
  0xef   : > { %p6709_p8 = por %p6708_p1, %p6707_p5 }
  0xf0   : > { %p6705_p6 = pneg %p6704_p13 }
  0xf1   : > { %p6711_p12 = por %p6710_p4, %p6709_p8 }
  0xf3   : > { %p6712_p10 = pnand %p6711_p12, %p6705_p6 }
  0xf5   : > { %6715 = shalt.err (!%p6712_p10)
}
  0xf6   : > { %s6716_s14 = scalar_lea.vmem %s7401_s8, 8192  ;;  %s6963_s24 = smov [#allocation14]  }
  0xf7   : > { %p6717_p11 = scmp.ne.s32.totalorder %s7401_s8, %s6716_s14  ;;  %s6721_s0 = sshll.u32 %s6963_s24, 4  ;;  %s6722_s0 = int_to_ptr.vmem [resolvable:$false] %s6721_s0 }
  0xf8   : > { %s6723_s13 = scalar_lea.vmem %s6722_s0, 16384  ;;  %p6724_p13 = scmp.lt.s32.totalorder %s7401_s8, %s6722_s0 }
  0xf9   : > { %p6719_p0 = pnand %p6717_p11, %p8936_p2  ;;  %p6725_p7 = scmp.lt.s32.totalorder %s6723_s13, %s6716_s14 }
  0xfb   : > { %p6720_p9 = pneg %p6719_p0  ;;  %p6726_p5 = por %p6725_p7, %p6724_p13 }
  0xfd   : > { %p6727_p1 = pnand %p6726_p5, %p6720_p9 }
  0xff   : > { %6730 = shalt.err (!%p6727_p1)
}
 0x100   : > { %s6964_s21 = smov 512   ;;  %s6965_s15 = smov 32  }
 0x101   : > { %p8937_p6 = scmp.ne.s32.totalorder %s8914_s16, 0  ;;  %s6966_s6 = smov [#allocation7]  }
 0x102   : > { %s503_s11 = sshll.u32 %s6966_s6, 4  ;;  %s6967_s23 = smov [#allocation8]   ;;  %s504_s11 = int_to_ptr.vmem [resolvable:$true] %s503_s11 }
 0x103   : > { %6168 = dma.hbm_to_vmem [thread:$0]  (!%p8937_p6), %s7391_s5, 8192, %s7401_s8, %s7150_s20, %s6964_s21, %s6964_s21, %s6965_s15  }
 0x104   : > { %s516_s24 = sshll.u32 %s6967_s23, 4  ;;  %s8938_s2 = sld [smem:[#allocation39_spill]]  ;;  %s517_s24 = int_to_ptr.vmem [resolvable:$true] %s516_s24 }
 0x10a   : > { %s6731_s14 = scalar_lea.hbm %s8938_s2, 384 }
 0x10b   : > { %p6732_p7 = scmp.ne.s32.totalorder %s8938_s2, %s6731_s14  ;;  %p6738_p12 = scmp.lt.u32.totalorder %s6731_s14, %s8938_s2 }
 0x10d   : > { %p6734_p8 = pnand %p6732_p7, %p7411_p3 }
 0x10f   : > { %p6735_p4 = pneg %p6734_p8 }
 0x111   : > { %p6740_p10 = pnand %p6738_p12, %p6735_p4 }
 0x113   : > { %6743 = shalt.err (!%p6740_p10)
}
 0x114   : > { %s6744_s5 = scalar_lea.vmem %s504_s11, 384  ;;  %p6752_p13 = scmp.lt.s32.totalorder %s504_s11, %s504_s11 }
 0x115   : > { %p6745_p11 = scmp.ne.s32.totalorder %s504_s11, %s6744_s5  ;;  %p6753_p5 = scmp.lt.s32.totalorder %s6744_s5, %s6744_s5 }
 0x117   : > { %p6747_p0 = pnand %p6745_p11, %p7411_p3  ;;  %p6754_p1 = por %p6753_p5, %p6752_p13 }
 0x119   : > { %p6748_p9 = pneg %p6747_p0 }
 0x11b   : > { %p6755_p6 = pnand %p6754_p1, %p6748_p9 }
 0x11d   : > { %6758 = shalt.err (!%p6755_p6)
}
 0x11e   : > { %p8939_p7 = scmp.ne.s32.totalorder %s8933_s26, 0  ;;  %s8940_s19 = sld [smem:[#allocation40_spill]] }
 0x120   : > { %6146 = dma.hbm_to_vmem [thread:$0]  (!%p8939_p7), %s8938_s2, 384, %s504_s11, [#allocation6], %s8923_s4, %s8923_s4, %s8922_s10  }
 0x124   : > { %s6759_s21 = scalar_lea.hbm %s8940_s19, 384 }
 0x125   : > { %p6760_p8 = scmp.ne.s32.totalorder %s8940_s19, %s6759_s21  ;;  %p6766_p12 = scmp.lt.u32.totalorder %s6759_s21, %s8940_s19 }
 0x127   : > { %p6762_p6 = pnand %p6760_p8, %p7411_p3 }
 0x129   : > { %p6763_p4 = pneg %p6762_p6 }
 0x12b   : > { %p6768_p10 = pnand %p6766_p12, %p6763_p4 }
 0x12d   : > { %6771 = shalt.err (!%p6768_p10)
}
 0x12e   : > { %s6772_s14 = scalar_lea.vmem %s517_s24, 384  ;;  %p6780_p13 = scmp.lt.s32.totalorder %s517_s24, %s517_s24 }
 0x12f   : > { %p6773_p11 = scmp.ne.s32.totalorder %s517_s24, %s6772_s14  ;;  %p6781_p5 = scmp.lt.s32.totalorder %s6772_s14, %s6772_s14 }
 0x131   : > { %p6775_p0 = pnand %p6773_p11, %p7411_p3  ;;  %p6782_p1 = por %p6781_p5, %p6780_p13 }
 0x133   : > { %p6776_p9 = pneg %p6775_p0 }
 0x135   : > { %p6783_p2 = pnand %p6782_p1, %p6776_p9 }
 0x137   : > { %6786 = shalt.err (!%p6783_p2)
}
 0x138   : > { %6149 = dma.hbm_to_vmem [thread:$0]  (!%p8939_p7), %s8940_s19, 384, %s517_s24, [#allocation9], %s8923_s4, %s8923_s4, %s8922_s10  }
 0x139   : > { %s8941_s27 = sshll.u32 %s6943_s29, 13  ;;  %s8942_s8 = sld [smem:[#allocation51_spill]] }
 0x13a   : > { %s8943_s3 = sshll.u32 %s7186_s17, 9  ;;  %p8944_p2 = scmp.ne.s32.totalorder %s8918_s9, 0 }
 0x13b   : > { %s684_s26 = scalar_lea.vmem [#allocation15], %s8943_s3 }
 0x13c   : > { %s691_s21 = sshll.u32 %s684_s26, 4  ;;  %s7503_s21 = int_to_ptr.vmem [resolvable:$true] %s691_s21 }
 0x13f   : > { %s7499_s12 = scalar_lea.hbm %s8942_s8, %s8941_s27  ;;  %s6792_s23 = scalar_lea.hbm %s8942_s8, 24576 }
 0x140   : > { %s6787_s15 = scalar_lea.hbm %s7499_s12, 8192  ;;  %p6793_p6 = scmp.lt.u32.totalorder %s7499_s12, %s8942_s8 }
 0x141   : > { %p6788_p3 = scmp.ne.s32.totalorder %s7499_s12, %s6787_s15  ;;  %p6794_p4 = scmp.lt.u32.totalorder %s6792_s23, %s6787_s15 }
 0x142   : > { %p6796_p10 = scmp.lt.u32.totalorder %s6787_s15, %s7499_s12 }
 0x143   : > { %p6790_p8 = pnand %p6788_p3, %p8944_p2  ;;  %p6795_p12 = por %p6794_p4, %p6793_p6 }
 0x145   : > { %p6791_p7 = pneg %p6790_p8  ;;  %p6797_p11 = por %p6796_p10, %p6795_p12 }
 0x147   : > { %p6798_p0 = pnand %p6797_p11, %p6791_p7 }
 0x149   : > { %6801 = shalt.err (!%p6798_p0)
}
 0x14a   : > { %s6802_s17 = scalar_lea.vmem %s7503_s21, 8192  ;;  %s6968_s11 = smov [#allocation15]  }
 0x14b   : > { %p6803_p9 = scmp.ne.s32.totalorder %s7503_s21, %s6802_s17  ;;  %s6807_s13 = sshll.u32 %s6968_s11, 4  ;;  %s6808_s13 = int_to_ptr.vmem [resolvable:$false] %s6807_s13 }
 0x14c   : > { %s6809_s27 = scalar_lea.vmem %s6808_s13, 16384  ;;  %p6810_p1 = scmp.lt.s32.totalorder %s7503_s21, %s6808_s13 }
 0x14d   : > { %p6805_p13 = pnand %p6803_p9, %p8944_p2  ;;  %p6811_p3 = scmp.lt.s32.totalorder %s6809_s27, %s6802_s17 }
 0x14f   : > { %p6806_p5 = pneg %p6805_p13  ;;  %p6812_p8 = por %p6811_p3, %p6810_p1 }
 0x151   : > { %p6813_p6 = pnand %p6812_p8, %p6806_p5 }
 0x153   : > { %6816 = shalt.err (!%p6813_p6)
}
 0x154   : > { %p8945_p7 = scmp.ne.s32.totalorder %s8914_s16, 0  ;;  %p8946_p2 = scmp.ne.s32.totalorder %s8931_s18, 0 }
 0x155   : > { %s711_s9 = sand.u32 (!%p8946_p2), 1, %s7344_s30   ;;  %s8875_s5 = sand.u32 (!%p8946_p2), 1, %s6927_s25  }
 0x156   : > { %6171 = dma.hbm_to_vmem [thread:$0]  (!%p8945_p7), %s7499_s12, 8192, %s7503_s21, %s7150_s20, %s8923_s4, %s8923_s4, %s8922_s10  }
 0x157   : > { %709 = sbr.rel (%p8946_p2) target bundleno = 5378 (0x1502), region = 84  ;;  %s712_s16 = scalar_lea.sflag (!%p8946_p2), [#allocation3], %s711_s9 }
 0x158   : > { %s7536_s1 = smul.u32 (!%p8946_p2), 24, %s8875_s5  ;;  %p8947_p4 = scmp.ne.s32.totalorder (!%p8946_p2), %s8924_s7, 0 }
 0x15a   : > { %s7539_s3 = scalar_lea.vmem (!%p8946_p2), [#allocation2], %s7536_s1 }
 0x15e   : > { %6890 = dma.done.wait (%p8947_p4), %s712_s16, 384  }
 0x15f   : > { %6892 = vsyncadd (%p8947_p4), %s712_s16, 4294966912  ;;  %p8948_p12 = scmp.eq.s32.totalorder %s7344_s30, 0 }
 0x161   : > { %6894 = dma.done.wait (%p8948_p12), [#allocation6], 768   ;;  %p8949_p10 = pmov %p8948_p12 }
 0x163   : > { %6896 = vsyncadd (%p8949_p10), [#allocation6], 4294966528  ;;  %p8950_p11 = pmov %p8949_p10 }
 0x164   : > { %p8951_p0 = pmov %p8949_p10 }
 0x165   : > { %6898 = dma.done.wait (%p8950_p11), [#allocation9], 384  }
 0x166   : > { %6900 = vsyncadd (%p8951_p0), [#allocation9], 4294966912  ;;  %s7554_s20 = sand.u32 1, %s6915_s22   ;;  %p8952_p9 = scmp.ne.s32.totalorder %s8925_s28, 0 }
 0x168   : > { %6902 = dma.done.wait (%p8952_p9), %s712_s16, 24608  }
 0x169   : > { %6904 = vsyncadd (%p8952_p9), %s712_s16, 4294942688  ;;  %s8953_s4 = sld [smem:[#allocation26_spill]]  ;;  %s6109_s7 = smul.u32 384, %s7554_s20 }
 0x16a   : > { %s5105_s30 = sshll.u32 %s7554_s20, 7  ;;  %s5106_s18 = sshll.u32 %s7554_s20, 9 }
 0x16b   : > { %s8954_s15 = sld [smem:[#allocation46_spill]]  ;;  %s8955_s0 = sld [smem:[#allocation47_spill]] }
 0x16c   : > { %s8956_s13 = sld [smem:[#allocation48_spill]]  ;;  %s8957_s5 = sld [smem:[#allocation44_spill]] }
 0x16d   : > { %s8958_s29 = sld [smem:[#allocation50_spill]]  ;;  %s743_s23 = scalar_lea.vmem [#allocation11], %s7554_s20 }
 0x16e   : > { %s7599_s17 = scalar_lea.vmem [#allocation13], %s5105_s30  ;;  %s7601_s11 = scalar_lea.vmem [#allocation14], %s5106_s18 }
 0x16f   : > { %p876_p13 = scmp.lt.s32.totalorder %s8953_s4, 2  ;;  %p5109_p5 = scmp.ne.s32.totalorder %s8953_s4, 0 }
 0x170   : > { %v900_v0 = vld [vmem:[%s7539_s3] sm:$0xff] (!%p5109_p5)  ;;  %v901_v1 = vld [vmem:[%s7539_s3 + $0x8] sm:$0xff] (!%p5109_p5)  ;;  %v902_v2 = vld [vmem:[%s7539_s3 + $0x10] sm:$0xff] (!%p5109_p5) }
 0x171   : > { %s7566_s12 = scalar_select %p876_p13, %s8953_s4, 2 }
 0x173   : > { %s6110_s28 = smul.u32 3, %s7566_s12  ;;  %s882_s24 = scalar_lea.vmem %s8954_s15, %s7566_s12 }
 0x174   : > { %s885_s14 = scalar_lea.vmem %s8955_s0, %s7566_s12  ;;  %s888_s27 = scalar_lea.vmem %s8956_s13, %s7566_s12 }
 0x175   : > { %s7584_s10 = scalar_lea.vmem %s8957_s5, %s6110_s28  ;;  %s5108_s2 = sshll.u32 %s7566_s12, 2 }
 0x176   : > { %s7590_s22 = scalar_lea.vmem %s8958_s29, %s5108_s2  ;;  %s8959_s15 = sld [smem:[#allocation52_spill]] }
 0x177   : > { %s7597_s0 = scalar_lea.vmem [#allocation12], %s6109_s7  ;;  %s7603_s13 = scalar_lea.vmem [#allocation15], %s5106_s18 }
 0x178   : > { %s7606_s5 = scalar_lea.vmem [#allocation16], %s7536_s1  ;;  %899 = sbr.rel (%p5109_p5) target bundleno = 383 (0x17f), region = 128 }
 0x179   : > { %903 = vst [vmem:[%s7606_s5] sm:$0xff] (!%p5109_p5), %v900_v0  ;;  %904 = vst [vmem:[%s7606_s5 + $0x8] sm:$0xff] (!%p5109_p5), %v901_v1 }
 0x17a   : > { %905 = vst [vmem:[%s7606_s5 + $0x10] sm:$0xff] (!%p5109_p5), %v902_v2 }
 0x17c   : > { %s895_s6 = scalar_lea.vmem %s8959_s15, %s7566_s12 }
 0x17f PF: > { %v964_v6 = vld [vmem:[%s7597_s0 + $0x8] sm:$0xff]  ;;  %v967_v7 = vld [vmem:[%s7597_s0 + $0x20] sm:$0xff]  ;;  %v6969_v10 = vmov 0.0|0.0   ;;  %v966_v11 = vld [vmem:[%s7597_s0 + $0x18] sm:$0xff]  ;;  %vm6971_vm0 = vmmov 0   ;;  %s8960_s2 = scalar_lea.vmem [#allocation10], %s7554_s20 }
 0x180   : > { %v906_v3 = vld [vmem:[%s7606_s5] sm:$0xff]  ;;  %v907_v5 = vld [vmem:[%s7606_s5 + $0x8] sm:$0xff]  ;;  %v5840_v9 = vpack.c.bf16 %v967_v7, %v964_v6  ;;  %5872 = vmatprep.subr.bf16.mxu1 %v6969_v10  ;;  %v965_v12 = vld [vmem:[%s7597_s0 + $0x10] sm:$0xff]  ;;  %s6972_s29 = smov 8   ;;  %s6973_s19 = smov 120   ;;  %vm1258_vm1 = vcmask 130048  }
 0x181   : > { %v908_v4 = vld [vmem:[%s7606_s5 + $0x10] sm:$0xff]  ;;  %911 = vadd.xlane.f32.xlu0 %v906_v3  ;;  %v963_v8 = vld [vmem:[%s7597_s0] sm:$0xff]  ;;  %v970_v16 = vld [vmem:[%s7597_s0 + $0x38] sm:$0xff]  ;;  %s6974_s8 = smov 112   ;;  %vm1357_vm4 = vcmask 195584   ;;  %s6975_s1 = smov 96  }
 0x182   : > { %915 = vadd.xlane.f32.xlu1 %v908_v4  ;;  %v968_v13 = vld [vmem:[%s7597_s0 + $0x28] sm:$0xff]  ;;  %v5842_v14 = vpack.c.bf16 %v966_v11, %v963_v8  ;;  %v973_v17 = vld [vmem:[%s7597_s0 + $0x50] sm:$0xff]  ;;  %5841 = vmatprep.subr.bf16.mxu0 %v5840_v9  ;;  %v971_v21 = vld [vmem:[%s7597_s0 + $0x40] sm:$0xff]  ;;  %s6976_s3 = smov 80   ;;  %s6977_s20 = smov 64  }
 0x183   : > { %v5873_v15 = vpack.c.bf16 %v968_v13, %v965_v12  ;;  %v969_v18 = vld [vmem:[%s7597_s0 + $0x30] sm:$0xff]  ;;  %v5844_v19 = vpack.c.bf16 %v973_v17, %v970_v16  ;;  %v972_v20 = vld [vmem:[%s7597_s0 + $0x48] sm:$0xff]  ;;  %v974_v22 = vld [vmem:[%s7597_s0 + $0x58] sm:$0xff]  ;;  %v6970_v16 = vmov 0.0   ;;  %s6979_s4 = smov 32   ;;  %s6980_s7 = smov 16  }
 0x184   : > { %5843 = vmatpush1.bf16.msra.mxu0 %v5842_v14  ;;  %v5846_v23 = vpack.c.bf16 %v972_v20, %v969_v18  ;;  %v5876_v24 = vpack.c.bf16 %v974_v22, %v971_v21  ;;  %v976_v25 = vld [vmem:[%s7597_s0 + $0x68] sm:$0xff]  ;;  %v979_v26 = vld [vmem:[%s7597_s0 + $0x80] sm:$0xff]  ;;  %v978_v29 = vld [vmem:[%s7597_s0 + $0x78] sm:$0xff]  ;;  %1092 = vmatprep.mubr.f32.mxu0 %v6970_v16  ;;  %s8968_s12 = sld [smem:[#allocation35_spill]] }
 0x185   : > { %913 = vadd.xlane.f32.xlu0 %v907_v5  ;;  %5874 = vmatpush3.bf16.msra.mxu1 %v5873_v15  ;;  %v975_v27 = vld [vmem:[%s7597_s0 + $0x60] sm:$0xff]  ;;  %v5848_v28 = vpack.c.bf16 %v979_v26, %v976_v25  ;;  %v977_v30 = vld [vmem:[%s7597_s0 + $0x70] sm:$0xff]  ;;  %v980_v31 = vld [vmem:[%s7597_s0 + $0x88] sm:$0xff] }
 0x186   : > { %5845 = vmatprep.subr.bf16.mxu0 %v5844_v19  ;;  %5875 = vmatprep.subr.bf16.mxu1 %v6969_v10  ;;  %v5850_v32 = vpack.c.bf16 %v978_v29, %v975_v27  ;;  %v5879_v33 = vpack.c.bf16 %v980_v31, %v977_v30  ;;  %v982_v46 = vld [vmem:[%s7597_s0 + $0x98] sm:$0xff]  ;;  %v985_v47 = vld [vmem:[%s7597_s0 + $0xb0] sm:$0xff]  ;;  %v984_v50 = vld [vmem:[%s7597_s0 + $0xa8] sm:$0xff] }
 0x187   : > { %v5852_v48 = vpack.c.bf16 %v985_v47, %v982_v46  ;;  %v981_v49 = vld [vmem:[%s7597_s0 + $0x90] sm:$0xff]  ;;  %v983_v51 = vld [vmem:[%s7597_s0 + $0xa0] sm:$0xff]  ;;  %v986_v53 = vld [vmem:[%s7597_s0 + $0xb8] sm:$0xff]  ;;  %5487 = vmatprep.mubr.msk.f32.mxu1 %vm6971_vm0, %v6970_v16 }
 0x188   : > { %5847 = vmatpush1.bf16.msra.mxu0 %v5846_v23  ;;  %v5854_v52 = vpack.c.bf16 %v984_v50, %v981_v49  ;;  %v5882_v54 = vpack.c.bf16 %v986_v53, %v983_v51  ;;  %v988_v55 = vld [vmem:[%s7597_s0 + $0xc8] sm:$0xff]  ;;  %v991_v56 = vld [vmem:[%s7597_s0 + $0xe0] sm:$0xff]  ;;  %v990_v59 = vld [vmem:[%s7597_s0 + $0xd8] sm:$0xff] }
 0x189   : > { %5877 = vmatpush3.bf16.msra.mxu1 %v5876_v24  ;;  %5849 = vmatprep.subr.bf16.mxu0 %v5848_v28  ;;  %v5856_v57 = vpack.c.bf16 %v991_v56, %v988_v55  ;;  %v987_v58 = vld [vmem:[%s7597_s0 + $0xc0] sm:$0xff]  ;;  %v989_v60 = vld [vmem:[%s7597_s0 + $0xd0] sm:$0xff]  ;;  %v992_v62 = vld [vmem:[%s7597_s0 + $0xe8] sm:$0xff] }
 0x18a   : > { %5878 = vmatprep.subr.bf16.mxu1 %v6969_v10  ;;  %v5858_v61 = vpack.c.bf16 %v990_v59, %v987_v58  ;;  %v5885_v63 = vpack.c.bf16 %v992_v62, %v989_v60  ;;  %v994_v0 = vld [vmem:[%s7597_s0 + $0xf8] sm:$0xff]  ;;  %v997_v1 = vld [vmem:[%s7597_s0 + $0x110] sm:$0xff]  ;;  %v1000_v8 = vld [vmem:[%s7597_s0 + $0x128] sm:$0xff]  ;;  %p8971_p3 = scmp.ne.s32.totalorder %s8968_s12, 0 }
 0x18b   : > { %v5860_v2 = vpack.c.bf16 %v997_v1, %v994_v0  ;;  %v998_v7 = vld [vmem:[%s7597_s0 + $0x118] sm:$0xff]  ;;  %v1003_v9 = vld [vmem:[%s7597_s0 + $0x140] sm:$0xff]  ;;  %v1001_v15 = vld [vmem:[%s7597_s0 + $0x130] sm:$0xff] }
 0x18c   : > { %5851 = vmatpush1.bf16.msra.mxu0 %v5850_v32  ;;  %v5864_v12 = vpack.c.bf16 %v1003_v9, %v1000_v8  ;;  %v999_v13 = vld [vmem:[%s7597_s0 + $0x120] sm:$0xff]  ;;  %v1002_v14 = vld [vmem:[%s7597_s0 + $0x138] sm:$0xff]  ;;  %v1004_v18 = vld [vmem:[%s7597_s0 + $0x148] sm:$0xff] }
 0x18d   : > { %5880 = vmatpush3.bf16.msra.mxu1 %v5879_v33  ;;  %5853 = vmatprep.subr.bf16.mxu0 %v5852_v48  ;;  %v5866_v17 = vpack.c.bf16 %v1002_v14, %v999_v13  ;;  %v1006_v19 = vld [vmem:[%s7597_s0 + $0x158] sm:$0xff]  ;;  %v1009_v20 = vld [vmem:[%s7597_s0 + $0x170] sm:$0xff]  ;;  %v5891_v21 = vpack.c.bf16 %v1004_v18, %v1001_v15  ;;  %v1008_v24 = vld [vmem:[%s7597_s0 + $0x168] sm:$0xff] }
 0x18e   : > { %5881 = vmatprep.subr.bf16.mxu1 %v6969_v10  ;;  %v5868_v22 = vpack.c.bf16 %v1009_v20, %v1006_v19  ;;  %v1005_v23 = vld [vmem:[%s7597_s0 + $0x150] sm:$0xff]  ;;  %v1007_v25 = vld [vmem:[%s7597_s0 + $0x160] sm:$0xff]  ;;  %v1010_v26 = vld [vmem:[%s7597_s0 + $0x178] sm:$0xff] }
 0x18f   : > { %v5870_v27 = vpack.c.bf16 %v1008_v24, %v1005_v23  ;;  %v5894_v28 = vpack.c.bf16 %v1010_v26, %v1007_v25  ;;  %v1011_v55 = vld [vmem:[%s7584_s10] sm:$0x7]  ;;  %v1194_v23 = vld [vmem:[#allocation7] sm:$0xff]  ;;  %v1191_v25 = vld [vmem:[#allocation5] sm:$0xff]  ;;  %s6978_s10 = smov 48  }
 0x190   : > { %5855 = vmatpush1.bf16.msra.mxu0 %v5854_v52  ;;  %v1195_v26 = vld [vmem:[#allocation7 + $0x8] sm:$0xff]  ;;  %vm7742_vm2 = vmpackc.low %vm1258_vm1, %vm1258_vm1 }
 0x191   : > { %5883 = vmatpush3.bf16.msra.mxu1 %v5882_v54  ;;  %5857 = vmatprep.subr.bf16.mxu0 %v5856_v57 }
 0x192   : > { %5884 = vmatprep.subr.bf16.mxu1 %v6969_v10 }
 0x194   : > { %5859 = vmatpush1.bf16.msra.mxu0 %v5858_v61 }
 0x195   : > { %5886 = vmatpush3.bf16.msra.mxu1 %v5885_v63  ;;  %5861 = vmatprep.subr.bf16.mxu0 %v5860_v2 }
 0x196   : > { %5887 = vmatprep.subr.bf16.mxu1 %v6969_v10 }
 0x20e   : > { %v912_v34 = vpop.xlane.xlu0 %911 }
 0x20f   : > { %v916_v35 = vpop.xlane.xlu1 %915  ;;  %v918_v36 = vmul.f32 0.0078125, %v912_v34 }
 0x210   : > { %v920_v37 = vmul.f32 0.0078125, %v916_v35 }
 0x211   : > { %v7640_v38 = vsub.f32 %v906_v3, %v918_v36  ;;  %v993_v3 = vld [vmem:[%s7597_s0 + $0xf0] sm:$0xff] }
 0x212   : > { %v7642_v39 = vsub.f32 %v908_v4, %v920_v37  ;;  %v914_v40 = vpop.xlane.xlu0 %913  ;;  %v996_v4 = vld [vmem:[%s7597_s0 + $0x108] sm:$0xff] }
 0x213   : > { %v919_v41 = vmul.f32 0.0078125, %v914_v40  ;;  %v924_v42 = vmul.f32 %v7640_v38, %v7640_v38  ;;  %v5862_v6 = vpack.c.bf16 %v996_v4, %v993_v3 }
 0x214   : > { %v926_v43 = vmul.f32 %v7642_v39, %v7642_v39 }
 0x215   : > { %927 = vadd.xlane.f32.xlu1 %v924_v42  ;;  %v7648_v44 = vsub.f32 %v907_v5, %v919_v41  ;;  %v995_v5 = vld [vmem:[%s7597_s0 + $0x100] sm:$0xff]  ;;  %5863 = vmatpush1.bf16.msra.mxu0 %v5862_v6  ;;  %s4794_s0 = sshll.u32 %s7606_s5, 4  ;;  %s8753_s0 = int_to_ptr.vmem [resolvable:$true] %s4794_s0 }
 0x216   : > { %v5888_v11 = vpack.c.bf16 %v998_v7, %v995_v5  ;;  %5865 = vmatprep.subr.bf16.mxu0 %v5864_v12  ;;  %v5110_v41 = vld [vmem:[%s8960_s2] ss:$0 sm:$0xff] }
 0x217   : > { %v925_v45 = vmul.f32 %v7648_v44, %v7648_v44 }
 0x218   : > { %5889 = vmatpush3.bf16.msra.mxu1 %v5888_v11 }
 0x219   : > { %931 = vadd.xlane.f32.xlu1 %v926_v43  ;;  %929 = vadd.xlane.f32.xlu0 %v925_v45  ;;  %v5111_v43 = vld [vmem:[%s743_s23] ss:$0 sm:$0xff]  ;;  %s8967_s23 = sld [smem:[#allocation27_spill]] }
 0x21a   : > { %5890 = vmatprep.subr.bf16.mxu1 %v6969_v10  ;;  %5867 = vmatpush1.bf16.msra.mxu0 %v5866_v17 }
 0x21b   : > { %5869 = vmatprep.subr.bf16.mxu0 %v5868_v22 }
 0x21c   : > { %5892 = vmatpush3.bf16.msra.mxu1 %v5891_v21 }
 0x21d   : > { %5893 = vmatprep.subr.bf16.mxu1 %v6969_v10 }
 0x21e   : > { %5871 = vmatpush1.bf16.msra.mxu0 %v5870_v27 }
 0x21f   : > { %5896 = vmatprep.subr.bf16.mxu0 %v6969_v10 }
 0x220   : > { %5895 = vmatpush3.bf16.msra.mxu1 %v5894_v28  ;;  %v1192_v28 = vld [vmem:[#allocation5 + $0x8] sm:$0xff] }
 0x221   : > { %5900 = vmatprep.subr.bf16.mxu1 %v6969_v10 }
 0x2a2   : > { %v928_v29 = vpop.xlane.xlu1 %927 }
 0x2a3   : > { %v933_v30 = vmul.f32 0.0078125, %v928_v29 }
 0x2a5   : > { %v936_v31 = vadd.f32 1e-06, %v933_v30 }
 0x2a6   : > { %v932_v32 = vpop.xlane.xlu1 %931  ;;  %v930_v33 = vpop.xlane.xlu0 %929 }
 0x2a7   : > { %6364 = vrsqrt.f32 %v936_v31  ;;  %v935_v34 = vmul.f32 0.0078125, %v932_v32  ;;  %v934_v35 = vmul.f32 0.0078125, %v930_v33  ;;  %v1197_v32 = vld [vmem:[#allocation8] sm:$0xff]  ;;  %v1198_v33 = vld [vmem:[#allocation8 + $0x8] sm:$0xff] }
 0x2a9   : > { %v938_v36 = vadd.f32 1e-06, %v935_v34  ;;  %v937_v37 = vadd.f32 1e-06, %v934_v35  ;;  %v1196_v34 = vld [vmem:[#allocation7 + $0x10] sm:$0xff] }
 0x2ab   : > { %6366 = vrsqrt.f32 %v938_v36  ;;  %v1193_v36 = vld [vmem:[#allocation5 + $0x10] sm:$0xff] }
 0x2ac   : > { %6368 = vrsqrt.f32 %v937_v37 }
 0x2b1   : > { %v6365_v40 = vpop.eup %6364 }
 0x2b2   : > { %v942_v42 = vmul.f32 %v6365_v40, %v7640_v38 }
 0x2b4   : > { %v951_v45 = vmul.f32 %v5110_v41, %v942_v42 }
 0x2b5   : > { %v6367_v46 = vpop.eup %6366 }
 0x2b6   : > { %v6369_v47 = vpop.eup %6368  ;;  %v960_v48 = vadd.f32 %v5111_v43, %v951_v45  ;;  %v944_v50 = vmul.f32 %v6367_v46, %v7642_v39  ;;  %v1013_v39 = vlaneseq }
 0x2b7   : > { %v943_v49 = vmul.f32 %v6369_v47, %v7648_v44 }
 0x2b8   : > { %1093 = vmatmul.mubr.f32.vlgmr.msra.gmra.mrb[0].mxu0 %v960_v48  ;;  %5488 = vmatmul.mubr.f32.vlgmr.msra.gmra.mrb[0].mxu1 %v960_v48  ;;  %v953_v52 = vmul.f32 %v5110_v41, %v944_v50  ;;  %v7709_v53 = vshrl.u32 %v1013_v39, 7  ;;  %v1199_v48 = vld [vmem:[#allocation8 + $0x10] sm:$0xff] }
 0x2b9   : > { %1098 = vmatprep.mubr.f32.mxu0 %v6970_v16  ;;  %5490 = vmatprep.mubr.msk.f32.mxu1 %vm6971_vm0, %v6970_v16  ;;  %v952_v51 = vmul.f32 %v5110_v41, %v943_v49 }
 0x2ba   : > { %v962_v44 = vadd.f32 %v5111_v43, %v953_v52  ;;  %v1019_v54 = vsub.s32 1, %v7709_v53  ;;  %v1023_v56 = vsub.s32 2, %v7709_v53  ;;  %v1015_v6 = vsub.s32 0, %v7709_v53 }
 0x2bb   : > { %v961_v38 = vadd.f32 %v5111_v43, %v952_v51 }
 0x2bc   : > { %v1020_v57 = vrot.slane %v1011_v55, %v1019_v54  ;;  %v1024_v62 = vrot.slane %v1011_v55, %v1023_v56  ;;  %v1016_v15 = vrot.slane %v1011_v55, %v1015_v6 }
 0x2bd   : > { %1099 = vmatmul.mubr.f32.gmra.mrb[2].mxu0 %v961_v38  ;;  %5491 = vmatmul.mubr.f32.gmra.mrb[2].mxu1 %v961_v38 }
 0x2be   : > { %1104 = vmatprep.mubr.f32.mxu0 %v6970_v16  ;;  %5493 = vmatprep.mubr.msk.f32.mxu1 %vm6971_vm0, %v6970_v16 }
 0x2c1   : > { %1105 = vmatmul.mubr.f32.gmra.mrb[4].mxu0 %v962_v44  ;;  %5494 = vmatmul.mubr.f32.gmra.mrb[4].mxu1 %v962_v44 }
 0x2c2   : > { %5502 = vmatprep.mubr.msk.f32.mxu0 %vm6971_vm0, %v6970_v16  ;;  %5517 = vmatprep.mubr.msk.f32.mxu1 %vm6971_vm0, %v6970_v16 }
 0x38b   : > { %v1094_v58 = vpop.f32.mrb[0].mxu0  ;;  %v1177_v59 = vpop.f32.mrb[0].mxu1 }
 0x38c   : > { %v1096_v60 = vpop.f32.mrb[1].mxu0  ;;  %v5489_v61 = vpop.f32.mrb[1].mxu1  ;;  %v1178_v2 = vadd.f32 %v1177_v59, %v1024_v62  ;;  %v1095_v19 = vadd.f32 %v1094_v58, %v1016_v15 }
 0x38d   : > { %v1097_v63 = vadd.f32 %v1096_v60, %v1020_v57 }
 0x38e   : > { %v1200_v60 = vmul.f32 %v1191_v25, %v1095_v19 }
 0x38f   : > { %1242 = vrot.lane.b32.xlu1 %v1097_v63, %s6972_s29  ;;  %1230 = vrot.lane.b32.xlu0 %v1097_v63, %s6973_s19  ;;  %v1227_v30 = vmul.f32 %v1191_v25, %v1097_v63 }
 0x390   : > { %v1100_v0 = vpop.f32.mrb[2].mxu0  ;;  %v1182_v1 = vpop.f32.mrb[2].mxu1 }
 0x391   : > { %v1183_v3 = vadd.f32 %v1182_v1, %v1024_v62  ;;  %v1102_v4 = vpop.f32.mrb[3].mxu0  ;;  %v5492_v5 = vpop.f32.mrb[3].mxu1  ;;  %v1101_v20 = vadd.f32 %v1100_v0, %v1016_v15 }
 0x392   : > { %v1103_v7 = vadd.f32 %v1102_v4, %v1020_v57 }
 0x393   : > { %v5901_v8 = vpack.c.bf16 %v1183_v3, %v1178_v2  ;;  %v7721_v9 = vpack.i.bf16 %v1183_v3, %v1178_v2  ;;  %v1201_v3 = vmul.f32 %v1192_v28, %v1101_v20 }
 0x394   : > { %v1106_v11 = vpop.f32.mrb[4].mxu0  ;;  %v1187_v12 = vpop.f32.mrb[4].mxu1  ;;  %1232 = vrot.lane.b32.xlu1 %v1103_v7, %s6973_s19  ;;  %v1228_v35 = vmul.f32 %v1192_v28, %v1103_v7 }
 0x395   : > { %v1108_v13 = vpop.f32.mrb[5].mxu0  ;;  %v5495_v14 = vpop.f32.mrb[5].mxu1  ;;  %5902 = vmatpush3.bf16.msra.mxu1 %v5901_v8  ;;  %v7727_v18 = vadd.f32 %v1187_v12, %v1024_v62  ;;  %v1107_v21 = vadd.f32 %v1106_v11, %v1016_v15 }
 0x396   : > { %v1109_v17 = vadd.f32 %v1108_v13, %v1020_v57  ;;  %5515 = vmatprep.subr.mxu1 %v6970_v16 }
 0x397   : > { %v1202_v13 = vmul.f32 %v1193_v36, %v1107_v21 }
 0x398   : > { %1234 = vrot.lane.b32.xlu0 %v1109_v17, %s6973_s19  ;;  %1244 = vrot.lane.b32.xlu1 %v1103_v7, %s6972_s29  ;;  %v1229_v47 = vmul.f32 %v1193_v36, %v1109_v17 }
 0x399   : > { %5516 = vmatpush3.msra.mxu1 %v7727_v18 }
 0x39a   : > { %5907 = vmatprep.subr.bf16.mxu1 %v6969_v10 }
 0x39c   : > { %1203 = vrot.lane.b32.xlu0 %v1095_v19, %s6973_s19  ;;  %1246 = vrot.lane.b32.xlu1 %v1109_v17, %s6972_s29 }
 0x3a0   : > { %1215 = vrot.lane.b32.xlu1 %v1095_v19, %s6972_s29  ;;  %1205 = vrot.lane.b32.xlu0 %v1101_v20, %s6973_s19 }
 0x3a4   : > { %1217 = vrot.lane.b32.xlu1 %v1101_v20, %s6972_s29  ;;  %1207 = vrot.lane.b32.xlu0 %v1107_v21, %s6973_s19  ;;  %s8970_s19 = sand.u32 1, %s6927_s25  }
 0x3a8   : > { %1219 = vrot.lane.b32.xlu1 %v1107_v21, %s6972_s29 }
 0x401   : > { %v1243_v22 = vpop.permute.xlu1 %1242  ;;  %v1231_v24 = vpop.permute.xlu0 %1230 }
 0x402   : > { %v1236_v27 = vmul.f32 %v1231_v24, %v1194_v23  ;;  %v1248_v42 = vmul.f32 %v1243_v22, %v1197_v32 }
 0x404   : > { %v1239_v37 = vadd.f32 %v1236_v27, %v1227_v30 }
 0x406   : > { %v1233_v29 = vpop.permute.xlu1 %1232  ;;  %v1251_v49 = vadd.f32 %v1248_v42, %v1239_v37 }
 0x407   : > { %v1237_v31 = vmul.f32 %v1233_v29, %v1195_v26  ;;  %v1255_v29 = vand.u32 127, %v1013_v39 }
 0x409   : > { %v1240_v43 = vadd.f32 %v1237_v31, %v1228_v35  ;;  %vm1256_vm3 = vcmp.ge.s32.totalorder %v1255_v29, 18 }
 0x40a   : > { %v1245_v40 = vpop.permute.xlu1 %1244  ;;  %v1235_v41 = vpop.permute.xlu0 %1234  ;;  %v7800_v30 = vsel %vm1256_vm3, -1e+30, %v6970_v16 }
 0x40b   : > { %v1249_v45 = vmul.f32 %v1245_v40, %v1198_v33  ;;  %v1238_v46 = vmul.f32 %v1235_v41, %v1196_v34 }
 0x40d   : > { %v1252_v50 = vadd.f32 %v1249_v45, %v1240_v43  ;;  %v1241_v51 = vadd.f32 %v1238_v46, %v1229_v47 }
 0x40e   : > { %v1247_v38 = vpop.permute.xlu1 %1246  ;;  %v1204_v52 = vpop.permute.xlu0 %1203 }
 0x40f   : > { %v1250_v55 = vmul.f32 %v1247_v38, %v1199_v48  ;;  %v1209_v57 = vmul.f32 %v1204_v52, %v1194_v23  ;;  %v7746_v58 = vpack.i.bf16 %v1252_v50, %v1251_v49  ;;  %v5897_v59 = vpack.c.bf16 %v1252_v50, %v1251_v49 }
 0x411   : > { %v7748_v61 = vadd.f32 %v1250_v55, %v1241_v51  ;;  %6295 = vrot.lane.b32.xlu0 %v7746_v58, %s6974_s8  ;;  %5899 = vmatpush3.bf16.xpose.msk.msra.mxu0 %vm7742_vm2, %v5897_v59  ;;  %v1212_v0 = vadd.f32 %v1209_v57, %v1200_v60 }
 0x412   : > { %v1216_v62 = vpop.permute.xlu1 %1215  ;;  %v1206_v63 = vpop.permute.xlu0 %1205  ;;  %5500 = vmatprep.subr.mxu0 %v6970_v16 }
 0x413   : > { %v1221_v1 = vmul.f32 %v1216_v62, %v1197_v32  ;;  %v1210_v2 = vmul.f32 %v1206_v63, %v1195_v26  ;;  %1495 = vrot.lane.b32.xlu1 %v7748_v61, %s6974_s8 }
 0x415   : > { %v7757_v4 = vadd.f32 %v1221_v1, %v1212_v0  ;;  %v1213_v8 = vadd.f32 %v1210_v2, %v1201_v3 }
 0x416   : > { %v1218_v5 = vpop.permute.xlu1 %1217  ;;  %v1208_v7 = vpop.permute.xlu0 %1207 }
 0x417   : > { %v1222_v11 = vmul.f32 %v1218_v5, %v1198_v33  ;;  %v1211_v12 = vmul.f32 %v1208_v7, %v1196_v34  ;;  %1485 = vrot.lane.b32.xlu0 %v7757_v4, %s6974_s8 }
 0x419   : > { %v7761_v14 = vadd.f32 %v1222_v11, %v1213_v8  ;;  %5501 = vmatpush3.xpose.msk.msra.mxu0 %vm1258_vm1, %v7748_v61  ;;  %v1214_v17 = vadd.f32 %v1211_v12, %v1202_v13 }
 0x41a   : > { %v1220_v15 = vpop.permute.xlu1 %1219  ;;  %5903 = vmatprep.subr.bf16.mxu0 %v6969_v10 }
 0x41b   : > { %v1223_v19 = vmul.f32 %v1220_v15, %v1199_v48  ;;  %1487 = vrot.lane.b32.xlu1 %v7761_v14, %s6974_s8 }
 0x41c   : > { %5503 = vmatmul.mubr.msk.f32.vlgmr.msra.gmra.mrb[6].mxu0 %vm1258_vm1, %v7757_v4 }
 0x41d   : > { %v7770_v20 = vadd.f32 %v1223_v19, %v1214_v17  ;;  %5505 = vmatprep.mubr.msk.f32.mxu0 %vm6971_vm0, %v6970_v16 }
 0x41f   : > { %1489 = vrot.lane.b32.xlu0 %v7770_v20, %s6974_s8 }
 0x420   : > { %5506 = vmatmul.mubr.msk.f32.gmra.mrb[8].mxu0 %vm1258_vm1, %v7761_v14 }
 0x421   : > { %5508 = vmatprep.mubr.msk.f32.mxu0 %vm6971_vm0, %v6970_v16 }
 0x424   : > { %5509 = vmatmul.mubr.msk.f32.gmra.mrb[10].mxu0 %vm1258_vm1, %v7770_v20 }
 0x425   : > { %5532 = vmatprep.mubr.msk.f32.mxu0 %vm6971_vm0, %v6970_v16 }
 0x483   : > { %v6296_v21 = vpop.permute.xlu0 %6295 }
 0x484   : > { %v6298_v22 = vunpack.i.h.bf16 %v6296_v21  ;;  %v6297_v23 = vunpack.i.l.bf16 %v6296_v21 }
 0x485   : > { %v1496_v25 = vpop.permute.xlu1 %1495 }
 0x486   : > { %v5904_v24 = vpack.c.bf16 %v6298_v22, %v6297_v23 }
 0x488   : > { %5906 = vmatpush3.bf16.xpose.msk.msra.mxu0 %vm7742_vm2, %v5904_v24 }
 0x489   : > { %5530 = vmatprep.subr.mxu0 %v6970_v16  ;;  %v1486_v26 = vpop.permute.xlu0 %1485 }
 0x48d   : > { %v1488_v27 = vpop.permute.xlu1 %1487 }
 0x490   : > { %5531 = vmatpush3.xpose.msk.msra.mxu0 %vm1258_vm1, %v1496_v25 }
 0x491   : > { %5910 = vmatprep.subr.bf16.mxu0 %v6969_v10  ;;  %v1490_v28 = vpop.permute.xlu0 %1489 }
 0x493   : > { %5533 = vmatmul.mubr.msk.f32.vlgmr.msra.gmra.mrb[12].mxu0 %vm1258_vm1, %v1486_v26 }
 0x494   : > { %5535 = vmatprep.mubr.msk.f32.mxu0 %vm6971_vm0, %v6970_v16 }
 0x497   : > { %5536 = vmatmul.mubr.msk.f32.gmra.mrb[14].mxu0 %vm1258_vm1, %v1488_v27 }
 0x498   : > { %5538 = vmatprep.mubr.msk.f32.mxu0 %vm6971_vm0, %v6970_v16 }
 0x49b   : > { %5539 = vmatmul.mubr.msk.f32.gmra.mrb[16].mxu0 %vm1258_vm1, %v1490_v28 }
 0x49c   : > { %5560 = vmatprep.mubr.msk.f32.mxu0 %vm6971_vm0, %v6970_v16 }
 0x4ef   : > { %v1343_v31 = vpop.f32.mrb[6].mxu0 }
 0x4f0   : > { %v1344_v32 = vadd.f32 %v1343_v31, %v7800_v30  ;;  %v5504_v33 = vpop.f32.mrb[7].mxu0 }
 0x4f2   : > { %v1358_v34 = vsel %vm1357_vm4, %v1344_v32, -inf }
 0x4f3   : > { %1359 = vmax.xlane.f32.xlu1 %v1358_v34  ;;  %v1348_v35 = vpop.f32.mrb[8].mxu0 }
 0x4f4   : > { %v1349_v36 = vadd.f32 %v1348_v35, %v7800_v30  ;;  %v5507_v37 = vpop.f32.mrb[9].mxu0 }
 0x4f6   : > { %v1361_v40 = vsel %vm1357_vm4, %v1349_v36, -inf }
 0x4f7   : > { %1362 = vmax.xlane.f32.xlu0 %v1361_v40  ;;  %v1353_v39 = vpop.f32.mrb[10].mxu0 }
 0x4f8   : > { %v1354_v41 = vadd.f32 %v1353_v39, %v7800_v30  ;;  %v5510_v42 = vpop.f32.mrb[11].mxu0 }
 0x4f9   : > { %v1727_v42 = vld [vmem:[%s7599_s17 + $0x18] sm:$0xff] }
 0x4fa   : > { %v1364_v43 = vsel %vm1357_vm4, %v1354_v41, -inf }
 0x4fb   : > { %1365 = vmax.xlane.f32.xlu0 %v1364_v43 }
 0x566   : > { %v1575_v45 = vpop.f32.mrb[12].mxu0 }
 0x567   : > { %v1576_v46 = vadd.f32 %v1575_v45, %v7800_v30  ;;  %v5534_v47 = vpop.f32.mrb[13].mxu0 }
 0x569   : > { %v1589_v48 = vsel %vm1357_vm4, %v1576_v46, -inf }
 0x56a   : > { %1590 = vmax.xlane.f32.xlu0 %v1589_v48  ;;  %v1580_v49 = vpop.f32.mrb[14].mxu0 }
 0x56b   : > { %v1581_v50 = vadd.f32 %v1580_v49, %v7800_v30  ;;  %v5537_v51 = vpop.f32.mrb[15].mxu0 }
 0x56d   : > { %v1592_v38 = vsel %vm1357_vm4, %v1581_v50, -inf }
 0x56e   : > { %1593 = vmax.xlane.f32.xlu1 %v1592_v38  ;;  %v1585_v52 = vpop.f32.mrb[16].mxu0  ;;  %v1483_v38 = vld [vmem:[%s7599_s17] sm:$0xff] }
 0x56f   : > { %v1586_v55 = vadd.f32 %v1585_v52, %v7800_v30  ;;  %v5540_v57 = vpop.f32.mrb[17].mxu0  ;;  %v1484_v52 = vld [vmem:[%s7599_s17 + $0x8] sm:$0xff] }
 0x571   : > { %v1595_v59 = vsel %vm1357_vm4, %v1586_v55, -inf }
 0x572   : > { %1596 = vmax.xlane.f32.xlu0 %v1595_v59 }
 0x57f   : > { %6300 = vrot.lane.b32.xlu1 %v7721_v9, %s6974_s8 }
 0x580   : > { %v1360_v60 = vpop.xlane.xlu1 %1359 }
 0x581   : > { %v1367_v62 = vsub.f32 %v1344_v32, %v1360_v60 }
 0x583   : > { %v1370_v63 = vmul.f32 1.442695, %v1367_v62 }
 0x584   : > { %v1363_v0 = vpop.xlane.xlu0 %1362 }
 0x585   : > { %6370 = vpow2.f32 %v1370_v63  ;;  %v1368_v1 = vsub.f32 %v1349_v36, %v1363_v0 }
 0x587   : > { %v1372_v2 = vmul.f32 1.442695, %v1368_v1 }
 0x588   : > { %v1366_v3 = vpop.xlane.xlu0 %1365  ;;  %1629 = vrot.lane.b32.xlu0 %v7727_v18, %s6974_s8  ;;  %s8758_s8 = scalar_lea.sflag [#allocation4], %s8970_s19 }
 0x589   : > { %6372 = vpow2.f32 %v1372_v2  ;;  %v1369_v5 = vsub.f32 %v1354_v41, %v1366_v3  ;;  %v1726_v41 = vld [vmem:[%s7599_s17 + $0x10] sm:$0xff] }
 0x58a   : > { %v5911_v43 = vpack.c.bf16 %v1727_v42, %v1726_v41 }
 0x58b   : > { %v1374_v7 = vmul.f32 1.442695, %v1369_v5 }
 0x58c   : > { %5912 = vmatpush3.bf16.msra.mxu0 %v5911_v43 }
 0x58d   : > { %6374 = vpow2.f32 %v1374_v7  ;;  %5916 = vmatprep.subr.bf16.mxu0 %v6969_v10 }
 0x58f   : > { %v7818_v8 = vpop.eup %6370 }
 0x590   : > { %5518 = vmatmul.mubr.msk.f32.vlgmr.msra.gmra.mrb[6].mxu1 %vm1357_vm4, %v7818_v8  ;;  %v1376_v51 = vsel %vm1357_vm4, %v7818_v8, 0.0 }
 0x591   : > { %5520 = vmatprep.mubr.msk.f32.mxu1 %vm6971_vm0, %v6970_v16 }
 0x593   : > { %v6373_v11 = vpop.eup %6372 }
 0x594   : > { %5521 = vmatmul.mubr.msk.f32.gmra.mrb[8].mxu1 %vm1357_vm4, %v6373_v11  ;;  %v1379_v40 = vsel %vm1357_vm4, %v6373_v11, 0.0 }
 0x595   : > { %5523 = vmatprep.mubr.msk.f32.mxu1 %vm6971_vm0, %v6970_v16 }
 0x597   : > { %v6375_v12 = vpop.eup %6374 }
 0x598   : > { %5524 = vmatmul.mubr.msk.f32.gmra.mrb[10].mxu1 %vm1357_vm4, %v6375_v12  ;;  %v1382_v39 = vsel %vm1357_vm4, %v6375_v12, 0.0 }
 0x599   : > { %5547 = vmatprep.mubr.msk.f32.mxu1 %vm6971_vm0, %v6970_v16 }
 0x5f7   : > { %v1591_v13 = vpop.xlane.xlu0 %1590 }
 0x5f8   : > { %v1598_v15 = vsub.f32 %v1576_v46, %v1591_v13 }
 0x5fa   : > { %v1601_v17 = vmul.f32 1.442695, %v1598_v15 }
 0x5fb   : > { %v1594_v19 = vpop.xlane.xlu1 %1593 }
 0x5fc   : > { %6376 = vpow2.f32 %v1601_v17  ;;  %v1599_v21 = vsub.f32 %v1581_v50, %v1594_v19 }
 0x5fe   : > { %v1603_v22 = vmul.f32 1.442695, %v1599_v21 }
 0x5ff   : > { %v6301_v23 = vpop.permute.xlu1 %6300  ;;  %v1597_v24 = vpop.xlane.xlu0 %1596 }
 0x600   : > { %6378 = vpow2.f32 %v1603_v22  ;;  %v6303_v25 = vunpack.i.h.bf16 %v6301_v23  ;;  %v6302_v26 = vunpack.i.l.bf16 %v6301_v23  ;;  %v1600_v27 = vsub.f32 %v1586_v55, %v1597_v24 }
 0x601   : > { %v5914_v55 = vpack.c.bf16 %v1484_v52, %v1483_v38 }
 0x602   : > { %v5908_v28 = vpack.c.bf16 %v6303_v25, %v6302_v26  ;;  %v1605_v29 = vmul.f32 1.442695, %v1600_v27 }
 0x603   : > { %v1630_v32 = vpop.permute.xlu0 %1629 }
 0x604   : > { %5909 = vmatpush3.bf16.msra.mxu1 %v5908_v28  ;;  %6380 = vpow2.f32 %v1605_v29 }
 0x605   : > { %5545 = vmatprep.subr.mxu1 %v6970_v16 }
 0x606   : > { %v6377_v31 = vpop.eup %6376 }
 0x607   : > { %v1607_v33 = vsel %vm1357_vm4, %v6377_v31, 0.0 }
 0x608   : > { %1608 = vadd.xlane.f32.xlu1 %v1607_v33  ;;  %5546 = vmatpush3.msra.mxu1 %v1630_v32 }
 0x609   : > { %5548 = vmatmul.mubr.msk.f32.vlgmr.msra.gmra.mrb[12].mxu1 %vm1357_vm4, %v6377_v31  ;;  %5913 = vmatprep.subr.bf16.mxu1 %v6969_v10 }
 0x60a   : > { %v6379_v34 = vpop.eup %6378  ;;  %5550 = vmatprep.mubr.msk.f32.mxu1 %vm6971_vm0, %v6970_v16  ;;  %5915 = vmatpush3.bf16.msra.mxu1 %v5914_v55 }
 0x60b   : > { %v1610_v35 = vsel %vm1357_vm4, %v6379_v34, 0.0  ;;  %5920 = vmatprep.subr.bf16.mxu1 %v6969_v10 }
 0x60c   : > { %1611 = vadd.xlane.f32.xlu0 %v1610_v35 }
 0x60d   : > { %5551 = vmatmul.mubr.msk.f32.gmra.mrb[14].mxu1 %vm1357_vm4, %v6379_v34 }
 0x60e   : > { %5553 = vmatprep.mubr.msk.f32.mxu1 %vm6971_vm0, %v6970_v16  ;;  %v6381_v36 = vpop.eup %6380 }
 0x60f   : > { %v1613_v37 = vsel %vm1357_vm4, %v6381_v36, 0.0 }
 0x611   : > { %5554 = vmatmul.mubr.msk.f32.gmra.mrb[16].mxu1 %vm1357_vm4, %v6381_v36 }
 0x612   : > { %5573 = vmatprep.mubr.msk.f32.mxu1 %vm6971_vm0, %v6970_v16 }
 0x619   : > { %1916 = vrot.lane.b32.xlu1 %v7748_v61, %s6975_s1 }
 0x61d   : > { %1906 = vrot.lane.b32.xlu1 %v7757_v4, %s6975_s1 }
 0x622   : > { %6305 = vrot.lane.b32.xlu0 %v7746_v58, %s6975_s1 }
 0x626   : > { %1910 = vrot.lane.b32.xlu0 %v7770_v20, %s6975_s1 }
 0x641   : > { %1614 = vadd.xlane.f32.xlu1 %v1613_v37 }
 0x645   : > { %1380 = vadd.xlane.f32.xlu0 %v1379_v40 }
 0x649   : > { %1383 = vadd.xlane.f32.xlu0 %v1382_v39 }
 0x652   : > { %1908 = vrot.lane.b32.xlu1 %v7761_v14, %s6975_s1 }
 0x663   : > { %v7859_v45 = vpop.f32.mrb[6].mxu1 }
 0x664   : > { %v5519_v46 = vpop.f32.mrb[7].mxu1 }
 0x667   : > { %v7861_v47 = vpop.f32.mrb[8].mxu1 }
 0x668   : > { %v5522_v48 = vpop.f32.mrb[9].mxu1 }
 0x66b   : > { %v7863_v49 = vpop.f32.mrb[10].mxu1 }
 0x66c   : > { %v5525_v50 = vpop.f32.mrb[11].mxu1 }
 0x676   : > { %1377 = vadd.xlane.f32.xlu1 %v1376_v51 }
 0x687   : > { %6310 = vrot.lane.b32.xlu1 %v7721_v9, %s6975_s1 }
 0x695   : > { %v1609_v57 = vpop.xlane.xlu1 %1608 }
 0x696   : > { %6382 = vrcp.f32 %v1609_v57 }
 0x699   : > { %v1917_v59 = vpop.permute.xlu1 %1916  ;;  %v1612_v60 = vpop.xlane.xlu0 %1611 }
 0x69a   : > { %6384 = vrcp.f32 %v1612_v60 }
 0x69d   : > { %v1907_v62 = vpop.permute.xlu1 %1906  ;;  %v6306_v63 = vpop.permute.xlu0 %6305 }
 0x69e   : > { %v6308_v1 = vunpack.i.h.bf16 %v6306_v63  ;;  %v6307_v2 = vunpack.i.l.bf16 %v6306_v63 }
 0x6a0   : > { %v6383_v3 = vpop.eup %6382  ;;  %v5917_v11 = vpack.c.bf16 %v6308_v1, %v6307_v2 }
 0x6a1   : > { %v1911_v25 = vpop.permute.xlu0 %1910 }
 0x6a4   : > { %v6385_v12 = vpop.eup %6384 }
 0x6ce   : > { %v1615_v0 = vpop.xlane.xlu1 %1614 }
 0x6cf   : > { %6386 = vrcp.f32 %v1615_v0 }
 0x6d2   : > { %v1909_v24 = vpop.permute.xlu1 %1908  ;;  %v1381_v26 = vpop.xlane.xlu0 %1380 }
 0x6d6   : > { %v1384_v28 = vpop.xlane.xlu0 %1383 }
 0x6d9   : > { %v6387_v19 = vpop.eup %6386 }
 0x6dc   : > { %v1709_v5 = vpop.f32.mrb[12].mxu1 }
 0x6dd   : > { %v1723_v7 = vmul.f32 %v6383_v3, %v1709_v5  ;;  %v5549_v8 = vpop.f32.mrb[13].mxu1 }
 0x6df   : > { %5561 = vmatmul.mubr.msk.f32.vlgmr.msra.gmra.mrb[18].mxu0 %vm1258_vm1, %v1723_v7 }
 0x6e0   : > { %5919 = vmatpush3.bf16.xpose.msk.msra.mxu0 %vm7742_vm2, %v5917_v11  ;;  %v1714_v13 = vpop.f32.mrb[14].mxu1  ;;  %5563 = vmatprep.mubr.msk.f32.mxu0 %vm6971_vm0, %v6970_v16 }
 0x6e1   : > { %v1724_v15 = vmul.f32 %v6385_v12, %v1714_v13  ;;  %v5552_v17 = vpop.f32.mrb[15].mxu1  ;;  %5586 = vmatprep.subr.mxu0 %v6970_v16 }
 0x6e3   : > { %5564 = vmatmul.mubr.msk.f32.gmra.mrb[20].mxu0 %vm1258_vm1, %v1724_v15 }
 0x6e4   : > { %v1719_v21 = vpop.f32.mrb[16].mxu1  ;;  %5566 = vmatprep.mubr.msk.f32.mxu0 %vm6971_vm0, %v6970_v16 }
 0x6e5   : > { %v1725_v22 = vmul.f32 %v6387_v19, %v1719_v21  ;;  %v5555_v23 = vpop.f32.mrb[17].mxu1 }
 0x6e7   : > { %5567 = vmatmul.mubr.msk.f32.gmra.mrb[22].mxu0 %vm1258_vm1, %v1725_v22 }
 0x6e8   : > { %5587 = vmatpush3.xpose.msk.msra.mxu0 %vm1258_vm1, %v1917_v59  ;;  %5588 = vmatprep.mubr.msk.f32.mxu0 %vm6971_vm0, %v6970_v16 }
 0x6e9   : > { %5923 = vmatprep.subr.bf16.mxu0 %v6969_v10 }
 0x6eb   : > { %5589 = vmatmul.mubr.msk.f32.vlgmr.msra.gmra.mrb[24].mxu0 %vm1258_vm1, %v1907_v62 }
 0x6ec   : > { %5591 = vmatprep.mubr.msk.f32.mxu0 %vm6971_vm0, %v6970_v16 }
 0x6ef   : > { %5592 = vmatmul.mubr.msk.f32.gmra.mrb[26].mxu0 %vm1258_vm1, %v1909_v24 }
 0x6f0   : > { %5594 = vmatprep.mubr.msk.f32.mxu0 %vm6971_vm0, %v6970_v16 }
 0x6f3   : > { %5595 = vmatmul.mubr.msk.f32.gmra.mrb[28].mxu0 %vm1258_vm1, %v1911_v25 }
 0x6f4   : > { %5616 = vmatprep.mubr.msk.f32.mxu0 %vm6971_vm0, %v6970_v16 }
 0x703   : > { %v1378_v27 = vpop.xlane.xlu1 %1377 }
 0x704   : > { %6388 = vrcp.f32 %v1378_v27 }
 0x705   : > { %6390 = vrcp.f32 %v1381_v26 }
 0x706   : > { %6392 = vrcp.f32 %v1384_v28 }
 0x707   : > { %v6311_v29 = vpop.permute.xlu1 %6310 }
 0x708   : > { %v6313_v31 = vunpack.i.h.bf16 %v6311_v29  ;;  %v6312_v32 = vunpack.i.l.bf16 %v6311_v29 }
 0x70a   : > { %v5921_v36 = vpack.c.bf16 %v6313_v31, %v6312_v32 }
 0x70e   : > { %v6389_v33 = vpop.eup %6388 }
 0x70f   : > { %v1480_v34 = vmul.f32 %v6389_v33, %v7859_v45  ;;  %v6391_v35 = vpop.eup %6390 }
 0x710   : > { %v1481_v37 = vmul.f32 %v6391_v35, %v7861_v47  ;;  %v6393_v40 = vpop.eup %6392 }
 0x711   : > { %5574 = vmatmul.mubr.msk.f32.vlgmr.msra.gmra.mrb[18].mxu1 %vm1258_vm1, %v1480_v34  ;;  %v1482_v39 = vmul.f32 %v6393_v40, %v7863_v49 }
 0x712   : > { %5922 = vmatpush3.bf16.msra.mxu1 %v5921_v36  ;;  %5576 = vmatprep.mubr.msk.f32.mxu1 %vm6971_vm0, %v6970_v16 }
 0x713   : > { %5601 = vmatprep.subr.mxu1 %v6970_v16 }
 0x715   : > { %5577 = vmatmul.mubr.msk.f32.gmra.mrb[20].mxu1 %vm1258_vm1, %v1481_v37 }
 0x716   : > { %5579 = vmatprep.mubr.msk.f32.mxu1 %vm6971_vm0, %v6970_v16 }
 0x719   : > { %5580 = vmatmul.mubr.msk.f32.gmra.mrb[22].mxu1 %vm1258_vm1, %v1482_v39 }
 0x71a   : > { %5603 = vmatprep.mubr.msk.f32.mxu1 %vm6971_vm0, %v6970_v16 }
 0x7b2   : > { %v1803_v41 = vpop.f32.mrb[18].mxu0 }
 0x7b3   : > { %v5562_v42 = vpop.f32.mrb[19].mxu0 }
 0x7b6   : > { %v1808_v43 = vpop.f32.mrb[20].mxu0 }
 0x7b7   : > { %v5565_v45 = vpop.f32.mrb[21].mxu0 }
 0x7b8   : > { %v2145_v45 = vld [vmem:[%s7599_s17 + $0x28] sm:$0xff] }
 0x7ba   : > { %v1813_v46 = vpop.f32.mrb[22].mxu0 }
 0x7bb   : > { %v5568_v47 = vpop.f32.mrb[23].mxu0 }
 0x7be   : > { %v1996_v48 = vpop.f32.mrb[24].mxu0 }
 0x7bf   : > { %v1997_v50 = vadd.f32 %v1996_v48, %v7800_v30  ;;  %v5590_v51 = vpop.f32.mrb[25].mxu0 }
 0x7c1   : > { %v2010_v38 = vsel %vm1357_vm4, %v1997_v50, -inf }
 0x7c2   : > { %2011 = vmax.xlane.f32.xlu0 %v2010_v38  ;;  %v2001_v52 = vpop.f32.mrb[26].mxu0 }
 0x7c3   : > { %v2002_v49 = vadd.f32 %v2001_v52, %v7800_v30  ;;  %v5593_v55 = vpop.f32.mrb[27].mxu0 }
 0x7c5   : > { %v2013_v57 = vsel %vm1357_vm4, %v2002_v49, -inf }
 0x7c6   : > { %2014 = vmax.xlane.f32.xlu1 %v2013_v57  ;;  %v2006_v59 = vpop.f32.mrb[28].mxu0 }
 0x7c7   : > { %v2007_v60 = vadd.f32 %v2006_v59, %v7800_v30  ;;  %v5596_v62 = vpop.f32.mrb[29].mxu0 }
 0x7c9   : > { %v2016_v63 = vsel %vm1357_vm4, %v2007_v60, -inf }
 0x7ca   : > { %2017 = vmax.xlane.f32.xlu0 %v2016_v63 }
 0x7d7   : > { %6315 = vrot.lane.b32.xlu1 %v7746_v58, %s6976_s3 }
 0x7db   : > { %2248 = vrot.lane.b32.xlu1 %v7748_v61, %s6976_s3 }
 0x7df   : > { %2238 = vrot.lane.b32.xlu1 %v7757_v4, %s6976_s3 }
 0x7e0   : > { %2047 = vrot.lane.b32.xlu0 %v7727_v18, %s6975_s1  ;;  %s6817_s1 = scalar_lea.vmem %s8753_s0, 384 }
 0x7e1   : > { %p6818_p1 = scmp.ne.s32.totalorder %s8753_s0, %s6817_s1 }
 0x7e3   : > { %2242 = vrot.lane.b32.xlu1 %v7770_v20, %s6976_s3  ;;  %p6819_p8 = pnand %p6818_p1, %p8971_p3 }
 0x7e4   : > { %v1892_v0 = vpop.f32.mrb[18].mxu1  ;;  %2240 = vrot.lane.b32.xlu0 %v7761_v14, %s6976_s3 }
 0x7e5   : > { %v7926_v1 = vadd.f32 %v1892_v0, %v1803_v41  ;;  %v5575_v2 = vpop.f32.mrb[19].mxu1  ;;  %p6820_p6 = pneg %p6819_p8 }
 0x7e8   : > { %v1897_v3 = vpop.f32.mrb[20].mxu1 }
 0x7e9   : > { %v7928_v5 = vadd.f32 %v1897_v3, %v1808_v43  ;;  %v5578_v7 = vpop.f32.mrb[21].mxu1  ;;  %v2144_v43 = vld [vmem:[%s7599_s17 + $0x20] sm:$0xff] }
 0x7ec   : > { %v1902_v8 = vpop.f32.mrb[22].mxu1 }
 0x7ed   : > { %v7930_v11 = vadd.f32 %v1902_v8, %v1813_v46  ;;  %v5581_v12 = vpop.f32.mrb[23].mxu1  ;;  %v5924_v46 = vpack.c.bf16 %v2145_v45, %v2144_v43 }
 0x7ef   : > { %5925 = vmatpush3.bf16.msra.mxu0 %v5924_v46 }
 0x7f0   : > { %5930 = vmatprep.subr.bf16.mxu0 %v6969_v10 }
 0x84f   : > { %v2012_v13 = vpop.xlane.xlu0 %2011 }
 0x850   : > { %v2019_v15 = vsub.f32 %v1997_v50, %v2012_v13 }
 0x852   : > { %v2022_v17 = vmul.f32 1.442695, %v2019_v15 }
 0x853   : > { %v2015_v19 = vpop.xlane.xlu1 %2014 }
 0x854   : > { %6394 = vpow2.f32 %v2022_v17  ;;  %v2020_v21 = vsub.f32 %v2002_v49, %v2015_v19 }
 0x856   : > { %v2024_v22 = vmul.f32 1.442695, %v2020_v21 }
 0x857   : > { %v2018_v23 = vpop.xlane.xlu0 %2017  ;;  %v6316_v26 = vpop.permute.xlu1 %6315 }
 0x858   : > { %6396 = vpow2.f32 %v2024_v22  ;;  %v2021_v24 = vsub.f32 %v2007_v60, %v2018_v23  ;;  %v6318_v29 = vunpack.i.h.bf16 %v6316_v26  ;;  %v6317_v31 = vunpack.i.l.bf16 %v6316_v26 }
 0x85a   : > { %v2026_v25 = vmul.f32 1.442695, %v2021_v24  ;;  %v5927_v34 = vpack.c.bf16 %v6318_v29, %v6317_v31 }
 0x85b   : > { %v2048_v27 = vpop.permute.xlu0 %2047  ;;  %v2249_v40 = vpop.permute.xlu1 %2248 }
 0x85c   : > { %6398 = vpow2.f32 %v2026_v25  ;;  %5602 = vmatpush3.msra.mxu1 %v2048_v27 }
 0x85d   : > { %5926 = vmatprep.subr.bf16.mxu1 %v6969_v10 }
 0x85e   : > { %v6395_v28 = vpop.eup %6394 }
 0x85f   : > { %5604 = vmatmul.mubr.msk.f32.vlgmr.msra.gmra.mrb[24].mxu1 %vm1357_vm4, %v6395_v28  ;;  %v2028_v32 = vsel %vm1357_vm4, %v6395_v28, 0.0  ;;  %v2239_v39 = vpop.permute.xlu1 %2238  ;;  %v2241_v41 = vpop.permute.xlu0 %2240 }
 0x860   : > { %2029 = vadd.xlane.f32.xlu0 %v2028_v32  ;;  %5606 = vmatprep.mubr.msk.f32.mxu1 %vm6971_vm0, %v6970_v16 }
 0x862   : > { %v6397_v33 = vpop.eup %6396 }
 0x863   : > { %5607 = vmatmul.mubr.msk.f32.gmra.mrb[26].mxu1 %vm1357_vm4, %v6397_v33  ;;  %v2031_v35 = vsel %vm1357_vm4, %v6397_v33, 0.0  ;;  %v2243_v42 = vpop.permute.xlu1 %2242 }
 0x864   : > { %5929 = vmatpush3.bf16.xpose.msk.msra.mxu1 %vm7742_vm2, %v5927_v34  ;;  %2032 = vadd.xlane.f32.xlu1 %v2031_v35 }
 0x865   : > { %5609 = vmatprep.mubr.msk.f32.mxu1 %vm6971_vm0, %v6970_v16  ;;  %5629 = vmatprep.subr.mxu1 %v6970_v16 }
 0x866   : > { %v6399_v36 = vpop.eup %6398 }
 0x867   : > { %5610 = vmatmul.mubr.msk.f32.gmra.mrb[28].mxu1 %vm1357_vm4, %v6399_v36  ;;  %v2034_v37 = vsel %vm1357_vm4, %v6399_v36, 0.0 }
 0x868   : > { %2035 = vadd.xlane.f32.xlu0 %v2034_v37  ;;  %5631 = vmatprep.mubr.msk.f32.mxu1 %vm6971_vm0, %v6970_v16 }
 0x86c   : > { %5630 = vmatpush3.xpose.msk.msra.mxu1 %vm1258_vm1, %v2249_v40 }
 0x86d   : > { %5933 = vmatprep.subr.bf16.mxu1 %v6969_v10 }
 0x86f   : > { %5632 = vmatmul.mubr.msk.f32.vlgmr.msra.gmra.mrb[30].mxu1 %vm1258_vm1, %v2239_v39 }
 0x870   : > { %5634 = vmatprep.mubr.msk.f32.mxu1 %vm6971_vm0, %v6970_v16 }
 0x873   : > { %5635 = vmatmul.mubr.msk.f32.gmra.mrb[32].mxu1 %vm1258_vm1, %v2241_v41 }
 0x874   : > { %5637 = vmatprep.mubr.msk.f32.mxu1 %vm6971_vm0, %v6970_v16 }
 0x875   : > { %2379 = vrot.lane.b32.xlu1 %v7727_v18, %s6976_s3 }
 0x877   : > { %5638 = vmatmul.mubr.msk.f32.gmra.mrb[34].mxu1 %vm1258_vm1, %v2243_v42 }
 0x878   : > { %5659 = vmatprep.mubr.msk.f32.mxu1 %vm6971_vm0, %v6970_v16 }
 0x879   : > { %6325 = vrot.lane.b32.xlu1 %v7746_v58, %s6977_s20 }
 0x8ed   : > { %v2030_v47 = vpop.xlane.xlu0 %2029 }
 0x8ee   : > { %6400 = vrcp.f32 %v2030_v47 }
 0x8f1   : > { %v2033_v48 = vpop.xlane.xlu1 %2032 }
 0x8f2   : > { %6402 = vrcp.f32 %v2033_v48 }
 0x8f5   : > { %v2036_v50 = vpop.xlane.xlu0 %2035  ;;  %v2380_v25 = vpop.permute.xlu1 %2379 }
 0x8f6   : > { %6404 = vrcp.f32 %v2036_v50 }
 0x8f8   : > { %v6401_v51 = vpop.eup %6400 }
 0x8f9   : > { %v6326_v29 = vpop.permute.xlu1 %6325 }
 0x8fa   : > { %v6328_v45 = vunpack.i.h.bf16 %v6326_v29  ;;  %v6327_v46 = vunpack.i.l.bf16 %v6326_v29 }
 0x8fc   : > { %v6403_v55 = vpop.eup %6402  ;;  %v5937_v50 = vpack.c.bf16 %v6328_v45, %v6327_v46 }
 0x900   : > { %v6405_v62 = vpop.eup %6404 }
 0x932   : > { %v2127_v38 = vpop.f32.mrb[24].mxu1 }
 0x933   : > { %v2141_v52 = vmul.f32 %v6401_v51, %v2127_v38  ;;  %v5605_v49 = vpop.f32.mrb[25].mxu1 }
 0x935   : > { %5617 = vmatmul.mubr.msk.f32.vlgmr.msra.gmra.mrb[30].mxu0 %vm1258_vm1, %v2141_v52 }
 0x936   : > { %v2132_v57 = vpop.f32.mrb[26].mxu1  ;;  %5619 = vmatprep.mubr.msk.f32.mxu0 %vm6971_vm0, %v6970_v16 }
 0x937   : > { %v2142_v59 = vmul.f32 %v6403_v55, %v2132_v57  ;;  %v5608_v60 = vpop.f32.mrb[27].mxu1  ;;  %v2476_v57 = vld [vmem:[%s7599_s17 + $0x30] sm:$0xff] }
 0x939   : > { %5620 = vmatmul.mubr.msk.f32.gmra.mrb[32].mxu0 %vm1258_vm1, %v2142_v59  ;;  %v2477_v59 = vld [vmem:[%s7599_s17 + $0x38] sm:$0xff] }
 0x93a   : > { %v2137_v63 = vpop.f32.mrb[28].mxu1  ;;  %5622 = vmatprep.mubr.msk.f32.mxu0 %vm6971_vm0, %v6970_v16  ;;  %v5934_v60 = vpack.c.bf16 %v2477_v59, %v2476_v57 }
 0x93b   : > { %v2143_v0 = vmul.f32 %v6405_v62, %v2137_v63  ;;  %v5611_v2 = vpop.f32.mrb[29].mxu1 }
 0x93c   : > { %5935 = vmatpush3.bf16.msra.mxu1 %v5934_v60 }
 0x93d   : > { %5623 = vmatmul.mubr.msk.f32.gmra.mrb[34].mxu0 %vm1258_vm1, %v2143_v0  ;;  %5940 = vmatprep.subr.bf16.mxu1 %v6969_v10 }
 0x93e   : > { %5646 = vmatprep.mubr.msk.f32.mxu0 %vm6971_vm0, %v6970_v16 }
 0x942   : > { %v2328_v3 = vpop.f32.mrb[30].mxu1 }
 0x943   : > { %v2329_v7 = vadd.f32 %v2328_v3, %v7800_v30  ;;  %v5633_v8 = vpop.f32.mrb[31].mxu1 }
 0x945   : > { %v2342_v12 = vsel %vm1357_vm4, %v2329_v7, -inf }
 0x946   : > { %2343 = vmax.xlane.f32.xlu0 %v2342_v12  ;;  %v2333_v13 = vpop.f32.mrb[32].mxu1 }
 0x947   : > { %v2334_v15 = vadd.f32 %v2333_v13, %v7800_v30  ;;  %v5636_v17 = vpop.f32.mrb[33].mxu1 }
 0x949   : > { %v2345_v19 = vsel %vm1357_vm4, %v2334_v15, -inf }
 0x94a   : > { %2346 = vmax.xlane.f32.xlu0 %v2345_v19  ;;  %v2338_v21 = vpop.f32.mrb[34].mxu1 }
 0x94b   : > { %v2339_v22 = vadd.f32 %v2338_v21, %v7800_v30  ;;  %v5639_v23 = vpop.f32.mrb[35].mxu1 }
 0x94d   : > { %v2348_v24 = vsel %vm1357_vm4, %v2339_v22, -inf }
 0x94e   : > { %2349 = vmax.xlane.f32.xlu1 %v2348_v24 }
 0x95f   : > { %2580 = vrot.lane.b32.xlu1 %v7748_v61, %s6977_s20 }
 0x960   : > { %6320 = vrot.lane.b32.xlu0 %v7721_v9, %s6976_s3  ;;  %s6981_s3 = smov [#allocation16]  }
 0x963   : > { %2572 = vrot.lane.b32.xlu1 %v7761_v14, %s6977_s20 }
 0x964   : > { %2570 = vrot.lane.b32.xlu0 %v7757_v4, %s6977_s20 }
 0x967   : > { %6330 = vrot.lane.b32.xlu1 %v7721_v9, %s6977_s20 }
 0x968   : > { %2574 = vrot.lane.b32.xlu0 %v7770_v20, %s6977_s20 }
 0x9d3   : > { %v2344_v26 = vpop.xlane.xlu0 %2343 }
 0x9d4   : > { %v2351_v27 = vsub.f32 %v2329_v7, %v2344_v26 }
 0x9d6   : > { %v2354_v28 = vmul.f32 1.442695, %v2351_v27 }
 0x9d7   : > { %v2347_v31 = vpop.xlane.xlu0 %2346 }
 0x9d8   : > { %6406 = vpow2.f32 %v2354_v28  ;;  %v2352_v32 = vsub.f32 %v2334_v15, %v2347_v31 }
 0x9da   : > { %v2356_v33 = vmul.f32 1.442695, %v2352_v32 }
 0x9db   : > { %v2350_v34 = vpop.xlane.xlu1 %2349  ;;  %v6321_v35 = vpop.permute.xlu0 %6320 }
 0x9dc   : > { %6408 = vpow2.f32 %v2356_v33  ;;  %v2353_v36 = vsub.f32 %v2339_v22, %v2350_v34  ;;  %v6323_v37 = vunpack.i.h.bf16 %v6321_v35  ;;  %v6322_v40 = vunpack.i.l.bf16 %v6321_v35 }
 0x9de   : > { %v2358_v39 = vmul.f32 1.442695, %v2353_v36  ;;  %v5931_v41 = vpack.c.bf16 %v6323_v37, %v6322_v40 }
 0x9df   : > { %v2581_v52 = vpop.permute.xlu1 %2580  ;;  %v2571_v49 = vpop.permute.xlu0 %2570 }
 0x9e0   : > { %6410 = vpow2.f32 %v2358_v39  ;;  %5932 = vmatpush3.bf16.msra.mxu0 %v5931_v41 }
 0x9e1   : > { %5644 = vmatprep.subr.mxu0 %v6970_v16 }
 0x9e2   : > { %v6407_v42 = vpop.eup %6406 }
 0x9e3   : > { %v2360_v43 = vsel %vm1357_vm4, %v6407_v42, 0.0  ;;  %v2573_v55 = vpop.permute.xlu1 %2572  ;;  %v2575_v62 = vpop.permute.xlu0 %2574 }
 0x9e4   : > { %2361 = vadd.xlane.f32.xlu1 %v2360_v43  ;;  %5645 = vmatpush3.msra.mxu0 %v2380_v25 }
 0x9e5   : > { %5647 = vmatmul.mubr.msk.f32.vlgmr.msra.gmra.mrb[36].mxu0 %vm1357_vm4, %v6407_v42  ;;  %5936 = vmatprep.subr.bf16.mxu0 %v6969_v10 }
 0x9e6   : > { %v6409_v47 = vpop.eup %6408  ;;  %5649 = vmatprep.mubr.msk.f32.mxu0 %vm6971_vm0, %v6970_v16 }
 0x9e7   : > { %v2363_v48 = vsel %vm1357_vm4, %v6409_v47, 0.0  ;;  %v6331_v17 = vpop.permute.xlu1 %6330 }
 0x9e8   : > { %2364 = vadd.xlane.f32.xlu0 %v2363_v48  ;;  %v6333_v23 = vunpack.i.h.bf16 %v6331_v17 }
 0x9e9   : > { %5650 = vmatmul.mubr.msk.f32.gmra.mrb[38].mxu0 %vm1357_vm4, %v6409_v47 }
 0x9ea   : > { %v6411_v51 = vpop.eup %6410  ;;  %5652 = vmatprep.mubr.msk.f32.mxu0 %vm6971_vm0, %v6970_v16 }
 0x9eb   : > { %5939 = vmatpush3.bf16.xpose.msk.msra.mxu0 %vm7742_vm2, %v5937_v50  ;;  %v2366_v38 = vsel %vm1357_vm4, %v6411_v51, 0.0 }
 0x9ec   : > { %2367 = vadd.xlane.f32.xlu0 %v2366_v38  ;;  %5672 = vmatprep.subr.mxu0 %v6970_v16 }
 0x9ed   : > { %5653 = vmatmul.mubr.msk.f32.gmra.mrb[40].mxu0 %vm1357_vm4, %v6411_v51 }
 0x9ee   : > { %5674 = vmatprep.mubr.msk.f32.mxu0 %vm6971_vm0, %v6970_v16 }
 0x9f3   : > { %5673 = vmatpush3.xpose.msk.msra.mxu0 %vm1258_vm1, %v2581_v52 }
 0x9f4   : > { %5943 = vmatprep.subr.bf16.mxu0 %v6969_v10 }
 0x9f6   : > { %5675 = vmatmul.mubr.msk.f32.vlgmr.msra.gmra.mrb[42].mxu0 %vm1258_vm1, %v2571_v49 }
 0x9f7   : > { %5677 = vmatprep.mubr.msk.f32.mxu0 %vm6971_vm0, %v6970_v16 }
 0x9fa   : > { %5678 = vmatmul.mubr.msk.f32.gmra.mrb[44].mxu0 %vm1258_vm1, %v2573_v55 }
 0x9fb   : > { %5680 = vmatprep.mubr.msk.f32.mxu0 %vm6971_vm0, %v6970_v16 }
 0x9fe   : > { %5681 = vmatmul.mubr.msk.f32.gmra.mrb[46].mxu0 %vm1258_vm1, %v2575_v62 }
 0x9ff   : > { %5702 = vmatprep.mubr.msk.f32.mxu0 %vm6971_vm0, %v6970_v16 }
 0xa08   : > { %v2221_v63 = vpop.f32.mrb[30].mxu0 }
 0xa09   : > { %v8025_v0 = vadd.f32 %v2221_v63, %v7926_v1  ;;  %v5618_v2 = vpop.f32.mrb[31].mxu0  ;;  %v6332_v1 = vunpack.i.l.bf16 %v6331_v17 }
 0xa0b   : > { %v5941_v27 = vpack.c.bf16 %v6333_v23, %v6332_v1 }
 0xa0c   : > { %v2226_v3 = vpop.f32.mrb[32].mxu0 }
 0xa0d   : > { %v8028_v7 = vadd.f32 %v2226_v3, %v7928_v5  ;;  %v5621_v8 = vpop.f32.mrb[33].mxu0 }
 0xa10   : > { %v2231_v12 = vpop.f32.mrb[34].mxu0 }
 0xa11   : > { %v8031_v13 = vadd.f32 %v2231_v12, %v7930_v11  ;;  %v5624_v15 = vpop.f32.mrb[35].mxu0 }
 0xa71   : > { %v2362_v19 = vpop.xlane.xlu1 %2361 }
 0xa72   : > { %6412 = vrcp.f32 %v2362_v19 }
 0xa75   : > { %v2365_v21 = vpop.xlane.xlu0 %2364 }
 0xa76   : > { %6414 = vrcp.f32 %v2365_v21 }
 0xa79   : > { %v2368_v22 = vpop.xlane.xlu0 %2367 }
 0xa7a   : > { %6416 = vrcp.f32 %v2368_v22 }
 0xa7c   : > { %v6413_v24 = vpop.eup %6412 }
 0xa80   : > { %v6415_v28 = vpop.eup %6414 }
 0xa84   : > { %v6417_v32 = vpop.eup %6416 }
 0xab8   : > { %v2459_v25 = vpop.f32.mrb[36].mxu0 }
 0xab9   : > { %v2473_v26 = vmul.f32 %v6413_v24, %v2459_v25  ;;  %v5648_v5 = vpop.f32.mrb[37].mxu0 }
 0xabb   : > { %5660 = vmatmul.mubr.msk.f32.vlgmr.msra.gmra.mrb[36].mxu1 %vm1258_vm1, %v2473_v26 }
 0xabc   : > { %5942 = vmatpush3.bf16.msra.mxu1 %v5941_v27  ;;  %v2464_v11 = vpop.f32.mrb[38].mxu0  ;;  %5662 = vmatprep.mubr.msk.f32.mxu1 %vm6971_vm0, %v6970_v16 }
 0xabd   : > { %v2474_v29 = vmul.f32 %v6415_v28, %v2464_v11  ;;  %v5651_v31 = vpop.f32.mrb[39].mxu0  ;;  %5687 = vmatprep.subr.mxu1 %v6970_v16 }
 0xabf   : > { %5663 = vmatmul.mubr.msk.f32.gmra.mrb[38].mxu1 %vm1258_vm1, %v2474_v29 }
 0xac0   : > { %v2469_v33 = vpop.f32.mrb[40].mxu0  ;;  %5665 = vmatprep.mubr.msk.f32.mxu1 %vm6971_vm0, %v6970_v16 }
 0xac1   : > { %v2475_v34 = vmul.f32 %v6417_v32, %v2469_v33  ;;  %v5654_v35 = vpop.f32.mrb[41].mxu0 }
 0xac2   : > { %v2808_v35 = vld [vmem:[%s7599_s17 + $0x40] sm:$0xff] }
 0xac3   : > { %5666 = vmatmul.mubr.msk.f32.gmra.mrb[40].mxu1 %vm1258_vm1, %v2475_v34 }
 0xac4   : > { %5689 = vmatprep.mubr.msk.f32.mxu1 %vm6971_vm0, %v6970_v16 }
 0xac9   : > { %v2660_v36 = vpop.f32.mrb[42].mxu0 }
 0xaca   : > { %v2661_v37 = vadd.f32 %v2660_v36, %v7800_v30  ;;  %v5676_v40 = vpop.f32.mrb[43].mxu0  ;;  %v2809_v36 = vld [vmem:[%s7599_s17 + $0x48] sm:$0xff] }
 0xacc   : > { %v2674_v39 = vsel %vm1357_vm4, %v2661_v37, -inf }
 0xacd   : > { %2675 = vmax.xlane.f32.xlu0 %v2674_v39  ;;  %v2665_v41 = vpop.f32.mrb[44].mxu0 }
 0xace   : > { %v2666_v42 = vadd.f32 %v2665_v41, %v7800_v30  ;;  %v5679_v43 = vpop.f32.mrb[45].mxu0 }
 0xad0   : > { %v2677_v45 = vsel %vm1357_vm4, %v2666_v42, -inf }
 0xad1   : > { %2678 = vmax.xlane.f32.xlu1 %v2677_v45  ;;  %v2670_v46 = vpop.f32.mrb[46].mxu0 }
 0xad2   : > { %v2671_v47 = vadd.f32 %v2670_v46, %v7800_v30  ;;  %v5682_v48 = vpop.f32.mrb[47].mxu0 }
 0xad4   : > { %v2680_v50 = vsel %vm1357_vm4, %v2671_v47, -inf }
 0xad5   : > { %2681 = vmax.xlane.f32.xlu0 %v2680_v50 }
 0xae2   : > { %6335 = vrot.lane.b32.xlu1 %v7746_v58, %s6978_s10 }
 0xae6   : > { %2912 = vrot.lane.b32.xlu1 %v7748_v61, %s6978_s10 }
 0xaea   : > { %2902 = vrot.lane.b32.xlu1 %v7757_v4, %s6978_s10 }
 0xaeb   : > { %2711 = vrot.lane.b32.xlu0 %v7727_v18, %s6977_s20  ;;  %s6821_s20 = sshll.u32 %s6981_s3, 4  ;;  %s6822_s20 = int_to_ptr.vmem [resolvable:$false] %s6821_s20 }
 0xaec   : > { %p6824_p7 = scmp.lt.s32.totalorder %s8753_s0, %s6822_s20 }
 0xaee   : > { %2906 = vrot.lane.b32.xlu1 %v7770_v20, %s6978_s10 }
 0xaef   : > { %2904 = vrot.lane.b32.xlu0 %v7761_v14, %s6978_s10 }
 0xb5a   : > { %v2676_v51 = vpop.xlane.xlu0 %2675 }
 0xb5b   : > { %v2683_v38 = vsub.f32 %v2661_v37, %v2676_v51  ;;  %v5944_v37 = vpack.c.bf16 %v2809_v36, %v2808_v35 }
 0xb5d   : > { %v2686_v52 = vmul.f32 1.442695, %v2683_v38  ;;  %5945 = vmatpush3.bf16.msra.mxu0 %v5944_v37 }
 0xb5e   : > { %v2679_v49 = vpop.xlane.xlu1 %2678  ;;  %5950 = vmatprep.subr.bf16.mxu0 %v6969_v10 }
 0xb5f   : > { %6418 = vpow2.f32 %v2686_v52  ;;  %v2684_v55 = vsub.f32 %v2666_v42, %v2679_v49 }
 0xb61   : > { %v2688_v57 = vmul.f32 1.442695, %v2684_v55 }
 0xb62   : > { %v2682_v59 = vpop.xlane.xlu0 %2681  ;;  %v6336_v63 = vpop.permute.xlu1 %6335 }
 0xb63   : > { %6420 = vpow2.f32 %v2688_v57  ;;  %v2685_v60 = vsub.f32 %v2671_v47, %v2682_v59  ;;  %v6338_v8 = vunpack.i.h.bf16 %v6336_v63  ;;  %v6337_v12 = vunpack.i.l.bf16 %v6336_v63 }
 0xb65   : > { %v2690_v62 = vmul.f32 1.442695, %v2685_v60  ;;  %v5947_v19 = vpack.c.bf16 %v6338_v8, %v6337_v12 }
 0xb66   : > { %v2712_v2 = vpop.permute.xlu0 %2711  ;;  %v2913_v1 = vpop.permute.xlu1 %2912 }
 0xb67   : > { %6422 = vpow2.f32 %v2690_v62  ;;  %5688 = vmatpush3.msra.mxu1 %v2712_v2 }
 0xb68   : > { %5946 = vmatprep.subr.bf16.mxu1 %v6969_v10 }
 0xb69   : > { %v6419_v3 = vpop.eup %6418 }
 0xb6a   : > { %5690 = vmatmul.mubr.msk.f32.vlgmr.msra.gmra.mrb[42].mxu1 %vm1357_vm4, %v6419_v3  ;;  %v2692_v15 = vsel %vm1357_vm4, %v6419_v3, 0.0  ;;  %v2903_v24 = vpop.permute.xlu1 %2902  ;;  %v2905_v25 = vpop.permute.xlu0 %2904 }
 0xb6b   : > { %2693 = vadd.xlane.f32.xlu0 %v2692_v15  ;;  %5692 = vmatprep.mubr.msk.f32.mxu1 %vm6971_vm0, %v6970_v16 }
 0xb6d   : > { %v6421_v17 = vpop.eup %6420 }
 0xb6e   : > { %5693 = vmatmul.mubr.msk.f32.gmra.mrb[44].mxu1 %vm1357_vm4, %v6421_v17  ;;  %v2695_v21 = vsel %vm1357_vm4, %v6421_v17, 0.0  ;;  %v2907_v26 = vpop.permute.xlu1 %2906 }
 0xb6f   : > { %5949 = vmatpush3.bf16.xpose.msk.msra.mxu1 %vm7742_vm2, %v5947_v19  ;;  %2696 = vadd.xlane.f32.xlu1 %v2695_v21 }
 0xb70   : > { %5695 = vmatprep.mubr.msk.f32.mxu1 %vm6971_vm0, %v6970_v16  ;;  %5715 = vmatprep.subr.mxu1 %v6970_v16 }
 0xb71   : > { %v6423_v22 = vpop.eup %6422 }
 0xb72   : > { %5696 = vmatmul.mubr.msk.f32.gmra.mrb[46].mxu1 %vm1357_vm4, %v6423_v22  ;;  %v2698_v23 = vsel %vm1357_vm4, %v6423_v22, 0.0 }
 0xb73   : > { %2699 = vadd.xlane.f32.xlu0 %v2698_v23  ;;  %5717 = vmatprep.mubr.msk.f32.mxu1 %vm6971_vm0, %v6970_v16 }
 0xb77   : > { %5716 = vmatpush3.xpose.msk.msra.mxu1 %vm1258_vm1, %v2913_v1 }
 0xb78   : > { %5953 = vmatprep.subr.bf16.mxu1 %v6969_v10 }
 0xb7a   : > { %5718 = vmatmul.mubr.msk.f32.vlgmr.msra.gmra.mrb[48].mxu1 %vm1258_vm1, %v2903_v24 }
 0xb7b   : > { %5720 = vmatprep.mubr.msk.f32.mxu1 %vm6971_vm0, %v6970_v16 }
 0xb7e   : > { %5721 = vmatmul.mubr.msk.f32.gmra.mrb[50].mxu1 %vm1258_vm1, %v2905_v25 }
 0xb7f   : > { %5723 = vmatprep.mubr.msk.f32.mxu1 %vm6971_vm0, %v6970_v16 }
 0xb80   : > { %3043 = vrot.lane.b32.xlu1 %v7727_v18, %s6978_s10 }
 0xb82   : > { %5724 = vmatmul.mubr.msk.f32.gmra.mrb[52].mxu1 %vm1258_vm1, %v2907_v26 }
 0xb83   : > { %5745 = vmatprep.mubr.msk.f32.mxu1 %vm6971_vm0, %v6970_v16 }
 0xb84   : > { %6345 = vrot.lane.b32.xlu1 %v7746_v58, %s6979_s4 }
 0xb8e   : > { %v2553_v5 = vpop.f32.mrb[36].mxu1 }
 0xb8f   : > { %v8093_v27 = vadd.f32 %v2553_v5, %v8025_v0  ;;  %v5661_v28 = vpop.f32.mrb[37].mxu1 }
 0xb92   : > { %v2558_v11 = vpop.f32.mrb[38].mxu1 }
 0xb93   : > { %v8096_v29 = vadd.f32 %v2558_v11, %v8028_v7  ;;  %v5664_v31 = vpop.f32.mrb[39].mxu1 }
 0xb96   : > { %v2563_v32 = vpop.f32.mrb[40].mxu1 }
 0xb97   : > { %v8099_v33 = vadd.f32 %v2563_v32, %v8031_v13  ;;  %v5667_v34 = vpop.f32.mrb[41].mxu1 }
 0xbf8   : > { %v2694_v40 = vpop.xlane.xlu0 %2693 }
 0xbf9   : > { %6424 = vrcp.f32 %v2694_v40 }
 0xbfc   : > { %v2697_v0 = vpop.xlane.xlu1 %2696 }
 0xbfd   : > { %6426 = vrcp.f32 %v2697_v0 }
 0xc00   : > { %v2700_v39 = vpop.xlane.xlu0 %2699  ;;  %v3044_v15 = vpop.permute.xlu1 %3043 }
 0xc01   : > { %6428 = vrcp.f32 %v2700_v39 }
 0xc03   : > { %v6425_v7 = vpop.eup %6424 }
 0xc04   : > { %v6346_v22 = vpop.permute.xlu1 %6345 }
 0xc05   : > { %v6348_v36 = vunpack.i.h.bf16 %v6346_v22  ;;  %v6347_v37 = vunpack.i.l.bf16 %v6346_v22 }
 0xc07   : > { %v6427_v13 = vpop.eup %6426  ;;  %v5957_v39 = vpack.c.bf16 %v6348_v36, %v6347_v37 }
 0xc0b   : > { %v6429_v48 = vpop.eup %6428 }
 0xc3d   : > { %v2791_v41 = vpop.f32.mrb[42].mxu1 }
 0xc3e   : > { %v2805_v42 = vmul.f32 %v6425_v7, %v2791_v41  ;;  %v5691_v43 = vpop.f32.mrb[43].mxu1 }
 0xc40   : > { %5703 = vmatmul.mubr.msk.f32.vlgmr.msra.gmra.mrb[48].mxu0 %vm1258_vm1, %v2805_v42 }
 0xc41   : > { %v2796_v45 = vpop.f32.mrb[44].mxu1  ;;  %5705 = vmatprep.mubr.msk.f32.mxu0 %vm6971_vm0, %v6970_v16 }
 0xc42   : > { %v2806_v46 = vmul.f32 %v6427_v13, %v2796_v45  ;;  %v5694_v47 = vpop.f32.mrb[45].mxu1  ;;  %v3140_v45 = vld [vmem:[%s7599_s17 + $0x50] sm:$0xff] }
 0xc44   : > { %5706 = vmatmul.mubr.msk.f32.gmra.mrb[50].mxu0 %vm1258_vm1, %v2806_v46  ;;  %v3141_v46 = vld [vmem:[%s7599_s17 + $0x58] sm:$0xff] }
 0xc45   : > { %v2801_v50 = vpop.f32.mrb[46].mxu1  ;;  %5708 = vmatprep.mubr.msk.f32.mxu0 %vm6971_vm0, %v6970_v16  ;;  %v5954_v47 = vpack.c.bf16 %v3141_v46, %v3140_v45 }
 0xc46   : > { %v2807_v51 = vmul.f32 %v6429_v48, %v2801_v50  ;;  %v5697_v38 = vpop.f32.mrb[47].mxu1 }
 0xc47   : > { %5955 = vmatpush3.bf16.msra.mxu1 %v5954_v47 }
 0xc48   : > { %5709 = vmatmul.mubr.msk.f32.gmra.mrb[52].mxu0 %vm1258_vm1, %v2807_v51  ;;  %5960 = vmatprep.subr.bf16.mxu1 %v6969_v10 }
 0xc49   : > { %5732 = vmatprep.mubr.msk.f32.mxu0 %vm6971_vm0, %v6970_v16 }
 0xc4d   : > { %v2992_v52 = vpop.f32.mrb[48].mxu1 }
 0xc4e   : > { %v2993_v49 = vadd.f32 %v2992_v52, %v7800_v30  ;;  %v5719_v55 = vpop.f32.mrb[49].mxu1 }
 0xc50   : > { %v3006_v57 = vsel %vm1357_vm4, %v2993_v49, -inf }
 0xc51   : > { %3007 = vmax.xlane.f32.xlu0 %v3006_v57  ;;  %v2997_v59 = vpop.f32.mrb[50].mxu1 }
 0xc52   : > { %v2998_v60 = vadd.f32 %v2997_v59, %v7800_v30  ;;  %v5722_v62 = vpop.f32.mrb[51].mxu1 }
 0xc54   : > { %v3009_v63 = vsel %vm1357_vm4, %v2998_v60, -inf }
 0xc55   : > { %3010 = vmax.xlane.f32.xlu0 %v3009_v63  ;;  %v3002_v2 = vpop.f32.mrb[52].mxu1 }
 0xc56   : > { %v3003_v3 = vadd.f32 %v3002_v2, %v7800_v30  ;;  %v5725_v8 = vpop.f32.mrb[53].mxu1 }
 0xc58   : > { %v3012_v12 = vsel %vm1357_vm4, %v3003_v3, -inf }
 0xc59   : > { %3013 = vmax.xlane.f32.xlu1 %v3012_v12 }
 0xc6a   : > { %3244 = vrot.lane.b32.xlu1 %v7748_v61, %s6979_s4 }
 0xc6b   : > { %6340 = vrot.lane.b32.xlu0 %v7721_v9, %s6978_s10  ;;  %s6823_s10 = scalar_lea.vmem %s6822_s20, 768 }
 0xc6c   : > { %p6825_p2 = scmp.lt.s32.totalorder %s6823_s10, %s6817_s1 }
 0xc6e   : > { %3236 = vrot.lane.b32.xlu1 %v7761_v14, %s6979_s4  ;;  %p6826_p4 = por %p6825_p2, %p6824_p7 }
 0xc6f   : > { %3234 = vrot.lane.b32.xlu0 %v7757_v4, %s6979_s4 }
 0xc70   : > { %p6827_p12 = pnand %p6826_p4, %p6820_p6 }
 0xc72   : > { %6350 = vrot.lane.b32.xlu1 %v7721_v9, %s6979_s4 }
 0xc73   : > { %3238 = vrot.lane.b32.xlu0 %v7770_v20, %s6979_s4 }
 0xcde   : > { %v3008_v17 = vpop.xlane.xlu0 %3007 }
 0xcdf   : > { %v3015_v19 = vsub.f32 %v2993_v49, %v3008_v17 }
 0xce1   : > { %v3018_v21 = vmul.f32 1.442695, %v3015_v19 }
 0xce2   : > { %v3011_v23 = vpop.xlane.xlu0 %3010 }
 0xce3   : > { %6430 = vpow2.f32 %v3018_v21  ;;  %v3016_v1 = vsub.f32 %v2998_v60, %v3011_v23 }
 0xce5   : > { %v3020_v24 = vmul.f32 1.442695, %v3016_v1 }
 0xce6   : > { %v3014_v25 = vpop.xlane.xlu1 %3013  ;;  %v6341_v26 = vpop.permute.xlu0 %6340 }
 0xce7   : > { %6432 = vpow2.f32 %v3020_v24  ;;  %v3017_v5 = vsub.f32 %v3003_v3, %v3014_v25  ;;  %v6343_v28 = vunpack.i.h.bf16 %v6341_v26  ;;  %v6342_v11 = vunpack.i.l.bf16 %v6341_v26 }
 0xce9   : > { %v3022_v31 = vmul.f32 1.442695, %v3017_v5  ;;  %v5951_v32 = vpack.c.bf16 %v6343_v28, %v6342_v11 }
 0xcea   : > { %v3245_v42 = vpop.permute.xlu1 %3244  ;;  %v3235_v43 = vpop.permute.xlu0 %3234 }
 0xceb   : > { %6434 = vpow2.f32 %v3022_v31  ;;  %5952 = vmatpush3.bf16.msra.mxu0 %v5951_v32 }
 0xcec   : > { %5730 = vmatprep.subr.mxu0 %v6970_v16 }
 0xced   : > { %v6431_v34 = vpop.eup %6430 }
 0xcee   : > { %v3024_v35 = vsel %vm1357_vm4, %v6431_v34, 0.0  ;;  %v3237_v13 = vpop.permute.xlu1 %3236  ;;  %v3239_v48 = vpop.permute.xlu0 %3238 }
 0xcef   : > { %3025 = vadd.xlane.f32.xlu1 %v3024_v35  ;;  %5731 = vmatpush3.msra.mxu0 %v3044_v15 }
 0xcf0   : > { %5733 = vmatmul.mubr.msk.f32.vlgmr.msra.gmra.mrb[54].mxu0 %vm1357_vm4, %v6431_v34  ;;  %5956 = vmatprep.subr.bf16.mxu0 %v6969_v10 }
 0xcf1   : > { %v6433_v40 = vpop.eup %6432  ;;  %5735 = vmatprep.mubr.msk.f32.mxu0 %vm6971_vm0, %v6970_v16 }
 0xcf2   : > { %v3027_v0 = vsel %vm1357_vm4, %v6433_v40, 0.0  ;;  %v6351_v62 = vpop.permute.xlu1 %6350 }
 0xcf3   : > { %3028 = vadd.xlane.f32.xlu0 %v3027_v0  ;;  %v6353_v8 = vunpack.i.h.bf16 %v6351_v62 }
 0xcf4   : > { %5736 = vmatmul.mubr.msk.f32.gmra.mrb[56].mxu0 %vm1357_vm4, %v6433_v40 }
 0xcf5   : > { %v6435_v7 = vpop.eup %6434  ;;  %5738 = vmatprep.mubr.msk.f32.mxu0 %vm6971_vm0, %v6970_v16 }
 0xcf6   : > { %5959 = vmatpush3.bf16.xpose.msk.msra.mxu0 %vm7742_vm2, %v5957_v39  ;;  %v3030_v41 = vsel %vm1357_vm4, %v6435_v7, 0.0 }
 0xcf7   : > { %3031 = vadd.xlane.f32.xlu0 %v3030_v41  ;;  %5758 = vmatprep.subr.mxu0 %v6970_v16 }
 0xcf8   : > { %5739 = vmatmul.mubr.msk.f32.gmra.mrb[58].mxu0 %vm1357_vm4, %v6435_v7 }
 0xcf9   : > { %5760 = vmatprep.mubr.msk.f32.mxu0 %vm6971_vm0, %v6970_v16 }
 0xcfe   : > { %5759 = vmatpush3.xpose.msk.msra.mxu0 %vm1258_vm1, %v3245_v42 }
 0xcff   : > { %5963 = vmatprep.subr.bf16.mxu0 %v6969_v10 }
 0xd01   : > { %5761 = vmatmul.mubr.msk.f32.vlgmr.msra.gmra.mrb[60].mxu0 %vm1258_vm1, %v3235_v43 }
 0xd02   : > { %5763 = vmatprep.mubr.msk.f32.mxu0 %vm6971_vm0, %v6970_v16 }
 0xd05   : > { %5764 = vmatmul.mubr.msk.f32.gmra.mrb[62].mxu0 %vm1258_vm1, %v3237_v13 }
 0xd06   : > { %5766 = vmatprep.mubr.msk.f32.mxu0 %vm6971_vm0, %v6970_v16 }
 0xd09   : > { %5767 = vmatmul.mubr.msk.f32.gmra.mrb[64].mxu0 %vm1258_vm1, %v3239_v48 }
 0xd0a   : > { %5788 = vmatprep.mubr.msk.f32.mxu0 %vm6971_vm0, %v6970_v16 }
 0xd13   : > { %v2885_v50 = vpop.f32.mrb[48].mxu0 }
 0xd14   : > { %v8163_v51 = vadd.f32 %v2885_v50, %v8093_v27  ;;  %v5704_v38 = vpop.f32.mrb[49].mxu0  ;;  %v6352_v27 = vunpack.i.l.bf16 %v6351_v62 }
 0xd16   : > { %v5961_v19 = vpack.c.bf16 %v6353_v8, %v6352_v27 }
 0xd17   : > { %v2890_v52 = vpop.f32.mrb[50].mxu0 }
 0xd18   : > { %v8166_v49 = vadd.f32 %v2890_v52, %v8096_v29  ;;  %v5707_v55 = vpop.f32.mrb[51].mxu0 }
 0xd1b   : > { %v2895_v57 = vpop.f32.mrb[52].mxu0 }
 0xd1c   : > { %v8169_v59 = vadd.f32 %v2895_v57, %v8099_v33  ;;  %v5710_v60 = vpop.f32.mrb[53].mxu0 }
 0xd7c   : > { %v3026_v63 = vpop.xlane.xlu1 %3025 }
 0xd7d   : > { %6436 = vrcp.f32 %v3026_v63 }
 0xd80   : > { %v3029_v2 = vpop.xlane.xlu0 %3028 }
 0xd81   : > { %6438 = vrcp.f32 %v3029_v2 }
 0xd84   : > { %v3032_v3 = vpop.xlane.xlu0 %3031 }
 0xd85   : > { %6440 = vrcp.f32 %v3032_v3 }
 0xd87   : > { %v6437_v12 = vpop.eup %6436 }
 0xd8b   : > { %v6439_v21 = vpop.eup %6438 }
 0xd8f   : > { %v6441_v1 = vpop.eup %6440 }
 0xdc3   : > { %v3123_v15 = vpop.f32.mrb[54].mxu0 }
 0xdc4   : > { %v3137_v17 = vmul.f32 %v6437_v12, %v3123_v15  ;;  %v5734_v29 = vpop.f32.mrb[55].mxu0 }
 0xdc6   : > { %5746 = vmatmul.mubr.msk.f32.vlgmr.msra.gmra.mrb[54].mxu1 %vm1258_vm1, %v3137_v17 }
 0xdc7   : > { %5962 = vmatpush3.bf16.msra.mxu1 %v5961_v19  ;;  %v3128_v33 = vpop.f32.mrb[56].mxu0  ;;  %5748 = vmatprep.mubr.msk.f32.mxu1 %vm6971_vm0, %v6970_v16 }
 0xdc8   : > { %v3138_v22 = vmul.f32 %v6439_v21, %v3128_v33  ;;  %v5737_v23 = vpop.f32.mrb[57].mxu0  ;;  %5773 = vmatprep.subr.mxu1 %v6970_v16  ;;  %v3472_v33 = vld [vmem:[%s7599_s17 + $0x60] sm:$0xff] }
 0xdca   : > { %5749 = vmatmul.mubr.msk.f32.gmra.mrb[56].mxu1 %vm1258_vm1, %v3138_v22  ;;  %v3473_v22 = vld [vmem:[%s7599_s17 + $0x68] sm:$0xff] }
 0xdcb   : > { %v3133_v24 = vpop.f32.mrb[58].mxu0  ;;  %5751 = vmatprep.mubr.msk.f32.mxu1 %vm6971_vm0, %v6970_v16  ;;  %v5964_v23 = vpack.c.bf16 %v3473_v22, %v3472_v33 }
 0xdcc   : > { %v3139_v25 = vmul.f32 %v6441_v1, %v3133_v24  ;;  %v5740_v26 = vpop.f32.mrb[59].mxu0 }
 0xdcd   : > { %5965 = vmatpush3.bf16.msra.mxu0 %v5964_v23 }
 0xdce   : > { %5752 = vmatmul.mubr.msk.f32.gmra.mrb[58].mxu1 %vm1258_vm1, %v3139_v25  ;;  %5970 = vmatprep.subr.bf16.mxu0 %v6969_v10 }
 0xdcf   : > { %5775 = vmatprep.mubr.msk.f32.mxu1 %vm6971_vm0, %v6970_v16 }
 0xdd4   : > { %v3324_v5 = vpop.f32.mrb[60].mxu0 }
 0xdd5   : > { %v3325_v28 = vadd.f32 %v3324_v5, %v7800_v30  ;;  %v5762_v11 = vpop.f32.mrb[61].mxu0 }
 0xdd7   : > { %v3338_v31 = vsel %vm1357_vm4, %v3325_v28, -inf }
 0xdd8   : > { %3339 = vmax.xlane.f32.xlu0 %v3338_v31  ;;  %v3329_v32 = vpop.f32.mrb[62].mxu0 }
 0xdd9   : > { %v3330_v34 = vadd.f32 %v3329_v32, %v7800_v30  ;;  %v5765_v35 = vpop.f32.mrb[63].mxu0 }
 0xddb   : > { %v3341_v36 = vsel %vm1357_vm4, %v3330_v34, -inf }
 0xddc   : > { %3342 = vmax.xlane.f32.xlu1 %v3341_v36  ;;  %v3334_v37 = vpop.f32.mrb[64].mxu0 }
 0xddd   : > { %v3335_v40 = vadd.f32 %v3334_v37, %v7800_v30  ;;  %v5768_v0 = vpop.f32.mrb[65].mxu0 }
 0xddf   : > { %v3344_v39 = vsel %vm1357_vm4, %v3335_v40, -inf }
 0xde0   : > { %3345 = vmax.xlane.f32.xlu0 %v3344_v39 }
 0xded   : > { %6355 = vrot.lane.b32.xlu1 %v7746_v58, %s6980_s7 }
 0xdf1   : > { %3576 = vrot.lane.b32.xlu1 %v7748_v61, %s6980_s7 }
 0xdf5   : > { %3566 = vrot.lane.b32.xlu1 %v7757_v4, %s6980_s7 }
 0xdf6   : > { %3375 = vrot.lane.b32.xlu0 %v7727_v18, %s6979_s4 }
 0xdf9   : > { %3570 = vrot.lane.b32.xlu1 %v7770_v20, %s6980_s7 }
 0xdfa   : > { %3568 = vrot.lane.b32.xlu0 %v7761_v14, %s6980_s7 }
 0xe65   : > { %v3340_v7 = vpop.xlane.xlu0 %3339 }
 0xe66   : > { %v3347_v41 = vsub.f32 %v3325_v28, %v3340_v7 }
 0xe68   : > { %v3350_v42 = vmul.f32 1.442695, %v3347_v41 }
 0xe69   : > { %v3343_v43 = vpop.xlane.xlu1 %3342 }
 0xe6a   : > { %6442 = vpow2.f32 %v3350_v42  ;;  %v3348_v58 = vsub.f32 %v3330_v34, %v3343_v43 }
 0xe6c   : > { %v3352_v13 = vmul.f32 1.442695, %v3348_v58 }
 0xe6d   : > { %v3346_v61 = vpop.xlane.xlu0 %3345  ;;  %v6356_v46 = vpop.permute.xlu1 %6355 }
 0xe6e   : > { %6444 = vpow2.f32 %v3352_v13  ;;  %v3349_v45 = vsub.f32 %v3335_v40, %v3346_v61  ;;  %v6358_v48 = vunpack.i.h.bf16 %v6356_v46  ;;  %v6357_v14 = vunpack.i.l.bf16 %v6356_v46 }
 0xe70   : > { %v3354_v4 = vmul.f32 1.442695, %v3349_v45  ;;  %v5967_v52 = vpack.c.bf16 %v6358_v48, %v6357_v14 }
 0xe71   : > { %v3376_v47 = vpop.permute.xlu0 %3375  ;;  %v3577_v62 = vpop.permute.xlu1 %3576 }
 0xe72   : > { %6446 = vpow2.f32 %v3354_v4  ;;  %5774 = vmatpush3.msra.mxu1 %v3376_v47 }
 0xe73   : > { %5966 = vmatprep.subr.bf16.mxu1 %v6969_v10 }
 0xe74   : > { %v6443_v20 = vpop.eup %6442 }
 0xe75   : > { %5776 = vmatmul.mubr.msk.f32.vlgmr.msra.gmra.mrb[60].mxu1 %vm1357_vm4, %v6443_v20  ;;  %v3356_v50 = vsel %vm1357_vm4, %v6443_v20, 0.0  ;;  %v3567_v44 = vpop.permute.xlu1 %3566  ;;  %v3569_v63 = vpop.permute.xlu0 %3568 }
 0xe76   : > { %3357 = vadd.xlane.f32.xlu0 %v3356_v50  ;;  %5778 = vmatprep.mubr.msk.f32.mxu1 %vm6971_vm0, %v6970_v16 }
 0xe78   : > { %v6445_v38 = vpop.eup %6444 }
 0xe79   : > { %5779 = vmatmul.mubr.msk.f32.gmra.mrb[62].mxu1 %vm1357_vm4, %v6445_v38  ;;  %v3359_v55 = vsel %vm1357_vm4, %v6445_v38, 0.0  ;;  %v3571_v2 = vpop.permute.xlu1 %3570 }
 0xe7a   : > { %5969 = vmatpush3.bf16.xpose.msk.msra.mxu1 %vm7742_vm2, %v5967_v52  ;;  %3360 = vadd.xlane.f32.xlu1 %v3359_v55 }
 0xe7b   : > { %5781 = vmatprep.mubr.msk.f32.mxu1 %vm6971_vm0, %v6970_v16  ;;  %5801 = vmatprep.subr.mxu1 %v6970_v16 }
 0xe7c   : > { %v6447_v57 = vpop.eup %6446 }
 0xe7d   : > { %5782 = vmatmul.mubr.msk.f32.gmra.mrb[64].mxu1 %vm1357_vm4, %v6447_v57  ;;  %v3362_v60 = vsel %vm1357_vm4, %v6447_v57, 0.0 }
 0xe7e   : > { %3363 = vadd.xlane.f32.xlu0 %v3362_v60  ;;  %5803 = vmatprep.mubr.msk.f32.mxu1 %vm6971_vm0, %v6970_v16 }
 0xe82   : > { %5802 = vmatpush3.xpose.msk.msra.mxu1 %vm1258_vm1, %v3577_v62 }
 0xe83   : > { %5973 = vmatprep.subr.bf16.mxu1 %v6969_v10 }
 0xe85   : > { %5804 = vmatmul.mubr.msk.f32.vlgmr.msra.gmra.mrb[66].mxu1 %vm1258_vm1, %v3567_v44 }
 0xe86   : > { %5806 = vmatprep.mubr.msk.f32.mxu1 %vm6971_vm0, %v6970_v16 }
 0xe89   : > { %5807 = vmatmul.mubr.msk.f32.gmra.mrb[68].mxu1 %vm1258_vm1, %v3569_v63 }
 0xe8a   : > { %5809 = vmatprep.mubr.msk.f32.mxu1 %vm6971_vm0, %v6970_v16 }
 0xe8d   : > { %5810 = vmatmul.mubr.msk.f32.gmra.mrb[70].mxu1 %vm1258_vm1, %v3571_v2 }
 0xe8e   : > { %5831 = vmatprep.mubr.msk.f32.mxu1 %vm6971_vm0, %v6970_v16 }
 0xe99   : > { %v3217_v3 = vpop.f32.mrb[54].mxu1 }
 0xe9a   : > { %v8227_v8 = vadd.f32 %v3217_v3, %v8163_v51  ;;  %v5747_v27 = vpop.f32.mrb[55].mxu1  ;;  %v3804_v3 = vld [vmem:[%s7599_s17 + $0x70] sm:$0xff] }
 0xe9b   : > { %v3805_v27 = vld [vmem:[%s7599_s17 + $0x78] sm:$0xff] }
 0xe9d   : > { %v3222_v12 = vpop.f32.mrb[56].mxu1 }
 0xe9e   : > { %v8230_v15 = vadd.f32 %v3222_v12, %v8166_v49  ;;  %v5750_v17 = vpop.f32.mrb[57].mxu1  ;;  %v5974_v12 = vpack.c.bf16 %v3805_v27, %v3804_v3  ;;  %v3977_v3 = vld [vmem:[%s7601_s11 + $0x68] sm:$0xff]  ;;  %v3975_v27 = vld [vmem:[%s7601_s11 + $0x58] sm:$0xff] }
 0xea0   : > { %5975 = vmatpush3.bf16.msra.mxu1 %v5974_v12  ;;  %v3979_v12 = vld [vmem:[%s7601_s11 + $0x78] sm:$0xff] }
 0xea1   : > { %v3227_v29 = vpop.f32.mrb[58].mxu1 }
 0xea2   : > { %v8233_v19 = vadd.f32 %v3227_v29, %v8169_v59  ;;  %v5753_v21 = vpop.f32.mrb[59].mxu1 }
 0xf03   : > { %v3358_v1 = vpop.xlane.xlu0 %3357 }
 0xf04   : > { %6448 = vrcp.f32 %v3358_v1 }
 0xf07   : > { %v3361_v51 = vpop.xlane.xlu1 %3360 }
 0xf08   : > { %6450 = vrcp.f32 %v3361_v51 }
 0xf0b   : > { %v3364_v24 = vpop.xlane.xlu0 %3363 }
 0xf0c   : > { %6452 = vrcp.f32 %v3364_v24 }
 0xf0e   : > { %v6449_v49 = vpop.eup %6448 }
 0xf12   : > { %v6451_v59 = vpop.eup %6450 }
 0xf16   : > { %v6453_v10 = vpop.eup %6452 }
 0xf48   : > { %v3455_v25 = vpop.f32.mrb[60].mxu1 }
 0xf49   : > { %v3469_v26 = vmul.f32 %v6449_v49, %v3455_v25  ;;  %v5777_v5 = vpop.f32.mrb[61].mxu1 }
 0xf4b   : > { %5789 = vmatmul.mubr.msk.f32.vlgmr.msra.gmra.mrb[66].mxu0 %vm1258_vm1, %v3469_v26 }
 0xf4c   : > { %v3460_v28 = vpop.f32.mrb[62].mxu1  ;;  %5791 = vmatprep.mubr.msk.f32.mxu0 %vm6971_vm0, %v6970_v16 }
 0xf4d   : > { %v3470_v11 = vmul.f32 %v6451_v59, %v3460_v28  ;;  %v5780_v31 = vpop.f32.mrb[63].mxu1 }
 0xf4f   : > { %5792 = vmatmul.mubr.msk.f32.gmra.mrb[68].mxu0 %vm1258_vm1, %v3470_v11 }
 0xf50   : > { %v3465_v32 = vpop.f32.mrb[64].mxu1  ;;  %5794 = vmatprep.mubr.msk.f32.mxu0 %vm6971_vm0, %v6970_v16 }
 0xf51   : > { %v3471_v34 = vmul.f32 %v6453_v10, %v3465_v32  ;;  %v5783_v35 = vpop.f32.mrb[65].mxu1 }
 0xf53   : > { %5795 = vmatmul.mubr.msk.f32.gmra.mrb[70].mxu0 %vm1258_vm1, %v3471_v34 }
 0xf54   : > { %5818 = vmatprep.mubr.msk.f32.mxu0 %vm6971_vm0, %v6970_v16 }
 0xf58   : > { %v3656_v36 = vpop.f32.mrb[66].mxu1 }
 0xf59   : > { %v3657_v37 = vadd.f32 %v3656_v36, %v7800_v30  ;;  %v5805_v40 = vpop.f32.mrb[67].mxu1 }
 0xf5b   : > { %v3670_v0 = vsel %vm1357_vm4, %v3657_v37, -inf }
 0xf5c   : > { %3671 = vmax.xlane.f32.xlu0 %v3670_v0  ;;  %v3661_v39 = vpop.f32.mrb[68].mxu1  ;;  %v5208_v0 = vld [vmem:[%s882_s24] ss:$0 sm:$0xff] }
 0xf5d   : > { %v3662_v7 = vadd.f32 %v3661_v39, %v7800_v30  ;;  %v5808_v41 = vpop.f32.mrb[69].mxu1  ;;  %v6520_v39 = vld [vmem:[%s7606_s5] sm:$0xff] }
 0xf5f   : > { %v3673_v42 = vsel %vm1357_vm4, %v3662_v7, -inf }
 0xf60   : > { %3674 = vmax.xlane.f32.xlu0 %v3673_v42  ;;  %v3666_v43 = vpop.f32.mrb[70].mxu1 }
 0xf61   : > { %v3667_v58 = vadd.f32 %v3666_v43, %v7800_v30  ;;  %v5811_v13 = vpop.f32.mrb[71].mxu1 }
 0xf62   : > { %v6521_v13 = vld [vmem:[%s7606_s5 + $0x8] sm:$0xff] }
 0xf63   : > { %v3676_v61 = vsel %vm1357_vm4, %v3667_v58, -inf }
 0xf64   : > { %3677 = vmax.xlane.f32.xlu1 %v3676_v61 }
 0xf75   : > { %3707 = vrot.lane.b32.xlu1 %v7727_v18, %s6980_s7 }
 0xf76   : > { %6360 = vrot.lane.b32.xlu0 %v7721_v9, %s6980_s7 }
 0xfe9   : > { %v3672_v45 = vpop.xlane.xlu0 %3671 }
 0xfea   : > { %v3679_v4 = vsub.f32 %v3657_v37, %v3672_v45 }
 0xfec   : > { %v3682_v46 = vmul.f32 1.442695, %v3679_v4 }
 0xfed   : > { %v3675_v47 = vpop.xlane.xlu0 %3674 }
 0xfee   : > { %6454 = vpow2.f32 %v3682_v46  ;;  %v3680_v20 = vsub.f32 %v3662_v7, %v3675_v47 }
 0xff0   : > { %v3684_v48 = vmul.f32 1.442695, %v3680_v20  ;;  %v6522_v20 = vld [vmem:[%s7606_s5 + $0x10] sm:$0xff] }
 0xff1   : > { %v3678_v14 = vpop.xlane.xlu1 %3677  ;;  %v6361_v50 = vpop.permute.xlu0 %6360 }
 0xff2   : > { %6456 = vpow2.f32 %v3684_v48  ;;  %v3681_v30 = vsub.f32 %v3667_v58, %v3678_v14  ;;  %v6363_v38 = vunpack.i.h.bf16 %v6361_v50  ;;  %v6362_v52 = vunpack.i.l.bf16 %v6361_v50  ;;  %v3965_v50 = vld [vmem:[%s7601_s11 + $0x8] sm:$0xff] }
 0xff4   : > { %v3686_v55 = vmul.f32 1.442695, %v3681_v30  ;;  %v5971_v57 = vpack.c.bf16 %v6363_v38, %v6362_v52  ;;  %v3969_v30 = vld [vmem:[%s7601_s11 + $0x28] sm:$0xff]  ;;  %v3967_v38 = vld [vmem:[%s7601_s11 + $0x18] sm:$0xff] }
 0xff5   : > { %v3708_v18 = vpop.permute.xlu1 %3707  ;;  %v5976_v52 = vpack.c.bf16 %v3969_v30, %v3965_v50  ;;  %v3990_v30 = vld [vmem:[%s7601_s11 + $0xd0] sm:$0xff] }
 0xff6   : > { %6458 = vpow2.f32 %v3686_v55  ;;  %5972 = vmatpush3.bf16.msra.mxu0 %v5971_v57  ;;  %v3971_v55 = vld [vmem:[%s7601_s11 + $0x38] sm:$0xff]  ;;  %v3964_v57 = vld [vmem:[%s7601_s11] sm:$0xff] }
 0xff7   : > { %5816 = vmatprep.subr.mxu0 %v6970_v16 }
 0xff8   : > { %v6455_v9 = vpop.eup %6454 }
 0xff9   : > { %v3688_v60 = vsel %vm1357_vm4, %v6455_v9, 0.0 }
 0xffa   : > { %3689 = vadd.xlane.f32.xlu1 %v3688_v60  ;;  %5817 = vmatpush3.msra.mxu0 %v3708_v18  ;;  %v6008_v18 = vpack.c.bf16 %v3971_v55, %v3967_v38  ;;  %v3994_v38 = vld [vmem:[%s7601_s11 + $0xf0] sm:$0xff]  ;;  %v3997_v55 = vld [vmem:[%s7601_s11 + $0x108] sm:$0xff] }
 0xffb   : > { %5819 = vmatmul.mubr.msk.f32.vlgmr.msra.gmra.mrb[72].mxu0 %vm1357_vm4, %v6455_v9  ;;  %v3968_v9 = vld [vmem:[%s7601_s11 + $0x20] sm:$0xff]  ;;  %5977 = vmatprep.subr.bf16.mxu0 %v5976_v52  ;;  %v6022_v52 = vpack.c.bf16 %v3994_v38, %v3990_v30 }
 0xffc   : > { %v6457_v62 = vpop.eup %6456  ;;  %5821 = vmatprep.mubr.msk.f32.mxu0 %vm6971_vm0, %v6970_v16  ;;  %v5978_v60 = vpack.c.bf16 %v3968_v9, %v3964_v57  ;;  %6009 = vmatprep.subr.bf16.mxu1 %v6008_v18  ;;  %v4001_v57 = vld [vmem:[%s7601_s11 + $0x128] sm:$0xff]  ;;  %v3999_v9 = vld [vmem:[%s7601_s11 + $0x118] sm:$0xff] }
 0xffd   : > { %v3691_v44 = vsel %vm1357_vm4, %v6457_v62, 0.0  ;;  %v5992_v18 = vpack.c.bf16 %v4001_v57, %v3997_v55 }
 0xffe   : > { %3692 = vadd.xlane.f32.xlu0 %v3691_v44  ;;  %v3970_v44 = vld [vmem:[%s7601_s11 + $0x30] sm:$0xff]  ;;  %5979 = vmatpush1.bf16.msra.mxu0 %v5978_v60  ;;  %v4003_v60 = vld [vmem:[%s7601_s11 + $0x138] sm:$0xff] }
 0xfff   : > { %5822 = vmatmul.mubr.msk.f32.gmra.mrb[74].mxu0 %vm1357_vm4, %v6457_v62  ;;  %v3966_v62 = vld [vmem:[%s7601_s11 + $0x10] sm:$0xff] }
0x1000   : > { %v6459_v63 = vpop.eup %6458  ;;  %5824 = vmatprep.mubr.msk.f32.mxu0 %vm6971_vm0, %v6970_v16 }
0x1001   : > { %v3694_v2 = vsel %vm1357_vm4, %v6459_v63, 0.0 }
0x1002   : > { %3695 = vadd.xlane.f32.xlu0 %v3694_v2  ;;  %v6010_v2 = vpack.c.bf16 %v3970_v44, %v3966_v62  ;;  %v3996_v62 = vld [vmem:[%s7601_s11 + $0x100] sm:$0xff] }
0x1003   : > { %5825 = vmatmul.mubr.msk.f32.gmra.mrb[76].mxu0 %vm1357_vm4, %v6459_v63  ;;  %v3973_v63 = vld [vmem:[%s7601_s11 + $0x48] sm:$0xff]  ;;  %v4000_v44 = vld [vmem:[%s7601_s11 + $0x120] sm:$0xff] }
0x1004   : > { %4114 = vmatprep.mubr.f32.mxu0 %v6970_v16 }
0x101e   : > { %v3549_v17 = vpop.f32.mrb[66].mxu0 }
0x101f   : > { %v3563_v29 = vadd.f32 %v3549_v17, %v8227_v8  ;;  %v5790_v21 = vpop.f32.mrb[67].mxu0  ;;  %v5980_v17 = vpack.c.bf16 %v3977_v3, %v3973_v63  ;;  %v6024_v63 = vpack.c.bf16 %v4003_v60, %v3999_v9  ;;  %v3998_v3 = vld [vmem:[%s7601_s11 + $0x110] sm:$0xff] }
0x1020   : > { %v3972_v21 = vld [vmem:[%s7601_s11 + $0x40] sm:$0xff] }
0x1021   : > { %5981 = vmatprep.subr.bf16.mxu0 %v5980_v17  ;;  %v4005_v17 = vld [vmem:[%s7601_s11 + $0x148] sm:$0xff] }
0x1022   : > { %v3554_v33 = vpop.f32.mrb[68].mxu0 }
0x1023   : > { %v3564_v22 = vadd.f32 %v3554_v33, %v8230_v15  ;;  %v5793_v23 = vpop.f32.mrb[69].mxu0  ;;  %v3976_v33 = vld [vmem:[%s7601_s11 + $0x60] sm:$0xff] }
0x1024   : > { %v5982_v23 = vpack.c.bf16 %v3976_v33, %v3972_v21  ;;  %v4007_v21 = vld [vmem:[%s7601_s11 + $0x158] sm:$0xff] }
0x1026   : > { %v3559_v1 = vpop.f32.mrb[70].mxu0  ;;  %5983 = vmatpush1.bf16.msra.mxu0 %v5982_v23  ;;  %v4004_v23 = vld [vmem:[%s7601_s11 + $0x140] sm:$0xff] }
0x1027   : > { %v3565_v51 = vadd.f32 %v3559_v1, %v8233_v19  ;;  %v5796_v24 = vpop.f32.mrb[71].mxu0  ;;  %v3978_v1 = vld [vmem:[%s7601_s11 + $0x70] sm:$0xff] }
0x1028   : > { %v3985_v24 = vld [vmem:[%s7601_s11 + $0xa8] sm:$0xff] }
0x1087   : > { %v3690_v49 = vpop.xlane.xlu1 %3689 }
0x1088   : > { %6460 = vrcp.f32 %v3690_v49 }
0x108b   : > { %v3693_v25 = vpop.xlane.xlu0 %3692 }
0x108c   : > { %6462 = vrcp.f32 %v3693_v25 }
0x108f   : > { %v3696_v26 = vpop.xlane.xlu0 %3695 }
0x1090   : > { %6464 = vrcp.f32 %v3696_v26  ;;  %v3983_v26 = vld [vmem:[%s7601_s11 + $0x98] sm:$0xff] }
0x1092   : > { %v6461_v5 = vpop.eup %6460 }
0x1096   : > { %v6463_v8 = vpop.eup %6462 }
0x109a   : > { %v6465_v10 = vpop.eup %6464 }
0x10ce   : > { %v3787_v59 = vpop.f32.mrb[72].mxu0 }
0x10cf   : > { %v3801_v28 = vmul.f32 %v6461_v5, %v3787_v59  ;;  %v5820_v11 = vpop.f32.mrb[73].mxu0  ;;  %v3987_v5 = vld [vmem:[%s7601_s11 + $0xb8] sm:$0xff]  ;;  %v3980_v59 = vld [vmem:[%s7601_s11 + $0x80] sm:$0xff] }
0x10d0   : > { %v3984_v11 = vld [vmem:[%s7601_s11 + $0xa0] sm:$0xff] }
0x10d1   : > { %5832 = vmatmul.mubr.msk.f32.vlgmr.msra.gmra.mrb[72].mxu1 %vm1258_vm1, %v3801_v28  ;;  %v6016_v28 = vpack.c.bf16 %v3987_v5, %v3983_v26  ;;  %v4013_v5 = vld [vmem:[%s7601_s11 + $0x188] sm:$0xff] }
0x10d2   : > { %v3792_v15 = vpop.f32.mrb[74].mxu0  ;;  %5834 = vmatprep.mubr.msk.f32.mxu1 %vm6971_vm0, %v6970_v16  ;;  %6011 = vmatpush1.bf16.msra.mxu1 %v6010_v2  ;;  %v5994_v2 = vpack.c.bf16 %v4000_v44, %v3996_v62  ;;  %v5209_v62 = vld [vmem:[%s885_s14] ss:$0 sm:$0xff] }
0x10d3   : > { %v3802_v19 = vmul.f32 %v6463_v8, %v3792_v15  ;;  %v5823_v31 = vpop.f32.mrb[75].mxu0  ;;  %v3982_v8 = vld [vmem:[%s7601_s11 + $0x90] sm:$0xff] }
0x10d4   : > { %v3986_v15 = vld [vmem:[%s7601_s11 + $0xb0] sm:$0xff] }
0x10d5   : > { %5835 = vmatmul.mubr.msk.f32.gmra.mrb[74].mxu1 %vm1258_vm1, %v3802_v19  ;;  %v5986_v19 = vpack.c.bf16 %v3984_v11, %v3980_v59  ;;  %v6018_v31 = vpack.c.bf16 %v3986_v15, %v3982_v8  ;;  %v4017_v59 = vld [vmem:[%s7601_s11 + $0x1a8] sm:$0xff]  ;;  %v4019_v8 = vld [vmem:[%s7601_s11 + $0x1b8] sm:$0xff]  ;;  %v4012_v15 = vld [vmem:[%s7601_s11 + $0x180] sm:$0xff] }
0x10d6   : > { %v3797_v32 = vpop.f32.mrb[76].mxu0  ;;  %5837 = vmatprep.mubr.msk.f32.mxu1 %vm6971_vm0, %v6970_v16  ;;  %v6000_v11 = vpack.c.bf16 %v4017_v59, %v4013_v5  ;;  %v4572_v5 = vld [vmem:[%s7603_s13 + $0x100] sm:$0xff] }
0x10d7   : > { %v3803_v34 = vmul.f32 %v6465_v10, %v3797_v32  ;;  %v5826_v35 = vpop.f32.mrb[77].mxu0 }
0x10d9   : > { %5838 = vmatmul.mubr.msk.f32.gmra.mrb[76].mxu1 %vm1258_vm1, %v3803_v34 }
0x10da   : > { %4197 = vmatprep.mubr.f32.mxu1 %v6970_v16 }
0x11a4   : > { %v3881_v36 = vpop.f32.mrb[72].mxu1 }
0x11a5   : > { %v3895_v37 = vadd.f32 %v3881_v36, %v3563_v29  ;;  %v5833_v40 = vpop.f32.mrb[73].mxu1  ;;  %v6012_v29 = vpack.c.bf16 %v3979_v12, %v3975_v27  ;;  %v4002_v27 = vld [vmem:[%s7601_s11 + $0x130] sm:$0xff] }
0x11a6   : > { %v6026_v12 = vpack.c.bf16 %v4002_v27, %v3998_v3 }
0x11a7   : > { %v3898_v7 = vadd.f32 %v6520_v39, %v3895_v37  ;;  %6013 = vmatprep.subr.bf16.mxu1 %v6012_v29  ;;  %v4009_v29 = vld [vmem:[%s7601_s11 + $0x168] sm:$0xff] }
0x11a8   : > { %v3886_v41 = vpop.f32.mrb[74].mxu1  ;;  %v5996_v33 = vpack.c.bf16 %v4009_v29, %v4005_v17 }
0x11a9   : > { %v3896_v42 = vadd.f32 %v3886_v41, %v3564_v22  ;;  %v5836_v43 = vpop.f32.mrb[75].mxu1  ;;  %v8288_v58 = vadd.f32 %v5208_v0, %v3898_v7  ;;  %v3974_v22 = vld [vmem:[%s7601_s11 + $0x50] sm:$0xff] }
0x11aa   : > { %v6014_v49 = vpack.c.bf16 %v3978_v1, %v3974_v22  ;;  %v3989_v43 = vld [vmem:[%s7601_s11 + $0xc8] sm:$0xff]  ;;  %v4011_v22 = vld [vmem:[%s7601_s11 + $0x178] sm:$0xff]  ;;  %v4008_v1 = vld [vmem:[%s7601_s11 + $0x160] sm:$0xff] }
0x11ab   : > { %v3899_v61 = vadd.f32 %v6521_v13, %v3896_v42  ;;  %3913 = vadd.xlane.f32.xlu1 %v8288_v58  ;;  %v3993_v13 = vld [vmem:[%s7601_s11 + $0xe8] sm:$0xff] }
0x11ac   : > { %v3891_v45 = vpop.f32.mrb[76].mxu1  ;;  %6015 = vmatpush1.bf16.msra.mxu1 %v6014_v49  ;;  %v4006_v49 = vld [vmem:[%s7601_s11 + $0x150] sm:$0xff] }
0x11ad   : > { %v3897_v4 = vadd.f32 %v3891_v45, %v3565_v51  ;;  %v5839_v46 = vpop.f32.mrb[77].mxu1  ;;  %v8292_v47 = vadd.f32 %v5208_v0, %v3899_v61  ;;  %v3981_v51 = vld [vmem:[%s7601_s11 + $0x88] sm:$0xff]  ;;  %6017 = vmatprep.subr.bf16.mxu1 %v6016_v28  ;;  %v3991_v61 = vld [vmem:[%s7601_s11 + $0xd8] sm:$0xff]  ;;  %v5988_v45 = vpack.c.bf16 %v3993_v13, %v3989_v43  ;;  %v4020_v43 = vld [vmem:[%s7601_s11 + $0x1c0] sm:$0xff] }
0x11ae   : > { %v5984_v25 = vpack.c.bf16 %v3985_v24, %v3981_v51  ;;  %v3988_v46 = vld [vmem:[%s7601_s11 + $0xc0] sm:$0xff]  ;;  %v6028_v51 = vpack.c.bf16 %v4011_v22, %v4007_v21  ;;  %v5998_v24 = vpack.c.bf16 %v4008_v1, %v4004_v23  ;;  %v4015_v28 = vld [vmem:[%s7601_s11 + $0x198] sm:$0xff]  ;;  %v4557_v23 = vld [vmem:[%s7603_s13 + $0x88] sm:$0xff] }
0x11af   : > { %v3900_v48 = vadd.f32 %v6522_v20, %v3897_v4  ;;  %3915 = vadd.xlane.f32.xlu0 %v8292_v47  ;;  %v3995_v4 = vld [vmem:[%s7601_s11 + $0xf8] sm:$0xff]  ;;  %v3992_v20 = vld [vmem:[%s7601_s11 + $0xe0] sm:$0xff] }
0x11b0   : > { %5985 = vmatprep.subr.bf16.mxu0 %v5984_v25  ;;  %6019 = vmatpush1.bf16.msra.mxu1 %v6018_v31  ;;  %v5990_v50 = vpack.c.bf16 %v3992_v20, %v3988_v46  ;;  %v4010_v25 = vld [vmem:[%s7601_s11 + $0x170] sm:$0xff]  ;;  %v6032_v31 = vpack.c.bf16 %v4019_v8, %v4015_v28  ;;  %v4024_v13 = vld [vmem:[%s7601_s11 + $0x1e0] sm:$0xff] }
0x11b1   : > { %v8296_v14 = vadd.f32 %v5208_v0, %v3900_v48  ;;  %5987 = vmatpush1.bf16.msra.mxu0 %v5986_v19  ;;  %v6020_v48 = vpack.c.bf16 %v3995_v4, %v3991_v61  ;;  %v6030_v26 = vpack.c.bf16 %v4010_v25, %v4006_v49  ;;  %v4016_v19 = vld [vmem:[%s7601_s11 + $0x1a0] sm:$0xff]  ;;  %v4022_v4 = vld [vmem:[%s7601_s11 + $0x1d0] sm:$0xff]  ;;  %v4541_v49 = vld [vmem:[%s7603_s13 + $0x8] sm:$0xff] }
0x11b2   : > { %5989 = vmatprep.subr.bf16.mxu0 %v5988_v45  ;;  %v6006_v45 = vpack.c.bf16 %v4024_v13, %v4020_v43  ;;  %v4026_v46 = vld [vmem:[%s7601_s11 + $0x1f0] sm:$0xff]  ;;  %v4556_v22 = vld [vmem:[%s7603_s13 + $0x80] sm:$0xff]  ;;  %v4593_v43 = vld [vmem:[%s7603_s13 + $0x1a8] sm:$0xff] }
0x11b3   : > { %3917 = vadd.xlane.f32.xlu1 %v8296_v14  ;;  %6021 = vmatprep.subr.bf16.mxu1 %v6020_v48  ;;  %v6038_v20 = vpack.c.bf16 %v4026_v46, %v4022_v4  ;;  %v4588_v1 = vld [vmem:[%s7603_s13 + $0x180] sm:$0xff]  ;;  %v4558_v28 = vld [vmem:[%s7603_s13 + $0x90] sm:$0xff]  ;;  %v4545_v4 = vld [vmem:[%s7603_s13 + $0x28] sm:$0xff] }
0x11b4   : > { %6023 = vmatpush1.bf16.msra.mxu1 %v6022_v52  ;;  %v4590_v8 = vld [vmem:[%s7603_s13 + $0x190] sm:$0xff]  ;;  %v4576_v46 = vld [vmem:[%s7603_s13 + $0x120] sm:$0xff] }
0x11b5   : > { %5991 = vmatpush1.bf16.msra.mxu0 %v5990_v50  ;;  %6025 = vmatprep.subr.bf16.mxu1 %v6024_v63  ;;  %v5210_v63 = vld [vmem:[%s888_s27] ss:$0 sm:$0xff] }
0x11b6   : > { %5993 = vmatprep.subr.bf16.mxu0 %v5992_v18 }
0x11b8   : > { %6027 = vmatpush1.bf16.msra.mxu1 %v6026_v12 }
0x11b9   : > { %5995 = vmatpush1.bf16.msra.mxu0 %v5994_v2  ;;  %6029 = vmatprep.subr.bf16.mxu1 %v6028_v51  ;;  %v6040_v51 = vpack.c.bf16 %v4557_v23, %v4556_v22  ;;  %v4581_v22 = vld [vmem:[%s7603_s13 + $0x148] sm:$0xff]  ;;  %v4566_v23 = vld [vmem:[%s7603_s13 + $0xd0] sm:$0xff] }
0x11ba   : > { %5997 = vmatprep.subr.bf16.mxu0 %v5996_v33 }
0x11bc   : > { %6031 = vmatpush1.bf16.msra.mxu1 %v6030_v26 }
0x11bd   : > { %5999 = vmatpush1.bf16.msra.mxu0 %v5998_v24  ;;  %6033 = vmatprep.subr.bf16.mxu1 %v6032_v31  ;;  %v4540_v24 = vld [vmem:[%s7603_s13] sm:$0xff]  ;;  %v4542_v31 = vld [vmem:[%s7603_s13 + $0x10] sm:$0xff] }
0x11be   : > { %6001 = vmatprep.subr.bf16.mxu0 %v6000_v11  ;;  %v6042_v26 = vpack.c.bf16 %v4541_v49, %v4540_v24  ;;  %v4559_v11 = vld [vmem:[%s7603_s13 + $0x98] sm:$0xff] }
0x1238   : > { %v3914_v10 = vpop.xlane.xlu1 %3913 }
0x1239   : > { %v3919_v32 = vmul.f32 0.0078125, %v3914_v10  ;;  %v6002_v10 = vpack.c.bf16 %v4016_v19, %v4012_v15  ;;  %v6044_v15 = vpack.c.bf16 %v4559_v11, %v4558_v28  ;;  %v4591_v19 = vld [vmem:[%s7603_s13 + $0x198] sm:$0xff]  ;;  %v4568_v11 = vld [vmem:[%s7603_s13 + $0xe0] sm:$0xff] }
0x123a   : > { %v4583_v28 = vld [vmem:[%s7603_s13 + $0x158] sm:$0xff] }
0x123b   : > { %v8324_v34 = vsub.f32 %v8288_v58, %v3919_v32  ;;  %v4014_v32 = vld [vmem:[%s7601_s11 + $0x190] sm:$0xff]  ;;  %6003 = vmatpush1.bf16.msra.mxu0 %v6002_v10  ;;  %v4543_v10 = vld [vmem:[%s7603_s13 + $0x18] sm:$0xff] }
0x123c   : > { %v3916_v35 = vpop.xlane.xlu0 %3915 }
0x123d   : > { %v3920_v36 = vmul.f32 0.0078125, %v3916_v35  ;;  %v3925_v37 = vmul.f32 %v8324_v34, %v8324_v34  ;;  %v4018_v35 = vld [vmem:[%s7601_s11 + $0x1b0] sm:$0xff] }
0x123f   : > { %v8329_v40 = vsub.f32 %v8292_v47, %v3920_v36  ;;  %3928 = vadd.xlane.f32.xlu0 %v3925_v37  ;;  %v6034_v36 = vpack.c.bf16 %v4018_v35, %v4014_v32  ;;  %v4021_v37 = vld [vmem:[%s7601_s11 + $0x1c8] sm:$0xff]  ;;  %v6076_v32 = vpack.c.bf16 %v4591_v19, %v4590_v8  ;;  %v6046_v35 = vpack.c.bf16 %v4543_v10, %v4542_v31 }
0x1240   : > { %v3918_v0 = vpop.xlane.xlu1 %3917  ;;  %v4569_v8 = vld [vmem:[%s7603_s13 + $0xe8] sm:$0xff] }
0x1241   : > { %v3921_v39 = vmul.f32 0.0078125, %v3918_v0  ;;  %v3926_v7 = vmul.f32 %v8329_v40, %v8329_v40  ;;  %v4025_v0 = vld [vmem:[%s7601_s11 + $0x1e8] sm:$0xff]  ;;  %6035 = vmatpush1.bf16.msra.mxu1 %v6034_v36  ;;  %v4574_v36 = vld [vmem:[%s7603_s13 + $0x110] sm:$0xff] }
0x1242   : > { %v4601_v19 = vld [vmem:[%s7603_s13 + $0x1e8] sm:$0xff] }
0x1243   : > { %v8334_v41 = vsub.f32 %v8296_v14, %v3921_v39  ;;  %3930 = vadd.xlane.f32.xlu1 %v3926_v7  ;;  %v4023_v39 = vld [vmem:[%s7601_s11 + $0x1d8] sm:$0xff]  ;;  %v6004_v7 = vpack.c.bf16 %v4025_v0, %v4021_v37  ;;  %v4560_v0 = vld [vmem:[%s7603_s13 + $0xa0] sm:$0xff] }
0x1244   : > { %v4575_v37 = vld [vmem:[%s7603_s13 + $0x118] sm:$0xff] }
0x1245   : > { %v3927_v42 = vmul.f32 %v8334_v41, %v8334_v41  ;;  %6005 = vmatprep.subr.bf16.mxu0 %v6004_v7  ;;  %v4561_v7 = vld [vmem:[%s7603_s13 + $0xa8] sm:$0xff] }
0x1246   : > { %6007 = vmatpush1.bf16.msra.mxu0 %v6006_v45  ;;  %v6048_v13 = vpack.c.bf16 %v4561_v7, %v4560_v0  ;;  %v4544_v45 = vld [vmem:[%s7603_s13 + $0x20] sm:$0xff]  ;;  %v4570_v7 = vld [vmem:[%s7603_s13 + $0xf0] sm:$0xff] }
0x1247   : > { %3932 = vadd.xlane.f32.xlu0 %v3927_v42  ;;  %v4027_v42 = vld [vmem:[%s7601_s11 + $0x1f8] sm:$0xff]  ;;  %6041 = vmatprep.subr.bf16.mxu0 %v6040_v51  ;;  %v4598_v51 = vld [vmem:[%s7603_s13 + $0x1d0] sm:$0xff] }
0x1248   : > { %v6036_v61 = vpack.c.bf16 %v4027_v42, %v4023_v39  ;;  %v6078_v39 = vpack.c.bf16 %v4575_v37, %v4574_v36  ;;  %v4592_v42 = vld [vmem:[%s7603_s13 + $0x1a0] sm:$0xff]  ;;  %v4553_v36 = vld [vmem:[%s7603_s13 + $0x68] sm:$0xff] }
0x1249   : > { %v4584_v37 = vld [vmem:[%s7603_s13 + $0x160] sm:$0xff] }
0x124a   : > { %6037 = vmatprep.subr.bf16.mxu1 %v6036_v61  ;;  %v6080_v61 = vpack.c.bf16 %v4593_v43, %v4592_v42  ;;  %v4571_v42 = vld [vmem:[%s7603_s13 + $0xf8] sm:$0xff]  ;;  %v4602_v43 = vld [vmem:[%s7603_s13 + $0x1f0] sm:$0xff] }
0x124b   : > { %6039 = vmatpush1.bf16.msra.mxu1 %v6038_v20  ;;  %v6050_v20 = vpack.c.bf16 %v4545_v4, %v4544_v45  ;;  %v6068_v4 = vpack.c.bf16 %v4571_v42, %v4570_v7 }
0x12cc   : > { %v3929_v48 = vpop.xlane.xlu0 %3928 }
0x12cd   : > { %v3934_v50 = vmul.f32 0.0078125, %v3929_v48  ;;  %v4577_v48 = vld [vmem:[%s7603_s13 + $0x128] sm:$0xff] }
0x12cf   : > { %v3937_v30 = vadd.f32 1e-06, %v3934_v50  ;;  %v4562_v50 = vld [vmem:[%s7603_s13 + $0xb0] sm:$0xff] }
0x12d0   : > { %v3931_v38 = vpop.xlane.xlu1 %3930 }
0x12d1   : > { %6466 = vrsqrt.f32 %v3937_v30  ;;  %v3935_v52 = vmul.f32 0.0078125, %v3931_v38  ;;  %v4563_v30 = vld [vmem:[%s7603_s13 + $0xb8] sm:$0xff]  ;;  %v6082_v38 = vpack.c.bf16 %v4577_v48, %v4576_v46  ;;  %v4554_v46 = vld [vmem:[%s7603_s13 + $0x70] sm:$0xff] }
0x12d3   : > { %v3938_v55 = vadd.f32 1e-06, %v3935_v52  ;;  %v6052_v52 = vpack.c.bf16 %v4563_v30, %v4562_v50  ;;  %v4586_v50 = vld [vmem:[%s7603_s13 + $0x170] sm:$0xff]  ;;  %v4587_v30 = vld [vmem:[%s7603_s13 + $0x178] sm:$0xff] }
0x12d4   : > { %v3933_v57 = vpop.xlane.xlu0 %3932 }
0x12d5   : > { %6468 = vrsqrt.f32 %v3938_v55  ;;  %v3936_v9 = vmul.f32 0.0078125, %v3933_v57  ;;  %v4594_v55 = vld [vmem:[%s7603_s13 + $0x1b0] sm:$0xff]  ;;  %v4595_v57 = vld [vmem:[%s7603_s13 + $0x1b8] sm:$0xff] }
0x12d7   : > { %v3939_v18 = vadd.f32 1e-06, %v3936_v9  ;;  %v4546_v9 = vld [vmem:[%s7603_s13 + $0x30] sm:$0xff] }
0x12d9   : > { %6470 = vrsqrt.f32 %v3939_v18  ;;  %v6084_v18 = vpack.c.bf16 %v4595_v57, %v4594_v55  ;;  %v4028_v55 = vld [vmem:[%s7590_s22] sm:$0xf]  ;;  %v4044_v57 = vsub.s32 3, %v7709_v53 }
0x12db   : > { %v6467_v60 = vpop.eup %6466 }
0x12dc   : > { %v3943_v44 = vmul.f32 %v6467_v60, %v8324_v34  ;;  %v4547_v60 = vld [vmem:[%s7603_s13 + $0x38] sm:$0xff] }
0x12de   : > { %v3952_v2 = vmul.f32 %v5209_v62, %v3943_v44  ;;  %v4579_v44 = vld [vmem:[%s7603_s13 + $0x138] sm:$0xff] }
0x12df   : > { %v6469_v3 = vpop.eup %6468 }
0x12e0   : > { %v3961_v27 = vadd.f32 %v5210_v63, %v3952_v2  ;;  %v3944_v12 = vmul.f32 %v6469_v3, %v8329_v40  ;;  %v4564_v2 = vld [vmem:[%s7603_s13 + $0xc0] sm:$0xff]  ;;  %v4565_v3 = vld [vmem:[%s7603_s13 + $0xc8] sm:$0xff] }
0x12e2   : > { %4115 = vmatmul.mubr.f32.vlgmr.msra.gmra.mrb[78].mxu0 %v3961_v27  ;;  %4198 = vmatmul.mubr.f32.vlgmr.msra.gmra.mrb[78].mxu1 %v3961_v27  ;;  %v3953_v17 = vmul.f32 %v5209_v62, %v3944_v12  ;;  %v4596_v27 = vld [vmem:[%s7603_s13 + $0x1c0] sm:$0xff] }
0x12e3   : > { %v6471_v29 = vpop.eup %6470  ;;  %4120 = vmatprep.mubr.f32.mxu0 %v6970_v16  ;;  %4203 = vmatprep.mubr.f32.mxu1 %v6970_v16 }
0x12e4   : > { %v3962_v34 = vadd.f32 %v5210_v63, %v3953_v17  ;;  %v3945_v21 = vmul.f32 %v6471_v29, %v8334_v41  ;;  %v4589_v41 = vld [vmem:[%s7603_s13 + $0x188] sm:$0xff]  ;;  %6043 = vmatpush3.bf16.msra.mxu0 %v6042_v26  ;;  %v6056_v17 = vpack.c.bf16 %v4565_v3, %v4564_v2  ;;  %v4550_v26 = vld [vmem:[%s7603_s13 + $0x50] sm:$0xff] }
0x12e5   : > { %v6072_v25 = vpack.c.bf16 %v4589_v41, %v4588_v1  ;;  %6045 = vmatprep.subr.bf16.mxu0 %v6044_v15  ;;  %v4597_v29 = vld [vmem:[%s7603_s13 + $0x1c8] sm:$0xff]  ;;  %v4567_v1 = vld [vmem:[%s7603_s13 + $0xd8] sm:$0xff]  ;;  %v4600_v15 = vld [vmem:[%s7603_s13 + $0x1e0] sm:$0xff] }
0x12e6   : > { %4121 = vmatmul.mubr.f32.gmra.mrb[80].mxu0 %v3962_v34  ;;  %4204 = vmatmul.mubr.f32.gmra.mrb[80].mxu1 %v3962_v34  ;;  %v3954_v40 = vmul.f32 %v5209_v62, %v3945_v21  ;;  %v4578_v62 = vld [vmem:[%s7603_s13 + $0x130] sm:$0xff]  ;;  %v4548_v34 = vld [vmem:[%s7603_s13 + $0x40] sm:$0xff]  ;;  %v4549_v21 = vld [vmem:[%s7603_s13 + $0x48] sm:$0xff]  ;;  %v6096_v0 = vpack.c.bf16 %v4601_v19, %v4600_v15 }
0x12e7   : > { %4126 = vmatprep.mubr.f32.mxu0 %v6970_v16  ;;  %4209 = vmatprep.mubr.f32.mxu1 %v6970_v16  ;;  %v4573_v16 = vld [vmem:[%s7603_s13 + $0x108] sm:$0xff]  ;;  %v6086_v12 = vpack.c.bf16 %v4579_v44, %v4578_v62  ;;  %v4599_v41 = vld [vmem:[%s7603_s13 + $0x1d8] sm:$0xff]  ;;  %v6058_v24 = vpack.c.bf16 %v4549_v21, %v4548_v34  ;;  %v8473_v62 = vrot.slane %v4028_v55, %v4044_v57 }
0x12e8   : > { %v3963_v33 = vadd.f32 %v5210_v63, %v3954_v40  ;;  %v6074_v59 = vpack.c.bf16 %v4573_v16, %v4572_v5  ;;  %6073 = vmatprep.subr.bf16.mxu1 %v6072_v25  ;;  %6047 = vmatpush3.bf16.msra.mxu0 %v6046_v35  ;;  %v6054_v63 = vpack.c.bf16 %v4547_v60, %v4546_v9  ;;  %v4551_v5 = vld [vmem:[%s7603_s13 + $0x58] sm:$0xff]  ;;  %v4582_v16 = vld [vmem:[%s7603_s13 + $0x150] sm:$0xff]  ;;  %v4552_v35 = vld [vmem:[%s7603_s13 + $0x60] sm:$0xff] }
0x12e9   : > { %6049 = vmatprep.subr.bf16.mxu0 %v6048_v13  ;;  %v6088_v40 = vpack.c.bf16 %v4597_v29, %v4596_v27  ;;  %v6060_v25 = vpack.c.bf16 %v4567_v1, %v4566_v23  ;;  %v6062_v31 = vpack.c.bf16 %v4551_v5, %v4550_v26  ;;  %v6094_v10 = vpack.c.bf16 %v4583_v28, %v4582_v16  ;;  %v4603_v13 = vld [vmem:[%s7603_s13 + $0x1f8] sm:$0xff] }
0x12ea   : > { %4127 = vmatmul.mubr.f32.gmra.mrb[82].mxu0 %v3963_v33  ;;  %4210 = vmatmul.mubr.f32.gmra.mrb[82].mxu1 %v3963_v33  ;;  %v4580_v33 = vld [vmem:[%s7603_s13 + $0x140] sm:$0xff]  ;;  %v6100_v48 = vpack.c.bf16 %v4603_v13, %v4602_v43  ;;  %v8463_v9 = vrot.slane %v4028_v55, %v1015_v6  ;;  %v8471_v60 = vrot.slane %v4028_v55, %v1019_v54 }
0x12eb   : > { %6075 = vmatpush3.bf16.msra.mxu1 %v6074_v59  ;;  %v6090_v49 = vpack.c.bf16 %v4581_v22, %v4580_v33  ;;  %v6092_v59 = vpack.c.bf16 %v4599_v41, %v4598_v51 }
0x12ec   : > { %6077 = vmatprep.subr.bf16.mxu1 %v6076_v32  ;;  %6051 = vmatpush3.bf16.msra.mxu0 %v6050_v20  ;;  %v6064_v32 = vpack.c.bf16 %v4569_v8, %v4568_v11  ;;  %v4555_v20 = vld [vmem:[%s7603_s13 + $0x78] sm:$0xff] }
0x12ed   : > { %6053 = vmatprep.subr.bf16.mxu0 %v6052_v52  ;;  %v6102_v52 = vpack.c.bf16 %v4587_v30, %v4586_v50 }
0x12ef   : > { %6079 = vmatpush3.bf16.msra.mxu1 %v6078_v39  ;;  %v4585_v39 = vld [vmem:[%s7603_s13 + $0x168] sm:$0xff]  ;;  %s8969_s13 = sld [smem:[#allocation53_spill]] }
0x12f0   : > { %6081 = vmatprep.subr.bf16.mxu1 %v6080_v61  ;;  %6055 = vmatpush3.bf16.msra.mxu0 %v6054_v63  ;;  %v6066_v61 = vpack.c.bf16 %v4553_v36, %v4552_v35  ;;  %v6098_v45 = vpack.c.bf16 %v4585_v39, %v4584_v37 }
0x12f1   : > { %6057 = vmatprep.subr.bf16.mxu0 %v6056_v17 }
0x12f3   : > { %6083 = vmatpush3.bf16.msra.mxu1 %v6082_v38  ;;  %v6070_v38 = vpack.c.bf16 %v4555_v20, %v4554_v46 }
0x12f4   : > { %6085 = vmatprep.subr.bf16.mxu1 %v6084_v18  ;;  %6059 = vmatpush3.bf16.msra.mxu0 %v6058_v24  ;;  %v8467_v18 = vrot.slane %v4028_v55, %v1023_v56 }
0x12f5   : > { %6061 = vmatprep.subr.bf16.mxu0 %v6060_v25 }
0x12f7   : > { %6087 = vmatpush3.bf16.msra.mxu1 %v6086_v12 }
0x12f8   : > { %6089 = vmatprep.subr.bf16.mxu1 %v6088_v40  ;;  %6063 = vmatpush3.bf16.msra.mxu0 %v6062_v31 }
0x12f9   : > { %6065 = vmatprep.subr.bf16.mxu0 %v6064_v32 }
0x12fb   : > { %6091 = vmatpush3.bf16.msra.mxu1 %v6090_v49 }
0x12fc   : > { %6093 = vmatprep.subr.bf16.mxu1 %v6092_v59  ;;  %6067 = vmatpush3.bf16.msra.mxu0 %v6066_v61 }
0x12fd   : > { %6069 = vmatprep.subr.bf16.mxu0 %v6068_v4 }
0x12ff   : > { %6095 = vmatpush3.bf16.msra.mxu1 %v6094_v10 }
0x1300   : > { %6097 = vmatprep.subr.bf16.mxu1 %v6096_v0  ;;  %6071 = vmatpush3.bf16.msra.mxu0 %v6070_v38 }
0x1303   : > { %6099 = vmatpush3.bf16.msra.mxu1 %v6098_v45 }
0x1304   : > { %6101 = vmatprep.subr.bf16.mxu1 %v6100_v48 }
0x1307   : > { %6103 = vmatpush3.bf16.msra.mxu1 %v6102_v52 }
0x13b5   : > { %v4116_v44 = vpop.f32.mrb[78].mxu0  ;;  %v4199_v63 = vpop.f32.mrb[78].mxu1 }
0x13b6   : > { %v4117_v2 = vadd.f32 %v4116_v44, %v8463_v9  ;;  %v4200_v3 = vadd.f32 %v4199_v63, %v8467_v18  ;;  %v4118_v27 = vpop.f32.mrb[79].mxu0  ;;  %v4201_v12 = vpop.f32.mrb[79].mxu1 }
0x13b7   : > { %v4119_v6 = vadd.f32 %v4118_v27, %v8471_v60  ;;  %v4202_v17 = vadd.f32 %v4201_v12, %v8473_v62 }
0x13b8   : > { %v8479_v56 = vmul.f32 0.70710677, %v4117_v2  ;;  %v8481_v29 = vmul.f32 0.70710677, %v4200_v3  ;;  %v8506_v42 = vmul.f32 0.5, %v4117_v2  ;;  %v8520_v63 = vmul.f32 0.5, %v4200_v3 }
0x13b9   : > { %v8483_v53 = vmul.f32 0.70710677, %v4119_v6  ;;  %v8485_v54 = vmul.f32 0.70710677, %v4202_v17  ;;  %v4122_v26 = vpop.f32.mrb[80].mxu0  ;;  %v4205_v5 = vpop.f32.mrb[80].mxu1 }
0x13ba   : > { %v4240_v34 = vand.u32 2147483647, %v8479_v56  ;;  %v4242_v21 = vand.u32 2147483647, %v8481_v29  ;;  %v4124_v59 = vpop.f32.mrb[81].mxu0  ;;  %v4207_v28 = vpop.f32.mrb[81].mxu1  ;;  %v4123_v15 = vadd.f32 %v4122_v26, %v8463_v9  ;;  %v8495_v32 = vadd.f32 %v4205_v5, %v8467_v18 }
0x13bb   : > { %v4241_v40 = vand.u32 2147483647, %v8483_v53  ;;  %v4243_v33 = vand.u32 2147483647, %v8485_v54  ;;  %v8504_v7 = vadd.f32 %v4124_v59, %v8471_v60  ;;  %v8513_v46 = vadd.f32 %v4207_v28, %v8473_v62 }
0x13bc   : > { %v4252_v22 = vmul.f32 0.3275911, %v4240_v34  ;;  %v4408_v23 = vsub.f32 0.0, %v4240_v34  ;;  %v4254_v1 = vmul.f32 0.3275911, %v4242_v21  ;;  %v4410_v51 = vsub.f32 0.0, %v4242_v21 }
0x13bd   : > { %v4409_v41 = vsub.f32 0.0, %v4241_v40  ;;  %v4253_v11 = vmul.f32 0.3275911, %v4241_v40  ;;  %v4411_v8 = vsub.f32 0.0, %v4243_v33  ;;  %v4128_v19 = vpop.f32.mrb[82].mxu0  ;;  %v8492_v31 = vpop.f32.mrb[82].mxu1 }
0x13be   : > { %v4264_v24 = vadd.f32 1.0, %v4252_v22  ;;  %v4420_v49 = vmul.f32 %v4408_v23, %v4240_v34  ;;  %v4266_v25 = vadd.f32 1.0, %v4254_v1  ;;  %v4422_v16 = vmul.f32 %v4410_v51, %v4242_v21  ;;  %v8497_v35 = vpop.f32.mrb[83].mxu0  ;;  %v8499_v36 = vpop.f32.mrb[83].mxu1 }
0x13bf   : > { %v4421_v10 = vmul.f32 %v4409_v41, %v4241_v40  ;;  %v4255_v0 = vmul.f32 0.3275911, %v4243_v33  ;;  %v8501_v39 = vmul.f32 0.70710677, %v4123_v15  ;;  %v8509_v13 = vmul.f32 0.70710677, %v8495_v32 }
0x13c0   : > { %6472 = vrcp.f32 %v4264_v24  ;;  %v4432_v37 = vmul.f32 1.442695, %v4420_v49  ;;  %v4436_v43 = vmul.f32 1.442695, %v4422_v16  ;;  %v4265_v61 = vadd.f32 1.0, %v4253_v11 }
0x13c1   : > { %6474 = vrcp.f32 %v4266_v25  ;;  %v4423_v45 = vmul.f32 %v4411_v8, %v4243_v33  ;;  %v4244_v4 = vand.u32 2147483647, %v8501_v39  ;;  %v4434_v20 = vmul.f32 1.442695, %v4421_v10 }
0x13c2   : > { %v4246_v48 = vand.u32 2147483647, %v8509_v13  ;;  %v8517_v50 = vmul.f32 0.70710677, %v8504_v7  ;;  %6476 = vpow2.f32 %v4432_v37  ;;  %v4267_v30 = vadd.f32 1.0, %v4255_v0 }
0x13c3   : > { %v4256_v38 = vmul.f32 0.3275911, %v4244_v4  ;;  %v4412_v52 = vsub.f32 0.0, %v4244_v4  ;;  %6478 = vpow2.f32 %v4436_v43  ;;  %v4438_v2 = vmul.f32 1.442695, %v4423_v45 }
0x13c4   : > { %v4258_v55 = vmul.f32 0.3275911, %v4246_v48  ;;  %v4414_v57 = vsub.f32 0.0, %v4246_v48  ;;  %v4245_v44 = vand.u32 2147483647, %v8517_v50  ;;  %6480 = vrcp.f32 %v4265_v61 }
0x13c5   : > { %v8523_v27 = vmul.f32 0.70710677, %v8513_v46  ;;  %v8525_v12 = vmul.f32 0.5, %v4119_v6  ;;  %6482 = vpow2.f32 %v4434_v20  ;;  %v8527_v34 = vmul.f32 0.5, %v4202_v17 }
0x13c6   : > { %v4424_v21 = vmul.f32 %v4412_v52, %v4244_v4  ;;  %v4268_v33 = vadd.f32 1.0, %v4256_v38  ;;  %v4426_v22 = vmul.f32 %v4414_v57, %v4246_v48  ;;  %v4413_v23 = vsub.f32 0.0, %v4245_v44 }
0x13c7   : > { %v4247_v1 = vand.u32 2147483647, %v8523_v27  ;;  %6484 = vrcp.f32 %v4267_v30  ;;  %v4270_v41 = vadd.f32 1.0, %v4258_v55  ;;  %v4257_v24 = vmul.f32 0.3275911, %v4245_v44 }
0x13c8   : > { %6486 = vpow2.f32 %v4438_v2  ;;  %v8536_v17 = vmul.f32 0.5, %v4123_v15  ;;  %v4440_v26 = vmul.f32 1.442695, %v4424_v21  ;;  %v8539_v16 = vadd.f32 %v4128_v19, %v8463_v9 }
0x13c9   : > { %v4259_v49 = vmul.f32 0.3275911, %v4247_v1  ;;  %v4415_v5 = vsub.f32 0.0, %v4247_v1  ;;  %6488 = vrcp.f32 %v4268_v33  ;;  %v4444_v28 = vmul.f32 1.442695, %v4426_v22 }
0x13ca   : > { %v8529_v40 = vpop.eup %6472  ;;  %v4425_v11 = vmul.f32 %v4413_v23, %v4245_v44  ;;  %6490 = vrcp.f32 %v4270_v41  ;;  %v4269_v10 = vadd.f32 1.0, %v4257_v24  ;;  %v8543_v37 = vmul.f32 0.70710677, %v8539_v16 }
0x13cb   : > { %v8532_v3 = vpop.eup %6474  ;;  %v4300_v51 = vmul.f32 1.0614054, %v8529_v40  ;;  %v4271_v43 = vadd.f32 1.0, %v4259_v49  ;;  %v4427_v61 = vmul.f32 %v4415_v5, %v4247_v1  ;;  %v8550_v9 = vadd.f32 %v8492_v31, %v8467_v18 }
0x13cc   : > { %v4302_v6 = vmul.f32 1.0614054, %v8532_v3  ;;  %v8545_v15 = vpop.eup %6476  ;;  %6492 = vpow2.f32 %v4440_v26  ;;  %v4248_v4 = vand.u32 2147483647, %v8543_v37  ;;  %v8557_v20 = vadd.f32 %v8497_v35, %v8471_v60 }
0x13cd   : > { %v4312_v25 = vadd.f32 -1.4531521, %v4300_v51  ;;  %v8552_v19 = vpop.eup %6478  ;;  %6494 = vpow2.f32 %v4444_v28  ;;  %v4442_v38 = vmul.f32 1.442695, %v4425_v11  ;;  %v8562_v52 = vmul.f32 0.70710677, %v8550_v9 }
0x13ce   : > { %v4314_v59 = vadd.f32 -1.4531521, %v4302_v6  ;;  %v8559_v48 = vpop.eup %6480  ;;  %6496 = vrcp.f32 %v4269_v10  ;;  %v4260_v55 = vmul.f32 0.3275911, %v4248_v4  ;;  %v4416_v57 = vsub.f32 0.0, %v4248_v4 }
0x13cf   : > { %v4324_v8 = vmul.f32 %v8529_v40, %v4312_v25  ;;  %v8564_v18 = vpop.eup %6482  ;;  %6498 = vrcp.f32 %v4271_v43  ;;  %v4446_v60 = vmul.f32 1.442695, %v4427_v61  ;;  %v4250_v35 = vand.u32 2147483647, %v8562_v52 }
0x13d0   : > { %v4326_v0 = vmul.f32 %v8532_v3, %v4314_v59  ;;  %v4272_v33 = vadd.f32 1.0, %v4260_v55  ;;  %v4428_v22 = vmul.f32 %v4416_v57, %v4248_v4  ;;  %v8572_v23 = vmul.f32 0.70710677, %v8557_v20 }
0x13d1   : > { %v4336_v45 = vadd.f32 1.4214138, %v4324_v8  ;;  %v8569_v2 = vpop.eup %6484  ;;  %6500 = vpow2.f32 %v4442_v38  ;;  %v4262_v41 = vmul.f32 0.3275911, %v4250_v35  ;;  %v4418_v24 = vsub.f32 0.0, %v4250_v35 }
0x13d2   : > { %v4338_v30 = vadd.f32 1.4214138, %v4326_v0  ;;  %v8574_v1 = vpop.eup %6486  ;;  %v4448_v49 = vmul.f32 1.442695, %v4428_v22  ;;  %v4249_v25 = vand.u32 2147483647, %v8572_v23  ;;  %v8580_v26 = vadd.f32 %v8499_v36, %v8473_v62 }
0x13d3   : > { %v4348_v31 = vmul.f32 %v8529_v40, %v4336_v45  ;;  %v8582_v5 = vpop.eup %6488  ;;  %v8586_v28 = vmul.f32 0.5, %v8495_v32  ;;  %6502 = vpow2.f32 %v4446_v60  ;;  %v4274_v11 = vadd.f32 1.0, %v4262_v41 }
0x13d4   : > { %v4350_v44 = vmul.f32 %v8532_v3, %v4338_v30  ;;  %v8588_v8 = vpop.eup %6490  ;;  %6504 = vrcp.f32 %v4272_v33  ;;  %v4261_v0 = vmul.f32 0.3275911, %v4249_v25  ;;  %v4417_v43 = vsub.f32 0.0, %v4249_v25 }
0x13d5   : > { %v4360_v21 = vadd.f32 -0.28449672, %v4348_v31  ;;  %vm4480_vm5 = vcmp.lt.f32.partialorder %v8479_v56, 0.0  ;;  %v8592_v62 = vmul.f32 0.5, %v8504_v7  ;;  %6506 = vpow2.f32 %v4448_v49 }
0x13d6   : > { %v4362_v51 = vadd.f32 -0.28449672, %v4350_v44  ;;  %v4430_v36 = vmul.f32 %v4418_v24, %v4250_v35  ;;  %v8594_v45 = vpop.eup %6492  ;;  %vm4482_vm6 = vcmp.lt.f32.partialorder %v8481_v29, 0.0  ;;  %v4273_v4 = vadd.f32 1.0, %v4261_v0 }
0x13d7   : > { %v4372_v6 = vmul.f32 %v8529_v40, %v4360_v21  ;;  %v4429_v30 = vmul.f32 %v4417_v43, %v4249_v25  ;;  %v8599_v38 = vmul.f32 0.70710677, %v8580_v26  ;;  %v8601_v31 = vpop.eup %6494  ;;  %6508 = vrcp.f32 %v4274_v11 }
0x13d8   : > { %v4374_v59 = vmul.f32 %v8532_v3, %v4362_v51  ;;  %v4301_v7 = vmul.f32 1.0614054, %v8559_v48  ;;  %v4303_v57 = vmul.f32 1.0614054, %v8569_v2  ;;  %v8606_v44 = vpop.eup %6496  ;;  %v8610_v60 = vmul.f32 0.5, %v8513_v46 }
0x13d9   : > { %v4384_v10 = vadd.f32 0.2548296, %v4372_v6  ;;  %6510 = vrcp.f32 %v4273_v4  ;;  %v4251_v35 = vand.u32 2147483647, %v8599_v38  ;;  %v8613_v21 = vpop.eup %6498  ;;  %v8616_v24 = vmul.f32 1.442695, %v4430_v36 }
0x13da   : > { %v4386_v61 = vadd.f32 0.2548296, %v4374_v59  ;;  %v4313_v22 = vadd.f32 -1.4531521, %v4301_v7  ;;  %v4315_v51 = vadd.f32 -1.4531521, %v4303_v57 }
0x13db   : > { %v4396_v32 = vmul.f32 %v8529_v40, %v4384_v10  ;;  %v4263_v6 = vmul.f32 0.3275911, %v4251_v35  ;;  %v4419_v49 = vsub.f32 0.0, %v4251_v35  ;;  %v8618_v25 = vpop.eup %6500  ;;  %v4305_v11 = vmul.f32 1.0614054, %v8606_v44 }
0x13dc   : > { %v4398_v55 = vmul.f32 %v8532_v3, %v4386_v61  ;;  %v4450_v3 = vmul.f32 1.442695, %v4429_v30  ;;  %v4325_v46 = vmul.f32 %v8559_v48, %v4313_v22  ;;  %v4327_v59 = vmul.f32 %v8569_v2, %v4315_v51 }
0x13dd   : > { %v4456_v40 = vmul.f32 %v8545_v15, %v4396_v32  ;;  %v4275_v0 = vadd.f32 1.0, %v4263_v6  ;;  %v4307_v43 = vmul.f32 1.0614054, %v8613_v21  ;;  %v8624_v61 = vpop.eup %6502  ;;  %v4317_v57 = vadd.f32 -1.4531521, %v4305_v11 }
0x13de   : > { %v4458_v33 = vmul.f32 %v8552_v19, %v4398_v55  ;;  %v4431_v19 = vmul.f32 %v4419_v49, %v4251_v35  ;;  %6512 = vpow2.f32 %v4450_v3  ;;  %v4337_v32 = vadd.f32 1.4214138, %v4325_v46  ;;  %v8626_v30 = vpop.eup %6504 }
0x13df   : > { %v4468_v41 = vsub.f32 1.0, %v4456_v40  ;;  %v4339_v4 = vadd.f32 1.4214138, %v4327_v59  ;;  %6514 = vrcp.f32 %v4275_v0  ;;  %v8630_v40 = vpop.eup %6506  ;;  %v4329_v6 = vmul.f32 %v8606_v44, %v4317_v57 }
0x13e0   : > { %v4470_v15 = vsub.f32 1.0, %v4458_v33  ;;  %v4454_v7 = vmul.f32 1.442695, %v4431_v19  ;;  %v4349_v22 = vmul.f32 %v8559_v48, %v4337_v32  ;;  %v4319_v49 = vadd.f32 -1.4531521, %v4307_v43 }
0x13e1   : > { %v4492_v10 = vsub.f32 0.0, %v4468_v41  ;;  %v4351_v3 = vmul.f32 %v8569_v2, %v4339_v4  ;;  %v8637_v56 = vpop.eup %6508  ;;  %v4304_v11 = vmul.f32 1.0614054, %v8582_v5  ;;  %v4306_v19 = vmul.f32 1.0614054, %v8588_v8 }
0x13e2   : > { %v4494_v36 = vsub.f32 0.0, %v4470_v15  ;;  %6516 = vpow2.f32 %v4454_v7  ;;  %v4361_v46 = vadd.f32 -0.28449672, %v4349_v22  ;;  %v4331_v0 = vmul.f32 %v8613_v21, %v4319_v49 }
0x13e3   : > { %v4504_v55 = vsel %vm4480_vm5, %v4492_v10, %v4468_v41  ;;  %v4363_v59 = vadd.f32 -0.28449672, %v4351_v3  ;;  %v8643_v29 = vpop.eup %6510  ;;  %v4341_v10 = vadd.f32 1.4214138, %v4329_v6  ;;  %v4318_v7 = vadd.f32 -1.4531521, %v4306_v19 }
0x13e4   : > { %v4516_v33 = vadd.f32 1.0, %v4504_v55  ;;  %v4506_v35 = vsel %vm4482_vm6, %v4494_v36, %v4470_v15  ;;  %v4373_v43 = vmul.f32 %v8559_v48, %v4361_v46  ;;  %v4309_v32 = vmul.f32 1.0614054, %v8643_v29 }
0x13e5   : > { %v4518_v51 = vadd.f32 1.0, %v4506_v35  ;;  %v4375_v36 = vmul.f32 %v8569_v2, %v4363_v59  ;;  %v4353_v4 = vmul.f32 %v8606_v44, %v4341_v10  ;;  %v4343_v55 = vadd.f32 1.4214138, %v4331_v0 }
0x13e6   : > { %v8640_v41 = vmul.f32 %v4516_v33, %v8506_v42  ;;  %v4316_v42 = vadd.f32 -1.4531521, %v4304_v11  ;;  %v4308_v57 = vmul.f32 1.0614054, %v8626_v30  ;;  %v4321_v22 = vadd.f32 -1.4531521, %v4309_v32 }
0x13e7   : > { %v8646_v15 = vmul.f32 %v4518_v51, %v8520_v63  ;;  %v4385_v63 = vadd.f32 0.2548296, %v4373_v43  ;;  %v4387_v33 = vadd.f32 0.2548296, %v4375_v36  ;;  %vm4481_vm7 = vcmp.lt.f32.partialorder %v8483_v53, 0.0 }
0x13e8   : > { %v4328_v35 = vmul.f32 %v8582_v5, %v4316_v42  ;;  %vm4483_vm8 = vcmp.lt.f32.partialorder %v8485_v54, 0.0  ;;  %v4365_v3 = vadd.f32 -0.28449672, %v4353_v4  ;;  %v4355_v51 = vmul.f32 %v8613_v21, %v4343_v55  ;;  %v8660_v46 = vpop.eup %6512 }
0x13e9   : > { %v4330_v6 = vmul.f32 %v8588_v8, %v4318_v7  ;;  %v4320_v49 = vadd.f32 -1.4531521, %v4308_v57  ;;  %v4397_v59 = vmul.f32 %v8559_v48, %v4385_v63  ;;  %v4399_v11 = vmul.f32 %v8569_v2, %v4387_v33  ;;  %v8665_v19 = vpop.eup %6514 }
0x13ea   : > { %v4340_v10 = vadd.f32 1.4214138, %v4328_v35  ;;  %v4333_v0 = vmul.f32 %v8643_v29, %v4321_v22  ;;  %v4377_v43 = vmul.f32 %v8606_v44, %v4365_v3  ;;  %v4367_v36 = vadd.f32 -0.28449672, %v4355_v51 }
0x13eb   : > { %v4342_v42 = vadd.f32 1.4214138, %v4330_v6  ;;  %v4332_v32 = vmul.f32 %v8626_v30, %v4320_v49  ;;  %v4457_v4 = vmul.f32 %v8564_v18, %v4397_v59  ;;  %v4459_v55 = vmul.f32 %v8574_v1, %v4399_v11 }
0x13ec   : > { %v4352_v7 = vmul.f32 %v8582_v5, %v4340_v10  ;;  %v4345_v48 = vadd.f32 1.4214138, %v4333_v0  ;;  %v8672_v57 = vpop.eup %6516  ;;  %v4389_v2 = vadd.f32 0.2548296, %v4377_v43  ;;  %v4379_v63 = vmul.f32 %v8613_v21, %v4367_v36 }
0x13ed   : > { %v4354_v33 = vmul.f32 %v8588_v8, %v4342_v42  ;;  %v4311_v35 = vmul.f32 1.0614054, %v8665_v19  ;;  %vm4485_vm9 = vcmp.lt.f32.partialorder %v8517_v50, 0.0  ;;  %v4469_v22 = vsub.f32 1.0, %v4457_v4 }
0x13ee   : > { %v4471_v3 = vsub.f32 1.0, %v4459_v55  ;;  %v4364_v51 = vadd.f32 -0.28449672, %v4352_v7  ;;  %v4357_v18 = vmul.f32 %v8643_v29, %v4345_v48  ;;  %v4401_v1 = vmul.f32 %v8606_v44, %v4389_v2 }
0x13ef   : > { %v4391_v6 = vadd.f32 0.2548296, %v4379_v63  ;;  %v4366_v49 = vadd.f32 -0.28449672, %v4354_v33  ;;  %v4323_v59 = vadd.f32 -1.4531521, %v4311_v35  ;;  %6518 = vpow2.f32 %v8616_v24 }
0x13f0   : > { %vm4487_vm10 = vcmp.lt.f32.partialorder %v8523_v27, 0.0  ;;  %v4493_v11 = vsub.f32 0.0, %v4469_v22  ;;  %v4495_v10 = vsub.f32 0.0, %v4471_v3  ;;  %v4376_v0 = vmul.f32 %v8582_v5, %v4364_v51 }
0x13f1   : > { %v4369_v43 = vadd.f32 -0.28449672, %v4357_v18  ;;  %v4461_v36 = vmul.f32 %v8618_v25, %v4401_v1  ;;  %v4403_v42 = vmul.f32 %v8613_v21, %v4391_v6  ;;  %v4378_v4 = vmul.f32 %v8588_v8, %v4366_v49 }
0x13f2   : > { %v4335_v55 = vmul.f32 %v8665_v19, %v4323_v59  ;;  %v4505_v44 = vsel %vm4481_vm7, %v4493_v11, %v4469_v22  ;;  %v4507_v7 = vsel %vm4483_vm8, %v4495_v10, %v4471_v3  ;;  %v4388_v48 = vadd.f32 0.2548296, %v4376_v0 }
0x13f3   : > { %v4381_v2 = vmul.f32 %v8643_v29, %v4369_v43  ;;  %vm4484_vm11 = vcmp.lt.f32.partialorder %v8501_v39, 0.0  ;;  %v4517_v63 = vadd.f32 1.0, %v4505_v44  ;;  %v4519_v33 = vadd.f32 1.0, %v4507_v7 }
0x13f4   : > { %v4473_v25 = vsub.f32 1.0, %v4461_v36  ;;  %v4463_v21 = vmul.f32 %v8624_v61, %v4403_v42  ;;  %v4400_v35 = vmul.f32 %v8582_v5, %v4388_v48  ;;  %v4390_v51 = vadd.f32 0.2548296, %v4378_v4 }
0x13f5   : > { %v4393_v18 = vadd.f32 0.2548296, %v4381_v2  ;;  %v4347_v1 = vadd.f32 1.4214138, %v4335_v55  ;;  %v4529_v53 = vmul.f32 %v4517_v63, %v8525_v12  ;;  %v4531_v54 = vmul.f32 %v4519_v33, %v8527_v34 }
0x13f6   : > { %v4497_v22 = vsub.f32 0.0, %v4473_v25  ;;  %v4475_v3 = vsub.f32 1.0, %v4463_v21  ;;  %v4460_v6 = vmul.f32 %v8594_v45, %v4400_v35  ;;  %v4402_v49 = vmul.f32 %v8588_v8, %v4390_v51 }
0x13f7   : > { %v4405_v59 = vmul.f32 %v8643_v29, %v4393_v18  ;;  %v4359_v11 = vmul.f32 %v8665_v19, %v4347_v1  ;;  %4668 = vmatprep.mubr.f32.mxu0 %v4529_v53  ;;  %4748 = vmatprep.mubr.f32.mxu1 %v4531_v54  ;;  %v4344_v10 = vadd.f32 1.4214138, %v4332_v32  ;;  %v4310_v12 = vmul.f32 1.0614054, %v8637_v56 }
0x13f8   : > { %v4509_v5 = vsel %vm4485_vm9, %v4497_v22, %v4473_v25  ;;  %v4499_v61 = vsub.f32 0.0, %v4475_v3  ;;  %4669 = vmatmul.mubr.f32.vlgmr.msra.gmra.mrb[84].mxu0 %v8640_v41  ;;  %4749 = vmatmul.mubr.f32.vlgmr.msra.gmra.mrb[84].mxu1 %v8646_v15  ;;  %v4472_v45 = vsub.f32 1.0, %v4460_v6  ;;  %v4462_v8 = vmul.f32 %v8601_v31, %v4402_v49 }
0x13f9   : > { %v4521_v34 = vadd.f32 1.0, %v4509_v5  ;;  %v4465_v29 = vmul.f32 %v8660_v46, %v4405_v59  ;;  %v4371_v43 = vadd.f32 -0.28449672, %v4359_v11  ;;  %v4356_v50 = vmul.f32 %v8626_v30, %v4344_v10 }
0x13fa   : > { %v4511_v0 = vsel %vm4487_vm10, %v4499_v61, %v4475_v3  ;;  %v4322_v36 = vadd.f32 -1.4531521, %v4310_v12  ;;  %v4496_v4 = vsub.f32 0.0, %v4472_v45  ;;  %v4474_v41 = vsub.f32 1.0, %v4462_v8 }
0x13fb   : > { %v4533_v32 = vmul.f32 %v4521_v34, %v8592_v62  ;;  %v4523_v42 = vadd.f32 1.0, %v4511_v0  ;;  %v4477_v55 = vsub.f32 1.0, %v4465_v29  ;;  %v4383_v15 = vmul.f32 %v8665_v19, %v4371_v43 }
0x13fc   : > { %v4368_v44 = vadd.f32 -0.28449672, %v4356_v50  ;;  %v4334_v31 = vmul.f32 %v8637_v56, %v4322_v36  ;;  %vm4486_vm12 = vcmp.lt.f32.partialorder %v8509_v13, 0.0  ;;  %v4508_v46 = vsel %vm4484_vm11, %v4496_v4, %v4472_v45 }
0x13fd   : > { %4673 = vmatprep.mubr.f32.mxu0 %v4533_v32  ;;  %v4535_v27 = vmul.f32 %v4523_v42, %v8610_v60  ;;  %v4498_v7 = vsub.f32 0.0, %v4474_v41  ;;  %v4520_v48 = vadd.f32 1.0, %v4508_v46  ;;  %v4501_v62 = vsub.f32 0.0, %v4477_v55 }
0x13fe   : > { %v4395_v2 = vadd.f32 0.2548296, %v4383_v15  ;;  %v4380_v63 = vmul.f32 %v8626_v30, %v4368_v44  ;;  %vm4489_vm13 = vcmp.lt.f32.partialorder %v8572_v23, 0.0  ;;  %v4346_v25 = vadd.f32 1.4214138, %v4334_v31 }
0x13ff   : > { %4753 = vmatprep.mubr.f32.mxu1 %v4535_v27  ;;  %v4510_v33 = vsel %vm4486_vm12, %v4498_v7, %v4474_v41  ;;  %v4532_v13 = vmul.f32 %v4520_v48, %v8536_v17  ;;  %v4513_v60 = vsel %vm4489_vm13, %v4501_v62, %v4477_v55  ;;  %v4225_v35 = vmul.f32 0.5, %v8557_v20 }
0x1400   : > { %v4522_v21 = vadd.f32 1.0, %v4510_v33  ;;  %v4407_v39 = vmul.f32 %v8665_v19, %v4395_v2  ;;  %v4525_v51 = vadd.f32 1.0, %v4513_v60  ;;  %v4392_v18 = vadd.f32 0.2548296, %v4380_v63 }
0x1401   : > { %v4358_v1 = vmul.f32 %v8637_v56, %v4346_v25  ;;  %4674 = vmatmul.mubr.f32.gmra.mrb[86].mxu0 %v4532_v13  ;;  %vm4491_vm14 = vcmp.lt.f32.partialorder %v8599_v38, 0.0  ;;  %vm4488_vm15 = vcmp.lt.f32.partialorder %v8543_v37, 0.0  ;;  %v4224_v12 = vmul.f32 0.5, %v8539_v16 }
0x1402   : > { %v4534_v24 = vmul.f32 %v4522_v21, %v8586_v28  ;;  %v4467_v23 = vmul.f32 %v8672_v57, %v4407_v39  ;;  %v4537_v53 = vmul.f32 %v4525_v51, %v4225_v35  ;;  %v4404_v54 = vmul.f32 %v8626_v30, %v4392_v18  ;;  %v6519_v28 = vpop.eup %6518 }
0x1403   : > { %v4370_v22 = vadd.f32 -0.28449672, %v4358_v1  ;;  %v4227_v57 = vmul.f32 0.5, %v8580_v26  ;;  %vm4490_vm0 = vcmp.lt.f32.partialorder %v8562_v52, 0.0  ;;  %v5211_v52 = vld [vmem:[%s895_s6] ss:$0 sm:$0xff] }
0x1404   : > { %4754 = vmatmul.mubr.f32.gmra.mrb[86].mxu1 %v4534_v24  ;;  %v4479_v17 = vsub.f32 1.0, %v4467_v23  ;;  %4678 = vmatprep.mubr.f32.mxu0 %v4537_v53  ;;  %v4464_v19 = vmul.f32 %v8630_v40, %v4404_v54  ;;  %s6111_s6 = smul.u32 384, %s8967_s23 }
0x1405   : > { %v4382_v20 = vmul.f32 %v8637_v56, %v4370_v22 }
0x1406   : > { %v4503_v3 = vsub.f32 0.0, %v4479_v17  ;;  %v4476_v6 = vsub.f32 1.0, %v4464_v19  ;;  %s8751_s2 = scalar_lea.hbm %s8969_s13, %s6111_s6 }
0x1407   : > { %v4394_v49 = vadd.f32 0.2548296, %v4382_v20 }
0x1408   : > { %v4515_v59 = vsel %vm4491_vm14, %v4503_v3, %v4479_v17  ;;  %v4500_v5 = vsub.f32 0.0, %v4476_v6 }
0x1409   : > { %v4527_v11 = vadd.f32 1.0, %v4515_v59  ;;  %v4406_v30 = vmul.f32 %v8637_v56, %v4394_v49  ;;  %v4226_v56 = vmul.f32 0.5, %v8550_v9 }
0x140a   : > { %v4512_v10 = vsel %vm4488_vm15, %v4500_v5, %v4476_v6 }
0x140b   : > { %v4539_v61 = vmul.f32 %v4527_v11, %v4227_v57  ;;  %v4466_v40 = vmul.f32 %v6519_v28, %v4406_v30  ;;  %v4524_v34 = vadd.f32 1.0, %v4512_v10 }
0x140d   : > { %4758 = vmatprep.mubr.f32.mxu1 %v4539_v61  ;;  %v4478_v38 = vsub.f32 1.0, %v4466_v40  ;;  %v4536_v45 = vmul.f32 %v4524_v34, %v4224_v12 }
0x140f   : > { %v4502_v8 = vsub.f32 0.0, %v4478_v38  ;;  %4679 = vmatmul.mubr.f32.gmra.mrb[88].mxu0 %v4536_v45 }
0x1411   : > { %v4514_v26 = vsel %vm4490_vm0, %v4502_v8, %v4478_v38 }
0x1412   : > { %v4526_v29 = vadd.f32 1.0, %v4514_v26 }
0x1414   : > { %v4538_v37 = vmul.f32 %v4526_v29, %v4226_v56 }
0x1416   : > { %4759 = vmatmul.mubr.f32.gmra.mrb[88].mxu1 %v4538_v37 }
0x14cb   : > { %v5405_v0 = vpop.f32.mrb[84].mxu0  ;;  %v5446_v43 = vpop.f32.mrb[84].mxu1 }
0x14cc   : > { %v5406_v50 = vpop.f32.mrb[85].mxu0  ;;  %v5447_v16 = vpop.f32.mrb[85].mxu1 }
0x14cd   : > { %v5407_v36 = vadd.f32 %v5406_v50, %v5405_v0  ;;  %v5448_v32 = vadd.f32 %v5447_v16, %v5446_v43 }
0x14cf   : > { %v4751_v42 = vadd.f32 %v5448_v32, %v5407_v36 }
0x14d1   : > { %v4764_v4 = vadd.f32 %v4751_v42, %v8288_v58 }
0x14d3   : > { %v4774_v41 = vadd.f32 %v5211_v52, %v4764_v4 }
0x14d4   : > { %v5408_v9 = vpop.f32.mrb[86].mxu0 }
0x14d5   : > { %4777 = vst [vmem:[%s7606_s5] sm:$0xff] %v4774_v41  ;;  %v5409_v55 = vpop.f32.mrb[87].mxu0 }
0x14d6   : > { %v5410_v44 = vadd.f32 %v5409_v55, %v5408_v9 }
0x14d7   : > { %v5449_v15 = vpop.f32.mrb[86].mxu1 }
0x14d8   : > { %v5450_v31 = vpop.f32.mrb[87].mxu1 }
0x14d9   : > { %v5451_v27 = vadd.f32 %v5450_v31, %v5449_v15 }
0x14db   : > { %v4756_v46 = vadd.f32 %v5451_v27, %v5410_v44 }
0x14dd   : > { %v4765_v7 = vadd.f32 %v4756_v46, %v8292_v47 }
0x14df   : > { %v4775_v48 = vadd.f32 %v5211_v52, %v4765_v7 }
0x14e1   : > { %4778 = vst [vmem:[%s7606_s5 + $0x8] sm:$0xff] %v4775_v48 }
0x14e2   : > { %v5411_v62 = vpop.f32.mrb[88].mxu0 }
0x14e3   : > { %v5412_v2 = vpop.f32.mrb[89].mxu0 }
0x14e4   : > { %v5413_v58 = vadd.f32 %v5412_v2, %v5411_v62 }
0x14e9   : > { %v5452_v63 = vpop.f32.mrb[88].mxu1 }
0x14ea   : > { %v5453_v33 = vpop.f32.mrb[89].mxu1 }
0x14eb   : > { %v5454_v25 = vadd.f32 %v5453_v33, %v5452_v63 }
0x14ed   : > { %v4761_v13 = vadd.f32 %v5454_v25, %v5413_v58 }
0x14ef   : > { %v4766_v21 = vadd.f32 %v4761_v13, %v8296_v14 }
0x14f1   : > { %v4776_v60 = vadd.f32 %v5211_v52, %v4766_v21 }
0x14f3   : > { %4779 = vst [vmem:[%s7606_s5 + $0x10] sm:$0xff] %v4776_v60 }
0x14f4   : > { %6830 = shalt.err (!%p6827_p12)
}
0x14f5   : > { %s6831_s5 = scalar_lea.hbm %s8751_s2, 384  ;;  %s6835_s30 = scalar_lea.hbm %s8969_s13, 768 }
0x14f6   : > { %p6832_p10 = scmp.ne.s32.totalorder %s8751_s2, %s6831_s5  ;;  %p6836_p9 = scmp.lt.u32.totalorder %s8751_s2, %s8969_s13 }
0x14f7   : > { %p6837_p13 = scmp.lt.u32.totalorder %s6835_s30, %s6831_s5  ;;  %p6839_p1 = scmp.lt.u32.totalorder %s6831_s5, %s8751_s2 }
0x14f8   : > { %p6833_p11 = pnand %p6832_p10, %p8971_p3 }
0x14f9   : > { %p6838_p5 = por %p6837_p13, %p6836_p9 }
0x14fa   : > { %p6834_p0 = pneg %p6833_p11 }
0x14fb   : > { %p6840_p8 = por %p6839_p1, %p6838_p5 }
0x14fd   : > { %p6841_p6 = pnand %p6840_p8, %p6834_p0 }
0x14ff   : > { %6844 = shalt.err (!%p6841_p6)
}
0x1500   : > { %s6982_s24 = smov 128  }
0x1501   : > { %6138 = dma.vmem_to_hbm [thread:$0]  (%p8971_p3), %s8753_s0, 384, %s8751_s2, %s8758_s8, %s6982_s24, %s6982_s24, %s6972_s29  }
0x1502 PF: > { %s8972_s9 = sld [smem:[#allocation30_spill]]  ;;  %s8973_s16 = sld [smem:[#allocation24_spill]] }
0x1503   : > { %s8974_s26 = sld [smem:[#allocation36_spill]] }
0x1508   : > { %p6183_p7 = scmp.ge.s32.totalorder %s8972_s9, 2  ;;  %s4809_s21 = sand.u32 1, %s8973_s16  }
0x1509   : > { %p8975_p2 = scmp.ne.s32.totalorder %s8974_s26, 0  ;;  %s4810_s15 = scalar_lea.sflag [#allocation4], %s4809_s21 }
0x150b   : > { %p6173_p4 = pnand %p6183_p7, %p8975_p2 }
0x150d   : > { %6906 = dma.done.wait (!%p6173_p4), %s4810_s15, 384  }
0x150e   : > { %6908 = vsyncadd (!%p6173_p4), %s4810_s15, 4294966912  ;;  %s34_s0 = sadd.s32 1, %s8972_s9   ;;  %s8976_s21 = sld [smem:[#allocation22_spill]] }
0x150f   : > { %p31_p12 = scmp.ge.s32.totalorder %s34_s0, 8   ;;  %s8977_s22 = sld [smem:[#allocation23_spill]] }
0x1510   : > { %s8978_s23 = sld [smem:[#allocation33_spill]]  ;;  %s8979_s14 = sld [smem:[#allocation25_spill]] }
0x1511   : > { %s8980_s26 = sld [smem:[#allocation34_spill]]  ;;  %s8981_s27 = sld [smem:[#allocation28_spill]] }
0x1512   : > { %s8982_s28 = sld [smem:[#allocation29_spill]]  ;;  %s8983_s29 = sld [smem:[#allocation31_spill]] }
0x1513   : > { %s8984_s30 = sld [smem:[#allocation32_spill]]  ;;  %s8985_s24 = smov %s6927_s25 }
0x1514   :  { %33 = sbr.rel (!%p31_p12) target bundleno = 29 (0x1d), region = 229 }
0x1516   : > { %s8986_s25 = smov %s8979_s14 }
0x151b   :  { %4815 = vsyncpa [#allocation3], 1 }
0x151c   :  { %4817 = vsyncpa [#allocation3 + $0x1], 1 }
0x151d   :  { %4818 = vsyncpa [#allocation6], 1 }
0x151e   :  { %4819 = vsyncpa [#allocation9], 1 }
0x151f   :  { %4820 = vsyncpa [#allocation4], 1 }
0x1520   :  { %4822 = vsyncpa [#allocation4 + $0x1], 1 }

</bundles_post_ra>
